<compile_context>
chip_gen: v6e
topology: v6e:2x2x1
jax: 0.10.0
libtpu: 0.0.40
codegen_flags: <defaults>
</compile_context>

<pallas_src>
import functools

import jax
import jax.numpy as jnp
from jax.experimental import pallas as pl
from jax.experimental.pallas import tpu as pltpu

LN_EPS = 1e-5            # nn.LayerNorm default eps
N_CLASSES = 2
PER_LAYER_PARAMS = 16    # wq,bq, wk,bk, wv,bv, wo,bo, w1,b1, w2,b2, g1,beta1, g2,beta2


# ---------------------------------------------------------------------------
# Kernel
# ---------------------------------------------------------------------------
def _layer_norm(x, gamma, beta):
    # One-pass (biased) variance: mean(x*x) - mu^2 -> single extra XLU reduction per LN.
    mu = jnp.mean(x, axis=-1, keepdims=True)
    var = jnp.mean(x * x, axis=-1, keepdims=True) - mu * mu
    return (x - mu) * jax.lax.rsqrt(var + LN_EPS) * gamma + beta


def _fused_forward_kernel(num_heads, num_layers, compute_dtype, *refs):
    """Whole ChurnTransformer forward for one batch row; everything resident in VMEM."""
    x_ref = refs[0]
    emb_w, emb_b = refs[1], refs[2]
    layer_refs = refs[3:3 + PER_LAYER_PARAMS * num_layers]
    cls_w = refs[3 + PER_LAYER_PARAMS * num_layers]
    cls_b = refs[4 + PER_LAYER_PARAMS * num_layers]
    o_ref = refs[5 + PER_LAYER_PARAMS * num_layers]

    def mm(a, b):  # MXU matmul with f32 accumulation; bf16 inputs if compute_dtype=bfloat16
        return jnp.dot(a.astype(compute_dtype), b.astype(compute_dtype),
                       preferred_element_type=jnp.float32)

    # --- embedding: (S, Din) @ (Din, D) + b ---
    x = x_ref[0]                                    # (S, Din)  (batch dim squeezed)
    h = mm(x, emb_w[...]) + emb_b[...]              # (S, D)
    S, D = h.shape
    hd = D // num_heads

    # --- encoder layers (post-norm, relu, dropout = identity in eval mode) ---
    for li in range(num_layers):
        (wq, bq, wk, bk, wv, bv, wo, bo,
         w1, b1, w2, b2, g1, be1, g2, be2) = layer_refs[PER_LAYER_PARAMS * li:
                                                        PER_LAYER_PARAMS * (li + 1)]

        # self-attention: 1/sqrt(hd) is already folded into wq/bq on the host
        q = mm(h, wq[...]) + bq[...]                # (S, D)
        k = mm(h, wk[...]) + bk[...]
        v = mm(h, wv[...]) + bv[...]

        qh = q.reshape(S, num_heads, hd).transpose(1, 0, 2)   # (H, S, hd)
        kh = k.reshape(S, num_heads, hd).transpose(1, 0, 2)
        vh = v.reshape(S, num_heads, hd).transpose(1, 0, 2)

        s = jnp.einsum('hqd,hkd->hqk',
                       qh.astype(compute_dtype), kh.astype(compute_dtype),
                       preferred_element_type=jnp.float32)    # (H, S, S)
        s = s - jnp.max(s, axis=-1, keepdims=True)
        p = jnp.exp(s)
        p = p * pl.reciprocal(jnp.sum(p, axis=-1, keepdims=True), approx=True)

        ctx = jnp.einsum('hqk,hkd->hqd',
                         p.astype(compute_dtype), vh.astype(compute_dtype),
                         preferred_element_type=jnp.float32)  # (H, S, hd)
        ctx = ctx.transpose(1, 0, 2).reshape(S, D)            # (S, D)

        attn_out = mm(ctx, wo[...]) + bo[...]
        h = _layer_norm(h + attn_out, g1[...], be1[...])      # norm1 (post-norm)

        ff = jnp.maximum(mm(h, w1[...]) + b1[...], 0.0)       # linear1 + relu
        ff = mm(ff, w2[...]) + b2[...]                        # linear2
        h = _layer_norm(h + ff, g2[...], be2[...])            # norm2

    # --- mean pool over sequence + classifier ---
    pooled = jnp.mean(h, axis=0, keepdims=True)               # (1, D)
    logits = mm(pooled, cls_w[...]) + cls_b[...]              # (1, 2)
    o_ref[...] = logits.reshape(1, 1, N_CLASSES)


# ---------------------------------------------------------------------------
# Wrapper
# ---------------------------------------------------------------------------
def churn_transformer_forward(x, params, num_heads, compute_dtype=jnp.float32):
    B, S, Din = x.shape
    num_layers = len(params["layers"])

    flat_w = [params["emb_w"], params["emb_b"]]
    for layer in params["layers"]:
        flat_w.extend(layer)
    flat_w.extend([params["cls_w"], params["cls_b"]])

    # x: one batch row per grid step; weights: whole array, constant block index (no re-DMA).
    in_specs = [pl.BlockSpec((1, S, Din), lambda b: (b, 0, 0))]
    for w in flat_w:
        in_specs.append(pl.BlockSpec(w.shape, lambda b, n=w.ndim: (0,) * n))

    kernel = functools.partial(_fused_forward_kernel, num_heads, num_layers,
                               compute_dtype)
    out = pl.pallas_call(
        kernel,
        grid=(B,),
        out_shape=jax.ShapeDtypeStruct((B, 1, N_CLASSES), jnp.float32),
        in_specs=in_specs,
        out_specs=pl.BlockSpec((1, 1, N_CLASSES), lambda b: (b, 0, 0)),
        compiler_params=pltpu.CompilerParams(
            dimension_semantics=("parallel",)),   # shards the batch across v7x's 2 TCs
    )(x, *flat_w)
    return out.reshape(B, N_CLASSES)


# ---------------------------------------------------------------------------
# Deterministic parameter init (synthetic; mirrors the PyTorch module's shapes).
# Linear weights are pre-transposed to (in_features, out_features); biases are (1, features).
# The MHA in_proj is pre-split into q/k/v, with 1/sqrt(head_dim) folded into Wq/bq.
# ---------------------------------------------------------------------------
def init_params(key, input_dim, d_model, num_heads, num_layers):
    ff_hidden = 2 * d_model                 # dim_feedforward * 2 in the PyTorch module
    hd = d_model // num_heads
    scale = 1.0 / (hd ** 0.5)

    def dense(k, fan_in, fan_out):
        kw, kb = jax.random.split(k)
        bound = 1.0 / (fan_in ** 0.5)
        w = jax.random.uniform(kw, (fan_in, fan_out), jnp.float32, -bound, bound)
        b = jax.random.uniform(kb, (1, fan_out), jnp.float32, -bound, bound)
        return w, b

    keys = jax.random.split(key, 2 + num_layers)
    emb_w, emb_b = dense(keys[0], input_dim, d_model)
    cls_w, cls_b = dense(keys[1], d_model, N_CLASSES)

    layers = []
    for li in range(num_layers):
        ks = jax.random.split(keys[2 + li], 6)
        wq, bq = dense(ks[0], d_model, d_model)      # MHA q-proj (scale folded below)
        wk, bk = dense(ks[1], d_model, d_model)      # MHA k-proj
        wv, bv = dense(ks[2], d_model, d_model)      # MHA v-proj
        wo, bo = dense(ks[3], d_model, d_model)      # MHA out_proj
        w1, b1 = dense(ks[4], d_model, ff_hidden)    # linear1
        w2, b2 = dense(ks[5], ff_hidden, d_model)    # linear2
        wq, bq = wq * scale, bq * scale              # fold attention scale into q projection
        g1 = jnp.ones((1, d_model), jnp.float32)
        be1 = jnp.zeros((1, d_model), jnp.float32)
        g2 = jnp.ones((1, d_model), jnp.float32)
        be2 = jnp.zeros((1, d_model), jnp.float32)
        layers.append((wq, bq, wk, bk, wv, bv, wo, bo,
                       w1, b1, w2, b2, g1, be1, g2, be2))

    return {"emb_w": emb_w, "emb_b": emb_b, "layers": layers,
            "cls_w": cls_w, "cls_b": cls_b}


# ---------------------------------------------------------------------------
if __name__ == "__main__":
    # Shapes follow the module defaults: d_model = dim_feedforward = 128 (lane-dense),
    # nhead = 4, num_layers = 2, ff hidden = 256; small batch/seq/input_dim.
    B, S, INPUT_DIM = 2, 8, 16
    D_MODEL, NUM_HEADS, NUM_LAYERS = 128, 4, 2

    key = jax.random.PRNGKey(0)
    kx, kp = jax.random.split(key)
    x = jax.random.normal(kx, (B, S, INPUT_DIM), jnp.float32)
    params = init_params(kp, INPUT_DIM, D_MODEL, NUM_HEADS, NUM_LAYERS)

    # compute_dtype=jnp.bfloat16 enables bf16 MXU inputs on v6e/v7x (f32 accumulation);
    # default float32 keeps exact PyTorch eval semantics.
    out = churn_transformer_forward(x, params, NUM_HEADS, compute_dtype=jnp.float32)
    jax.block_until_ready(out)
    assert out.shape == (B, N_CLASSES) and out.dtype == jnp.float32
    print("KERNEL_OK")
</pallas_src>

<mosaic_0001>
module attributes {stable_mosaic.version = 11 : i64} {
  func.func @_fused_forward_kernel(%arg0: i32, %arg1: memref<1x8x16xf32, #tpu.memory_space<vmem>>, %arg2: memref<16x128xf32, #tpu.memory_space<vmem>>, %arg3: memref<1x128xf32, #tpu.memory_space<vmem>>, %arg4: memref<128x128xf32, #tpu.memory_space<vmem>>, %arg5: memref<1x128xf32, #tpu.memory_space<vmem>>, %arg6: memref<128x128xf32, #tpu.memory_space<vmem>>, %arg7: memref<1x128xf32, #tpu.memory_space<vmem>>, %arg8: memref<128x128xf32, #tpu.memory_space<vmem>>, %arg9: memref<1x128xf32, #tpu.memory_space<vmem>>, %arg10: memref<128x128xf32, #tpu.memory_space<vmem>>, %arg11: memref<1x128xf32, #tpu.memory_space<vmem>>, %arg12: memref<128x256xf32, #tpu.memory_space<vmem>>, %arg13: memref<1x256xf32, #tpu.memory_space<vmem>>, %arg14: memref<256x128xf32, #tpu.memory_space<vmem>>, %arg15: memref<1x128xf32, #tpu.memory_space<vmem>>, %arg16: memref<1x128xf32, #tpu.memory_space<vmem>>, %arg17: memref<1x128xf32, #tpu.memory_space<vmem>>, %arg18: memref<1x128xf32, #tpu.memory_space<vmem>>, %arg19: memref<1x128xf32, #tpu.memory_space<vmem>>, %arg20: memref<128x128xf32, #tpu.memory_space<vmem>>, %arg21: memref<1x128xf32, #tpu.memory_space<vmem>>, %arg22: memref<128x128xf32, #tpu.memory_space<vmem>>, %arg23: memref<1x128xf32, #tpu.memory_space<vmem>>, %arg24: memref<128x128xf32, #tpu.memory_space<vmem>>, %arg25: memref<1x128xf32, #tpu.memory_space<vmem>>, %arg26: memref<128x128xf32, #tpu.memory_space<vmem>>, %arg27: memref<1x128xf32, #tpu.memory_space<vmem>>, %arg28: memref<128x256xf32, #tpu.memory_space<vmem>>, %arg29: memref<1x256xf32, #tpu.memory_space<vmem>>, %arg30: memref<256x128xf32, #tpu.memory_space<vmem>>, %arg31: memref<1x128xf32, #tpu.memory_space<vmem>>, %arg32: memref<1x128xf32, #tpu.memory_space<vmem>>, %arg33: memref<1x128xf32, #tpu.memory_space<vmem>>, %arg34: memref<1x128xf32, #tpu.memory_space<vmem>>, %arg35: memref<1x128xf32, #tpu.memory_space<vmem>>, %arg36: memref<128x2xf32, #tpu.memory_space<vmem>>, %arg37: memref<1x2xf32, #tpu.memory_space<vmem>>, %arg38: memref<1x1x2xf32, #tpu.memory_space<vmem>>) attributes {dimension_semantics = [#tpu.dimension_semantics<parallel>], iteration_bounds = array<i64: 2>, scalar_prefetch = 0 : i64, scratch_operands = 0 : i64, tpu.core_type = #tpu.core_type<tc>, window_params = [{transform_indices = @transform_0, window_bounds = array<i64: 1, 8, 16>}, {pipeline_mode = #tpu.pipeline_mode<synchronous>, transform_indices = @transform_1, window_bounds = array<i64: 16, 128>}, {pipeline_mode = #tpu.pipeline_mode<synchronous>, transform_indices = @transform_2, window_bounds = array<i64: 1, 128>}, {pipeline_mode = #tpu.pipeline_mode<synchronous>, transform_indices = @transform_3, window_bounds = array<i64: 128, 128>}, {pipeline_mode = #tpu.pipeline_mode<synchronous>, transform_indices = @transform_4, window_bounds = array<i64: 1, 128>}, {pipeline_mode = #tpu.pipeline_mode<synchronous>, transform_indices = @transform_5, window_bounds = array<i64: 128, 128>}, {pipeline_mode = #tpu.pipeline_mode<synchronous>, transform_indices = @transform_6, window_bounds = array<i64: 1, 128>}, {pipeline_mode = #tpu.pipeline_mode<synchronous>, transform_indices = @transform_7, window_bounds = array<i64: 128, 128>}, {pipeline_mode = #tpu.pipeline_mode<synchronous>, transform_indices = @transform_8, window_bounds = array<i64: 1, 128>}, {pipeline_mode = #tpu.pipeline_mode<synchronous>, transform_indices = @transform_9, window_bounds = array<i64: 128, 128>}, {pipeline_mode = #tpu.pipeline_mode<synchronous>, transform_indices = @transform_10, window_bounds = array<i64: 1, 128>}, {pipeline_mode = #tpu.pipeline_mode<synchronous>, transform_indices = @transform_11, window_bounds = array<i64: 128, 256>}, {pipeline_mode = #tpu.pipeline_mode<synchronous>, transform_indices = @transform_12, window_bounds = array<i64: 1, 256>}, {pipeline_mode = #tpu.pipeline_mode<synchronous>, transform_indices = @transform_13, window_bounds = array<i64: 256, 128>}, {pipeline_mode = #tpu.pipeline_mode<synchronous>, transform_indices = @transform_14, window_bounds = array<i64: 1, 128>}, {pipeline_mode = #tpu.pipeline_mode<synchronous>, transform_indices = @transform_15, window_bounds = array<i64: 1, 128>}, {pipeline_mode = #tpu.pipeline_mode<synchronous>, transform_indices = @transform_16, window_bounds = array<i64: 1, 128>}, {pipeline_mode = #tpu.pipeline_mode<synchronous>, transform_indices = @transform_17, window_bounds = array<i64: 1, 128>}, {pipeline_mode = #tpu.pipeline_mode<synchronous>, transform_indices = @transform_18, window_bounds = array<i64: 1, 128>}, {pipeline_mode = #tpu.pipeline_mode<synchronous>, transform_indices = @transform_19, window_bounds = array<i64: 128, 128>}, {pipeline_mode = #tpu.pipeline_mode<synchronous>, transform_indices = @transform_20, window_bounds = array<i64: 1, 128>}, {pipeline_mode = #tpu.pipeline_mode<synchronous>, transform_indices = @transform_21, window_bounds = array<i64: 128, 128>}, {pipeline_mode = #tpu.pipeline_mode<synchronous>, transform_indices = @transform_22, window_bounds = array<i64: 1, 128>}, {pipeline_mode = #tpu.pipeline_mode<synchronous>, transform_indices = @transform_23, window_bounds = array<i64: 128, 128>}, {pipeline_mode = #tpu.pipeline_mode<synchronous>, transform_indices = @transform_24, window_bounds = array<i64: 1, 128>}, {pipeline_mode = #tpu.pipeline_mode<synchronous>, transform_indices = @transform_25, window_bounds = array<i64: 128, 128>}, {pipeline_mode = #tpu.pipeline_mode<synchronous>, transform_indices = @transform_26, window_bounds = array<i64: 1, 128>}, {pipeline_mode = #tpu.pipeline_mode<synchronous>, transform_indices = @transform_27, window_bounds = array<i64: 128, 256>}, {pipeline_mode = #tpu.pipeline_mode<synchronous>, transform_indices = @transform_28, window_bounds = array<i64: 1, 256>}, {pipeline_mode = #tpu.pipeline_mode<synchronous>, transform_indices = @transform_29, window_bounds = array<i64: 256, 128>}, {pipeline_mode = #tpu.pipeline_mode<synchronous>, transform_indices = @transform_30, window_bounds = array<i64: 1, 128>}, {pipeline_mode = #tpu.pipeline_mode<synchronous>, transform_indices = @transform_31, window_bounds = array<i64: 1, 128>}, {pipeline_mode = #tpu.pipeline_mode<synchronous>, transform_indices = @transform_32, window_bounds = array<i64: 1, 128>}, {pipeline_mode = #tpu.pipeline_mode<synchronous>, transform_indices = @transform_33, window_bounds = array<i64: 1, 128>}, {pipeline_mode = #tpu.pipeline_mode<synchronous>, transform_indices = @transform_34, window_bounds = array<i64: 1, 128>}, {pipeline_mode = #tpu.pipeline_mode<synchronous>, transform_indices = @transform_35, window_bounds = array<i64: 128, 2>}, {pipeline_mode = #tpu.pipeline_mode<synchronous>, transform_indices = @transform_36, window_bounds = array<i64: 1, 2>}, {transform_indices = @transform_37, window_bounds = array<i64: 1, 1, 2>}]} {
    %c0 = arith.constant 0 : index
    %c0_0 = arith.constant 0 : index
    %c0_1 = arith.constant 0 : index
    %0 = vector.load %arg1[%c0, %c0_0, %c0_1] : memref<1x8x16xf32, #tpu.memory_space<vmem>>, vector<1x8x16xf32>
    %1 = vector.shape_cast %0 : vector<1x8x16xf32> to vector<8x16xf32>
    %c0_2 = arith.constant 0 : index
    %c0_3 = arith.constant 0 : index
    %2 = vector.load %arg2[%c0_2, %c0_3] : memref<16x128xf32, #tpu.memory_space<vmem>>, vector<16x128xf32>
    %cst = arith.constant dense<0.000000e+00> : vector<8x128xf32>
    %3 = tpu.matmul %1, %2, %cst {dimension_numbers = #tpu.dot_dimension_numbers<[1], [0], [0], [1], [0, 0, 1, 1], [], []>} : vector<8x16xf32>, vector<16x128xf32>, vector<8x128xf32> -> vector<8x128xf32>
    %c0_4 = arith.constant 0 : index
    %c0_5 = arith.constant 0 : index
    %4 = vector.load %arg3[%c0_4, %c0_5] : memref<1x128xf32, #tpu.memory_space<vmem>>, vector<1x128xf32>
    %5 = vector.broadcast %4 : vector<1x128xf32> to vector<8x128xf32>
    %6 = arith.addf %3, %5 : vector<8x128xf32>
    %c0_6 = arith.constant 0 : index
    %c0_7 = arith.constant 0 : index
    %7 = vector.load %arg4[%c0_6, %c0_7] : memref<128x128xf32, #tpu.memory_space<vmem>>, vector<128x128xf32>
    %cst_8 = arith.constant dense<0.000000e+00> : vector<8x128xf32>
    %8 = tpu.matmul %6, %7, %cst_8 {dimension_numbers = #tpu.dot_dimension_numbers<[1], [0], [0], [1], [0, 0, 1, 1], [], []>} : vector<8x128xf32>, vector<128x128xf32>, vector<8x128xf32> -> vector<8x128xf32>
    %c0_9 = arith.constant 0 : index
    %c0_10 = arith.constant 0 : index
    %9 = vector.load %arg5[%c0_9, %c0_10] : memref<1x128xf32, #tpu.memory_space<vmem>>, vector<1x128xf32>
    %10 = vector.broadcast %9 : vector<1x128xf32> to vector<8x128xf32>
    %11 = arith.addf %8, %10 : vector<8x128xf32>
    %c0_11 = arith.constant 0 : index
    %c0_12 = arith.constant 0 : index
    %12 = vector.load %arg6[%c0_11, %c0_12] : memref<128x128xf32, #tpu.memory_space<vmem>>, vector<128x128xf32>
    %cst_13 = arith.constant dense<0.000000e+00> : vector<8x128xf32>
    %13 = tpu.matmul %6, %12, %cst_13 {dimension_numbers = #tpu.dot_dimension_numbers<[1], [0], [0], [1], [0, 0, 1, 1], [], []>} : vector<8x128xf32>, vector<128x128xf32>, vector<8x128xf32> -> vector<8x128xf32>
    %c0_14 = arith.constant 0 : index
    %c0_15 = arith.constant 0 : index
    %14 = vector.load %arg7[%c0_14, %c0_15] : memref<1x128xf32, #tpu.memory_space<vmem>>, vector<1x128xf32>
    %15 = vector.broadcast %14 : vector<1x128xf32> to vector<8x128xf32>
    %16 = arith.addf %13, %15 : vector<8x128xf32>
    %c0_16 = arith.constant 0 : index
    %c0_17 = arith.constant 0 : index
    %17 = vector.load %arg8[%c0_16, %c0_17] : memref<128x128xf32, #tpu.memory_space<vmem>>, vector<128x128xf32>
    %cst_18 = arith.constant dense<0.000000e+00> : vector<8x128xf32>
    %18 = tpu.matmul %6, %17, %cst_18 {dimension_numbers = #tpu.dot_dimension_numbers<[1], [0], [0], [1], [0, 0, 1, 1], [], []>} : vector<8x128xf32>, vector<128x128xf32>, vector<8x128xf32> -> vector<8x128xf32>
    %c0_19 = arith.constant 0 : index
    %c0_20 = arith.constant 0 : index
    %19 = vector.load %arg9[%c0_19, %c0_20] : memref<1x128xf32, #tpu.memory_space<vmem>>, vector<1x128xf32>
    %20 = vector.broadcast %19 : vector<1x128xf32> to vector<8x128xf32>
    %21 = arith.addf %18, %20 : vector<8x128xf32>
    %22 = vector.shape_cast %11 : vector<8x128xf32> to vector<8x4x32xf32>
    %23 = tpu.transpose %22, [1, 0, 2] : vector<8x4x32xf32> -> vector<4x8x32xf32>
    %24 = vector.shape_cast %16 : vector<8x128xf32> to vector<8x4x32xf32>
    %25 = tpu.transpose %24, [1, 0, 2] : vector<8x4x32xf32> -> vector<4x8x32xf32>
    %26 = vector.shape_cast %21 : vector<8x128xf32> to vector<8x4x32xf32>
    %27 = tpu.transpose %26, [1, 0, 2] : vector<8x4x32xf32> -> vector<4x8x32xf32>
    "tpu.trace_start"() <{level = 10 : i32, message = "hqd,hkd->hqk"}> : () -> ()
    %cst_21 = arith.constant dense<0.000000e+00> : vector<4x8x8xf32>
    %28 = tpu.matmul %23, %25, %cst_21 {dimension_numbers = #tpu.dot_dimension_numbers<[2], [2], [1], [1], [0, 0, 0, 1, 1, 1], [0], [0]>} : vector<4x8x32xf32>, vector<4x8x32xf32>, vector<4x8x8xf32> -> vector<4x8x8xf32>
    "tpu.trace_stop"() : () -> ()
    %cst_22 = arith.constant dense<0xFF800000> : vector<4x8xf32>
    %29 = vector.multi_reduction <maximumf>, %28, %cst_22 [2] : vector<4x8x8xf32> to vector<4x8xf32>
    %30 = vector.shape_cast %29 : vector<4x8xf32> to vector<4x8x1xf32>
    %31 = vector.broadcast %30 : vector<4x8x1xf32> to vector<4x8x8xf32>
    %32 = arith.subf %28, %31 : vector<4x8x8xf32>
    %33 = math.exp %32 : vector<4x8x8xf32>
    %cst_23 = arith.constant dense<0.000000e+00> : vector<4x8xf32>
    %34 = vector.multi_reduction <add>, %33, %cst_23 [2] : vector<4x8x8xf32> to vector<4x8xf32>
    %35 = vector.shape_cast %34 : vector<4x8xf32> to vector<4x8x1xf32>
    %36 = tpu.reciprocal %35 {approx = true} : vector<4x8x1xf32> -> vector<4x8x1xf32>
    %37 = vector.broadcast %36 : vector<4x8x1xf32> to vector<4x8x8xf32>
    %38 = arith.mulf %33, %37 : vector<4x8x8xf32>
    "tpu.trace_start"() <{level = 10 : i32, message = "hqk,hkd->hqd"}> : () -> ()
    %cst_24 = arith.constant dense<0.000000e+00> : vector<4x8x32xf32>
    %39 = tpu.matmul %38, %27, %cst_24 {dimension_numbers = #tpu.dot_dimension_numbers<[2], [1], [1], [2], [0, 0, 0, 1, 1, 2], [0], [0]>} : vector<4x8x8xf32>, vector<4x8x32xf32>, vector<4x8x32xf32> -> vector<4x8x32xf32>
    "tpu.trace_stop"() : () -> ()
    %40 = tpu.transpose %39, [1, 0, 2] : vector<4x8x32xf32> -> vector<8x4x32xf32>
    %41 = vector.shape_cast %40 : vector<8x4x32xf32> to vector<8x128xf32>
    %c0_25 = arith.constant 0 : index
    %c0_26 = arith.constant 0 : index
    %42 = vector.load %arg10[%c0_25, %c0_26] : memref<128x128xf32, #tpu.memory_space<vmem>>, vector<128x128xf32>
    %cst_27 = arith.constant dense<0.000000e+00> : vector<8x128xf32>
    %43 = tpu.matmul %41, %42, %cst_27 {dimension_numbers = #tpu.dot_dimension_numbers<[1], [0], [0], [1], [0, 0, 1, 1], [], []>} : vector<8x128xf32>, vector<128x128xf32>, vector<8x128xf32> -> vector<8x128xf32>
    %c0_28 = arith.constant 0 : index
    %c0_29 = arith.constant 0 : index
    %44 = vector.load %arg11[%c0_28, %c0_29] : memref<1x128xf32, #tpu.memory_space<vmem>>, vector<1x128xf32>
    %45 = vector.broadcast %44 : vector<1x128xf32> to vector<8x128xf32>
    %46 = arith.addf %43, %45 : vector<8x128xf32>
    %47 = arith.addf %6, %46 : vector<8x128xf32>
    %c0_30 = arith.constant 0 : index
    %c0_31 = arith.constant 0 : index
    %48 = vector.load %arg16[%c0_30, %c0_31] : memref<1x128xf32, #tpu.memory_space<vmem>>, vector<1x128xf32>
    %c0_32 = arith.constant 0 : index
    %c0_33 = arith.constant 0 : index
    %49 = vector.load %arg17[%c0_32, %c0_33] : memref<1x128xf32, #tpu.memory_space<vmem>>, vector<1x128xf32>
    %cst_34 = arith.constant dense<0.000000e+00> : vector<8xf32>
    %50 = vector.multi_reduction <add>, %47, %cst_34 [1] : vector<8x128xf32> to vector<8xf32>
    %51 = vector.shape_cast %50 : vector<8xf32> to vector<8x1xf32>
    %cst_35 = arith.constant 1.280000e+02 : f32
    %52 = vector.broadcast %cst_35 : f32 to vector<8x1xf32>
    %53 = arith.divf %51, %52 : vector<8x1xf32>
    %54 = arith.mulf %47, %47 : vector<8x128xf32>
    %cst_36 = arith.constant dense<0.000000e+00> : vector<8xf32>
    %55 = vector.multi_reduction <add>, %54, %cst_36 [1] : vector<8x128xf32> to vector<8xf32>
    %56 = vector.shape_cast %55 : vector<8xf32> to vector<8x1xf32>
    %cst_37 = arith.constant 1.280000e+02 : f32
    %57 = vector.broadcast %cst_37 : f32 to vector<8x1xf32>
    %58 = arith.divf %56, %57 : vector<8x1xf32>
    %59 = arith.mulf %53, %53 : vector<8x1xf32>
    %60 = arith.subf %58, %59 : vector<8x1xf32>
    %61 = vector.broadcast %53 : vector<8x1xf32> to vector<8x128xf32>
    %62 = arith.subf %47, %61 : vector<8x128xf32>
    %cst_38 = arith.constant 9.99999974E-6 : f32
    %63 = vector.broadcast %cst_38 : f32 to vector<8x1xf32>
    %64 = arith.addf %60, %63 : vector<8x1xf32>
    %65 = math.rsqrt %64 : vector<8x1xf32>
    %66 = vector.broadcast %65 : vector<8x1xf32> to vector<8x128xf32>
    %67 = arith.mulf %62, %66 : vector<8x128xf32>
    %68 = vector.broadcast %48 : vector<1x128xf32> to vector<8x128xf32>
    %69 = arith.mulf %67, %68 : vector<8x128xf32>
    %70 = vector.broadcast %49 : vector<1x128xf32> to vector<8x128xf32>
    %71 = arith.addf %69, %70 : vector<8x128xf32>
    %c0_39 = arith.constant 0 : index
    %c0_40 = arith.constant 0 : index
    %72 = vector.load %arg12[%c0_39, %c0_40] : memref<128x256xf32, #tpu.memory_space<vmem>>, vector<128x256xf32>
    %cst_41 = arith.constant dense<0.000000e+00> : vector<8x256xf32>
    %73 = tpu.matmul %71, %72, %cst_41 {dimension_numbers = #tpu.dot_dimension_numbers<[1], [0], [0], [1], [0, 0, 1, 1], [], []>} : vector<8x128xf32>, vector<128x256xf32>, vector<8x256xf32> -> vector<8x256xf32>
    %c0_42 = arith.constant 0 : index
    %c0_43 = arith.constant 0 : index
    %74 = vector.load %arg13[%c0_42, %c0_43] : memref<1x256xf32, #tpu.memory_space<vmem>>, vector<1x256xf32>
    %75 = vector.broadcast %74 : vector<1x256xf32> to vector<8x256xf32>
    %76 = arith.addf %73, %75 : vector<8x256xf32>
    %cst_44 = arith.constant 0.000000e+00 : f32
    %77 = vector.broadcast %cst_44 : f32 to vector<8x256xf32>
    %78 = arith.maximumf %76, %77 : vector<8x256xf32>
    %c0_45 = arith.constant 0 : index
    %c0_46 = arith.constant 0 : index
    %79 = vector.load %arg14[%c0_45, %c0_46] : memref<256x128xf32, #tpu.memory_space<vmem>>, vector<256x128xf32>
    %cst_47 = arith.constant dense<0.000000e+00> : vector<8x128xf32>
    %80 = tpu.matmul %78, %79, %cst_47 {dimension_numbers = #tpu.dot_dimension_numbers<[1], [0], [0], [1], [0, 0, 1, 1], [], []>} : vector<8x256xf32>, vector<256x128xf32>, vector<8x128xf32> -> vector<8x128xf32>
    %c0_48 = arith.constant 0 : index
    %c0_49 = arith.constant 0 : index
    %81 = vector.load %arg15[%c0_48, %c0_49] : memref<1x128xf32, #tpu.memory_space<vmem>>, vector<1x128xf32>
    %82 = vector.broadcast %81 : vector<1x128xf32> to vector<8x128xf32>
    %83 = arith.addf %80, %82 : vector<8x128xf32>
    %84 = arith.addf %71, %83 : vector<8x128xf32>
    %c0_50 = arith.constant 0 : index
    %c0_51 = arith.constant 0 : index
    %85 = vector.load %arg18[%c0_50, %c0_51] : memref<1x128xf32, #tpu.memory_space<vmem>>, vector<1x128xf32>
    %c0_52 = arith.constant 0 : index
    %c0_53 = arith.constant 0 : index
    %86 = vector.load %arg19[%c0_52, %c0_53] : memref<1x128xf32, #tpu.memory_space<vmem>>, vector<1x128xf32>
    %cst_54 = arith.constant dense<0.000000e+00> : vector<8xf32>
    %87 = vector.multi_reduction <add>, %84, %cst_54 [1] : vector<8x128xf32> to vector<8xf32>
    %88 = vector.shape_cast %87 : vector<8xf32> to vector<8x1xf32>
    %cst_55 = arith.constant 1.280000e+02 : f32
    %89 = vector.broadcast %cst_55 : f32 to vector<8x1xf32>
    %90 = arith.divf %88, %89 : vector<8x1xf32>
    %91 = arith.mulf %84, %84 : vector<8x128xf32>
    %cst_56 = arith.constant dense<0.000000e+00> : vector<8xf32>
    %92 = vector.multi_reduction <add>, %91, %cst_56 [1] : vector<8x128xf32> to vector<8xf32>
    %93 = vector.shape_cast %92 : vector<8xf32> to vector<8x1xf32>
    %cst_57 = arith.constant 1.280000e+02 : f32
    %94 = vector.broadcast %cst_57 : f32 to vector<8x1xf32>
    %95 = arith.divf %93, %94 : vector<8x1xf32>
    %96 = arith.mulf %90, %90 : vector<8x1xf32>
    %97 = arith.subf %95, %96 : vector<8x1xf32>
    %98 = vector.broadcast %90 : vector<8x1xf32> to vector<8x128xf32>
    %99 = arith.subf %84, %98 : vector<8x128xf32>
    %cst_58 = arith.constant 9.99999974E-6 : f32
    %100 = vector.broadcast %cst_58 : f32 to vector<8x1xf32>
    %101 = arith.addf %97, %100 : vector<8x1xf32>
    %102 = math.rsqrt %101 : vector<8x1xf32>
    %103 = vector.broadcast %102 : vector<8x1xf32> to vector<8x128xf32>
    %104 = arith.mulf %99, %103 : vector<8x128xf32>
    %105 = vector.broadcast %85 : vector<1x128xf32> to vector<8x128xf32>
    %106 = arith.mulf %104, %105 : vector<8x128xf32>
    %107 = vector.broadcast %86 : vector<1x128xf32> to vector<8x128xf32>
    %108 = arith.addf %106, %107 : vector<8x128xf32>
    %c0_59 = arith.constant 0 : index
    %c0_60 = arith.constant 0 : index
    %109 = vector.load %arg20[%c0_59, %c0_60] : memref<128x128xf32, #tpu.memory_space<vmem>>, vector<128x128xf32>
    %cst_61 = arith.constant dense<0.000000e+00> : vector<8x128xf32>
    %110 = tpu.matmul %108, %109, %cst_61 {dimension_numbers = #tpu.dot_dimension_numbers<[1], [0], [0], [1], [0, 0, 1, 1], [], []>} : vector<8x128xf32>, vector<128x128xf32>, vector<8x128xf32> -> vector<8x128xf32>
    %c0_62 = arith.constant 0 : index
    %c0_63 = arith.constant 0 : index
    %111 = vector.load %arg21[%c0_62, %c0_63] : memref<1x128xf32, #tpu.memory_space<vmem>>, vector<1x128xf32>
    %112 = vector.broadcast %111 : vector<1x128xf32> to vector<8x128xf32>
    %113 = arith.addf %110, %112 : vector<8x128xf32>
    %c0_64 = arith.constant 0 : index
    %c0_65 = arith.constant 0 : index
    %114 = vector.load %arg22[%c0_64, %c0_65] : memref<128x128xf32, #tpu.memory_space<vmem>>, vector<128x128xf32>
    %cst_66 = arith.constant dense<0.000000e+00> : vector<8x128xf32>
    %115 = tpu.matmul %108, %114, %cst_66 {dimension_numbers = #tpu.dot_dimension_numbers<[1], [0], [0], [1], [0, 0, 1, 1], [], []>} : vector<8x128xf32>, vector<128x128xf32>, vector<8x128xf32> -> vector<8x128xf32>
    %c0_67 = arith.constant 0 : index
    %c0_68 = arith.constant 0 : index
    %116 = vector.load %arg23[%c0_67, %c0_68] : memref<1x128xf32, #tpu.memory_space<vmem>>, vector<1x128xf32>
    %117 = vector.broadcast %116 : vector<1x128xf32> to vector<8x128xf32>
    %118 = arith.addf %115, %117 : vector<8x128xf32>
    %c0_69 = arith.constant 0 : index
    %c0_70 = arith.constant 0 : index
    %119 = vector.load %arg24[%c0_69, %c0_70] : memref<128x128xf32, #tpu.memory_space<vmem>>, vector<128x128xf32>
    %cst_71 = arith.constant dense<0.000000e+00> : vector<8x128xf32>
    %120 = tpu.matmul %108, %119, %cst_71 {dimension_numbers = #tpu.dot_dimension_numbers<[1], [0], [0], [1], [0, 0, 1, 1], [], []>} : vector<8x128xf32>, vector<128x128xf32>, vector<8x128xf32> -> vector<8x128xf32>
    %c0_72 = arith.constant 0 : index
    %c0_73 = arith.constant 0 : index
    %121 = vector.load %arg25[%c0_72, %c0_73] : memref<1x128xf32, #tpu.memory_space<vmem>>, vector<1x128xf32>
    %122 = vector.broadcast %121 : vector<1x128xf32> to vector<8x128xf32>
    %123 = arith.addf %120, %122 : vector<8x128xf32>
    %124 = vector.shape_cast %113 : vector<8x128xf32> to vector<8x4x32xf32>
    %125 = tpu.transpose %124, [1, 0, 2] : vector<8x4x32xf32> -> vector<4x8x32xf32>
    %126 = vector.shape_cast %118 : vector<8x128xf32> to vector<8x4x32xf32>
    %127 = tpu.transpose %126, [1, 0, 2] : vector<8x4x32xf32> -> vector<4x8x32xf32>
    %128 = vector.shape_cast %123 : vector<8x128xf32> to vector<8x4x32xf32>
    %129 = tpu.transpose %128, [1, 0, 2] : vector<8x4x32xf32> -> vector<4x8x32xf32>
    "tpu.trace_start"() <{level = 10 : i32, message = "hqd,hkd->hqk"}> : () -> ()
    %cst_74 = arith.constant dense<0.000000e+00> : vector<4x8x8xf32>
    %130 = tpu.matmul %125, %127, %cst_74 {dimension_numbers = #tpu.dot_dimension_numbers<[2], [2], [1], [1], [0, 0, 0, 1, 1, 1], [0], [0]>} : vector<4x8x32xf32>, vector<4x8x32xf32>, vector<4x8x8xf32> -> vector<4x8x8xf32>
    "tpu.trace_stop"() : () -> ()
    %cst_75 = arith.constant dense<0xFF800000> : vector<4x8xf32>
    %131 = vector.multi_reduction <maximumf>, %130, %cst_75 [2] : vector<4x8x8xf32> to vector<4x8xf32>
    %132 = vector.shape_cast %131 : vector<4x8xf32> to vector<4x8x1xf32>
    %133 = vector.broadcast %132 : vector<4x8x1xf32> to vector<4x8x8xf32>
    %134 = arith.subf %130, %133 : vector<4x8x8xf32>
    %135 = math.exp %134 : vector<4x8x8xf32>
    %cst_76 = arith.constant dense<0.000000e+00> : vector<4x8xf32>
    %136 = vector.multi_reduction <add>, %135, %cst_76 [2] : vector<4x8x8xf32> to vector<4x8xf32>
    %137 = vector.shape_cast %136 : vector<4x8xf32> to vector<4x8x1xf32>
    %138 = tpu.reciprocal %137 {approx = true} : vector<4x8x1xf32> -> vector<4x8x1xf32>
    %139 = vector.broadcast %138 : vector<4x8x1xf32> to vector<4x8x8xf32>
    %140 = arith.mulf %135, %139 : vector<4x8x8xf32>
    "tpu.trace_start"() <{level = 10 : i32, message = "hqk,hkd->hqd"}> : () -> ()
    %cst_77 = arith.constant dense<0.000000e+00> : vector<4x8x32xf32>
    %141 = tpu.matmul %140, %129, %cst_77 {dimension_numbers = #tpu.dot_dimension_numbers<[2], [1], [1], [2], [0, 0, 0, 1, 1, 2], [0], [0]>} : vector<4x8x8xf32>, vector<4x8x32xf32>, vector<4x8x32xf32> -> vector<4x8x32xf32>
    "tpu.trace_stop"() : () -> ()
    %142 = tpu.transpose %141, [1, 0, 2] : vector<4x8x32xf32> -> vector<8x4x32xf32>
    %143 = vector.shape_cast %142 : vector<8x4x32xf32> to vector<8x128xf32>
    %c0_78 = arith.constant 0 : index
    %c0_79 = arith.constant 0 : index
    %144 = vector.load %arg26[%c0_78, %c0_79] : memref<128x128xf32, #tpu.memory_space<vmem>>, vector<128x128xf32>
    %cst_80 = arith.constant dense<0.000000e+00> : vector<8x128xf32>
    %145 = tpu.matmul %143, %144, %cst_80 {dimension_numbers = #tpu.dot_dimension_numbers<[1], [0], [0], [1], [0, 0, 1, 1], [], []>} : vector<8x128xf32>, vector<128x128xf32>, vector<8x128xf32> -> vector<8x128xf32>
    %c0_81 = arith.constant 0 : index
    %c0_82 = arith.constant 0 : index
    %146 = vector.load %arg27[%c0_81, %c0_82] : memref<1x128xf32, #tpu.memory_space<vmem>>, vector<1x128xf32>
    %147 = vector.broadcast %146 : vector<1x128xf32> to vector<8x128xf32>
    %148 = arith.addf %145, %147 : vector<8x128xf32>
    %149 = arith.addf %108, %148 : vector<8x128xf32>
    %c0_83 = arith.constant 0 : index
    %c0_84 = arith.constant 0 : index
    %150 = vector.load %arg32[%c0_83, %c0_84] : memref<1x128xf32, #tpu.memory_space<vmem>>, vector<1x128xf32>
    %c0_85 = arith.constant 0 : index
    %c0_86 = arith.constant 0 : index
    %151 = vector.load %arg33[%c0_85, %c0_86] : memref<1x128xf32, #tpu.memory_space<vmem>>, vector<1x128xf32>
    %cst_87 = arith.constant dense<0.000000e+00> : vector<8xf32>
    %152 = vector.multi_reduction <add>, %149, %cst_87 [1] : vector<8x128xf32> to vector<8xf32>
    %153 = vector.shape_cast %152 : vector<8xf32> to vector<8x1xf32>
    %cst_88 = arith.constant 1.280000e+02 : f32
    %154 = vector.broadcast %cst_88 : f32 to vector<8x1xf32>
    %155 = arith.divf %153, %154 : vector<8x1xf32>
    %156 = arith.mulf %149, %149 : vector<8x128xf32>
    %cst_89 = arith.constant dense<0.000000e+00> : vector<8xf32>
    %157 = vector.multi_reduction <add>, %156, %cst_89 [1] : vector<8x128xf32> to vector<8xf32>
    %158 = vector.shape_cast %157 : vector<8xf32> to vector<8x1xf32>
    %cst_90 = arith.constant 1.280000e+02 : f32
    %159 = vector.broadcast %cst_90 : f32 to vector<8x1xf32>
    %160 = arith.divf %158, %159 : vector<8x1xf32>
    %161 = arith.mulf %155, %155 : vector<8x1xf32>
    %162 = arith.subf %160, %161 : vector<8x1xf32>
    %163 = vector.broadcast %155 : vector<8x1xf32> to vector<8x128xf32>
    %164 = arith.subf %149, %163 : vector<8x128xf32>
    %cst_91 = arith.constant 9.99999974E-6 : f32
    %165 = vector.broadcast %cst_91 : f32 to vector<8x1xf32>
    %166 = arith.addf %162, %165 : vector<8x1xf32>
    %167 = math.rsqrt %166 : vector<8x1xf32>
    %168 = vector.broadcast %167 : vector<8x1xf32> to vector<8x128xf32>
    %169 = arith.mulf %164, %168 : vector<8x128xf32>
    %170 = vector.broadcast %150 : vector<1x128xf32> to vector<8x128xf32>
    %171 = arith.mulf %169, %170 : vector<8x128xf32>
    %172 = vector.broadcast %151 : vector<1x128xf32> to vector<8x128xf32>
    %173 = arith.addf %171, %172 : vector<8x128xf32>
    %c0_92 = arith.constant 0 : index
    %c0_93 = arith.constant 0 : index
    %174 = vector.load %arg28[%c0_92, %c0_93] : memref<128x256xf32, #tpu.memory_space<vmem>>, vector<128x256xf32>
    %cst_94 = arith.constant dense<0.000000e+00> : vector<8x256xf32>
    %175 = tpu.matmul %173, %174, %cst_94 {dimension_numbers = #tpu.dot_dimension_numbers<[1], [0], [0], [1], [0, 0, 1, 1], [], []>} : vector<8x128xf32>, vector<128x256xf32>, vector<8x256xf32> -> vector<8x256xf32>
    %c0_95 = arith.constant 0 : index
    %c0_96 = arith.constant 0 : index
    %176 = vector.load %arg29[%c0_95, %c0_96] : memref<1x256xf32, #tpu.memory_space<vmem>>, vector<1x256xf32>
    %177 = vector.broadcast %176 : vector<1x256xf32> to vector<8x256xf32>
    %178 = arith.addf %175, %177 : vector<8x256xf32>
    %cst_97 = arith.constant 0.000000e+00 : f32
    %179 = vector.broadcast %cst_97 : f32 to vector<8x256xf32>
    %180 = arith.maximumf %178, %179 : vector<8x256xf32>
    %c0_98 = arith.constant 0 : index
    %c0_99 = arith.constant 0 : index
    %181 = vector.load %arg30[%c0_98, %c0_99] : memref<256x128xf32, #tpu.memory_space<vmem>>, vector<256x128xf32>
    %cst_100 = arith.constant dense<0.000000e+00> : vector<8x128xf32>
    %182 = tpu.matmul %180, %181, %cst_100 {dimension_numbers = #tpu.dot_dimension_numbers<[1], [0], [0], [1], [0, 0, 1, 1], [], []>} : vector<8x256xf32>, vector<256x128xf32>, vector<8x128xf32> -> vector<8x128xf32>
    %c0_101 = arith.constant 0 : index
    %c0_102 = arith.constant 0 : index
    %183 = vector.load %arg31[%c0_101, %c0_102] : memref<1x128xf32, #tpu.memory_space<vmem>>, vector<1x128xf32>
    %184 = vector.broadcast %183 : vector<1x128xf32> to vector<8x128xf32>
    %185 = arith.addf %182, %184 : vector<8x128xf32>
    %186 = arith.addf %173, %185 : vector<8x128xf32>
    %c0_103 = arith.constant 0 : index
    %c0_104 = arith.constant 0 : index
    %187 = vector.load %arg34[%c0_103, %c0_104] : memref<1x128xf32, #tpu.memory_space<vmem>>, vector<1x128xf32>
    %c0_105 = arith.constant 0 : index
    %c0_106 = arith.constant 0 : index
    %188 = vector.load %arg35[%c0_105, %c0_106] : memref<1x128xf32, #tpu.memory_space<vmem>>, vector<1x128xf32>
    %cst_107 = arith.constant dense<0.000000e+00> : vector<8xf32>
    %189 = vector.multi_reduction <add>, %186, %cst_107 [1] : vector<8x128xf32> to vector<8xf32>
    %190 = vector.shape_cast %189 : vector<8xf32> to vector<8x1xf32>
    %cst_108 = arith.constant 1.280000e+02 : f32
    %191 = vector.broadcast %cst_108 : f32 to vector<8x1xf32>
    %192 = arith.divf %190, %191 : vector<8x1xf32>
    %193 = arith.mulf %186, %186 : vector<8x128xf32>
    %cst_109 = arith.constant dense<0.000000e+00> : vector<8xf32>
    %194 = vector.multi_reduction <add>, %193, %cst_109 [1] : vector<8x128xf32> to vector<8xf32>
    %195 = vector.shape_cast %194 : vector<8xf32> to vector<8x1xf32>
    %cst_110 = arith.constant 1.280000e+02 : f32
    %196 = vector.broadcast %cst_110 : f32 to vector<8x1xf32>
    %197 = arith.divf %195, %196 : vector<8x1xf32>
    %198 = arith.mulf %192, %192 : vector<8x1xf32>
    %199 = arith.subf %197, %198 : vector<8x1xf32>
    %200 = vector.broadcast %192 : vector<8x1xf32> to vector<8x128xf32>
    %201 = arith.subf %186, %200 : vector<8x128xf32>
    %cst_111 = arith.constant 9.99999974E-6 : f32
    %202 = vector.broadcast %cst_111 : f32 to vector<8x1xf32>
    %203 = arith.addf %199, %202 : vector<8x1xf32>
    %204 = math.rsqrt %203 : vector<8x1xf32>
    %205 = vector.broadcast %204 : vector<8x1xf32> to vector<8x128xf32>
    %206 = arith.mulf %201, %205 : vector<8x128xf32>
    %207 = vector.broadcast %187 : vector<1x128xf32> to vector<8x128xf32>
    %208 = arith.mulf %206, %207 : vector<8x128xf32>
    %209 = vector.broadcast %188 : vector<1x128xf32> to vector<8x128xf32>
    %210 = arith.addf %208, %209 : vector<8x128xf32>
    %cst_112 = arith.constant dense<0.000000e+00> : vector<128xf32>
    %211 = vector.multi_reduction <add>, %210, %cst_112 [0] : vector<8x128xf32> to vector<128xf32>
    %212 = vector.shape_cast %211 : vector<128xf32> to vector<1x128xf32>
    %cst_113 = arith.constant 8.000000e+00 : f32
    %213 = vector.broadcast %cst_113 : f32 to vector<1x128xf32>
    %214 = arith.divf %212, %213 : vector<1x128xf32>
    %c0_114 = arith.constant 0 : index
    %c0_115 = arith.constant 0 : index
    %215 = vector.load %arg36[%c0_114, %c0_115] : memref<128x2xf32, #tpu.memory_space<vmem>>, vector<128x2xf32>
    %cst_116 = arith.constant dense<0.000000e+00> : vector<1x2xf32>
    %216 = tpu.matmul %214, %215, %cst_116 {dimension_numbers = #tpu.dot_dimension_numbers<[1], [0], [0], [1], [0, 0, 1, 1], [], []>} : vector<1x128xf32>, vector<128x2xf32>, vector<1x2xf32> -> vector<1x2xf32>
    %c0_117 = arith.constant 0 : index
    %c0_118 = arith.constant 0 : index
    %217 = vector.load %arg37[%c0_117, %c0_118] : memref<1x2xf32, #tpu.memory_space<vmem>>, vector<1x2xf32>
    %218 = arith.addf %216, %217 : vector<1x2xf32>
    %219 = vector.shape_cast %218 : vector<1x2xf32> to vector<1x1x2xf32>
    %c0_119 = arith.constant 0 : index
    %c0_120 = arith.constant 0 : index
    %c0_121 = arith.constant 0 : index
    %220 = vector.load %arg38[%c0_119, %c0_120, %c0_121] : memref<1x1x2xf32, #tpu.memory_space<vmem>>, vector<1x1x2xf32>
    tpu.vector_store %arg38[%c0_119, %c0_120, %c0_121], %219 {strides = array<i32>} : memref<1x1x2xf32, #tpu.memory_space<vmem>>, vector<1x1x2xf32>,
    return
  }
  func.func @transform_0(%arg0: i32) -> (i32, i32, i32) {
    %c0_i32 = arith.constant 0 : i32
    %c0_i32_0 = arith.constant 0 : i32
    %c0_i32_1 = arith.constant 0 : i32
    return %arg0, %c0_i32, %c0_i32_0 : i32, i32, i32
  }
  func.func @transform_1(%arg0: i32) -> (i32, i32) {
    %c0_i32 = arith.constant 0 : i32
    %c0_i32_0 = arith.constant 0 : i32
    %c0_i32_1 = arith.constant 0 : i32
    return %c0_i32, %c0_i32_0 : i32, i32
  }
  func.func @transform_2(%arg0: i32) -> (i32, i32) {
    %c0_i32 = arith.constant 0 : i32
    %c0_i32_0 = arith.constant 0 : i32
    %c0_i32_1 = arith.constant 0 : i32
    return %c0_i32, %c0_i32_0 : i32, i32
  }
  func.func @transform_3(%arg0: i32) -> (i32, i32) {
    %c0_i32 = arith.constant 0 : i32
    %c0_i32_0 = arith.constant 0 : i32
    %c0_i32_1 = arith.constant 0 : i32
    return %c0_i32, %c0_i32_0 : i32, i32
  }
  func.func @transform_4(%arg0: i32) -> (i32, i32) {
    %c0_i32 = arith.constant 0 : i32
    %c0_i32_0 = arith.constant 0 : i32
    %c0_i32_1 = arith.constant 0 : i32
    return %c0_i32, %c0_i32_0 : i32, i32
  }
  func.func @transform_5(%arg0: i32) -> (i32, i32) {
    %c0_i32 = arith.constant 0 : i32
    %c0_i32_0 = arith.constant 0 : i32
    %c0_i32_1 = arith.constant 0 : i32
    return %c0_i32, %c0_i32_0 : i32, i32
  }
  func.func @transform_6(%arg0: i32) -> (i32, i32) {
    %c0_i32 = arith.constant 0 : i32
    %c0_i32_0 = arith.constant 0 : i32
    %c0_i32_1 = arith.constant 0 : i32
    return %c0_i32, %c0_i32_0 : i32, i32
  }
  func.func @transform_7(%arg0: i32) -> (i32, i32) {
    %c0_i32 = arith.constant 0 : i32
    %c0_i32_0 = arith.constant 0 : i32
    %c0_i32_1 = arith.constant 0 : i32
    return %c0_i32, %c0_i32_0 : i32, i32
  }
  func.func @transform_8(%arg0: i32) -> (i32, i32) {
    %c0_i32 = arith.constant 0 : i32
    %c0_i32_0 = arith.constant 0 : i32
    %c0_i32_1 = arith.constant 0 : i32
    return %c0_i32, %c0_i32_0 : i32, i32
  }
  func.func @transform_9(%arg0: i32) -> (i32, i32) {
    %c0_i32 = arith.constant 0 : i32
    %c0_i32_0 = arith.constant 0 : i32
    %c0_i32_1 = arith.constant 0 : i32
    return %c0_i32, %c0_i32_0 : i32, i32
  }
  func.func @transform_10(%arg0: i32) -> (i32, i32) {
    %c0_i32 = arith.constant 0 : i32
    %c0_i32_0 = arith.constant 0 : i32
    %c0_i32_1 = arith.constant 0 : i32
    return %c0_i32, %c0_i32_0 : i32, i32
  }
  func.func @transform_11(%arg0: i32) -> (i32, i32) {
    %c0_i32 = arith.constant 0 : i32
    %c0_i32_0 = arith.constant 0 : i32
    %c0_i32_1 = arith.constant 0 : i32
    return %c0_i32, %c0_i32_0 : i32, i32
  }
  func.func @transform_12(%arg0: i32) -> (i32, i32) {
    %c0_i32 = arith.constant 0 : i32
    %c0_i32_0 = arith.constant 0 : i32
    %c0_i32_1 = arith.constant 0 : i32
    return %c0_i32, %c0_i32_0 : i32, i32
  }
  func.func @transform_13(%arg0: i32) -> (i32, i32) {
    %c0_i32 = arith.constant 0 : i32
    %c0_i32_0 = arith.constant 0 : i32
    %c0_i32_1 = arith.constant 0 : i32
    return %c0_i32, %c0_i32_0 : i32, i32
  }
  func.func @transform_14(%arg0: i32) -> (i32, i32) {
    %c0_i32 = arith.constant 0 : i32
    %c0_i32_0 = arith.constant 0 : i32
    %c0_i32_1 = arith.constant 0 : i32
    return %c0_i32, %c0_i32_0 : i32, i32
  }
  func.func @transform_15(%arg0: i32) -> (i32, i32) {
    %c0_i32 = arith.constant 0 : i32
    %c0_i32_0 = arith.constant 0 : i32
    %c0_i32_1 = arith.constant 0 : i32
    return %c0_i32, %c0_i32_0 : i32, i32
  }
  func.func @transform_16(%arg0: i32) -> (i32, i32) {
    %c0_i32 = arith.constant 0 : i32
    %c0_i32_0 = arith.constant 0 : i32
    %c0_i32_1 = arith.constant 0 : i32
    return %c0_i32, %c0_i32_0 : i32, i32
  }
  func.func @transform_17(%arg0: i32) -> (i32, i32) {
    %c0_i32 = arith.constant 0 : i32
    %c0_i32_0 = arith.constant 0 : i32
    %c0_i32_1 = arith.constant 0 : i32
    return %c0_i32, %c0_i32_0 : i32, i32
  }
  func.func @transform_18(%arg0: i32) -> (i32, i32) {
    %c0_i32 = arith.constant 0 : i32
    %c0_i32_0 = arith.constant 0 : i32
    %c0_i32_1 = arith.constant 0 : i32
    return %c0_i32, %c0_i32_0 : i32, i32
  }
  func.func @transform_19(%arg0: i32) -> (i32, i32) {
    %c0_i32 = arith.constant 0 : i32
    %c0_i32_0 = arith.constant 0 : i32
    %c0_i32_1 = arith.constant 0 : i32
    return %c0_i32, %c0_i32_0 : i32, i32
  }
  func.func @transform_20(%arg0: i32) -> (i32, i32) {
    %c0_i32 = arith.constant 0 : i32
    %c0_i32_0 = arith.constant 0 : i32
    %c0_i32_1 = arith.constant 0 : i32
    return %c0_i32, %c0_i32_0 : i32, i32
  }
  func.func @transform_21(%arg0: i32) -> (i32, i32) {
    %c0_i32 = arith.constant 0 : i32
    %c0_i32_0 = arith.constant 0 : i32
    %c0_i32_1 = arith.constant 0 : i32
    return %c0_i32, %c0_i32_0 : i32, i32
  }
  func.func @transform_22(%arg0: i32) -> (i32, i32) {
    %c0_i32 = arith.constant 0 : i32
    %c0_i32_0 = arith.constant 0 : i32
    %c0_i32_1 = arith.constant 0 : i32
    return %c0_i32, %c0_i32_0 : i32, i32
  }
  func.func @transform_23(%arg0: i32) -> (i32, i32) {
    %c0_i32 = arith.constant 0 : i32
    %c0_i32_0 = arith.constant 0 : i32
    %c0_i32_1 = arith.constant 0 : i32
    return %c0_i32, %c0_i32_0 : i32, i32
  }
  func.func @transform_24(%arg0: i32) -> (i32, i32) {
    %c0_i32 = arith.constant 0 : i32
    %c0_i32_0 = arith.constant 0 : i32
    %c0_i32_1 = arith.constant 0 : i32
    return %c0_i32, %c0_i32_0 : i32, i32
  }
  func.func @transform_25(%arg0: i32) -> (i32, i32) {
    %c0_i32 = arith.constant 0 : i32
    %c0_i32_0 = arith.constant 0 : i32
    %c0_i32_1 = arith.constant 0 : i32
    return %c0_i32, %c0_i32_0 : i32, i32
  }
  func.func @transform_26(%arg0: i32) -> (i32, i32) {
    %c0_i32 = arith.constant 0 : i32
    %c0_i32_0 = arith.constant 0 : i32
    %c0_i32_1 = arith.constant 0 : i32
    return %c0_i32, %c0_i32_0 : i32, i32
  }
  func.func @transform_27(%arg0: i32) -> (i32, i32) {
    %c0_i32 = arith.constant 0 : i32
    %c0_i32_0 = arith.constant 0 : i32
    %c0_i32_1 = arith.constant 0 : i32
    return %c0_i32, %c0_i32_0 : i32, i32
  }
  func.func @transform_28(%arg0: i32) -> (i32, i32) {
    %c0_i32 = arith.constant 0 : i32
    %c0_i32_0 = arith.constant 0 : i32
    %c0_i32_1 = arith.constant 0 : i32
    return %c0_i32, %c0_i32_0 : i32, i32
  }
  func.func @transform_29(%arg0: i32) -> (i32, i32) {
    %c0_i32 = arith.constant 0 : i32
    %c0_i32_0 = arith.constant 0 : i32
    %c0_i32_1 = arith.constant 0 : i32
    return %c0_i32, %c0_i32_0 : i32, i32
  }
  func.func @transform_30(%arg0: i32) -> (i32, i32) {
    %c0_i32 = arith.constant 0 : i32
    %c0_i32_0 = arith.constant 0 : i32
    %c0_i32_1 = arith.constant 0 : i32
    return %c0_i32, %c0_i32_0 : i32, i32
  }
  func.func @transform_31(%arg0: i32) -> (i32, i32) {
    %c0_i32 = arith.constant 0 : i32
    %c0_i32_0 = arith.constant 0 : i32
    %c0_i32_1 = arith.constant 0 : i32
    return %c0_i32, %c0_i32_0 : i32, i32
  }
  func.func @transform_32(%arg0: i32) -> (i32, i32) {
    %c0_i32 = arith.constant 0 : i32
    %c0_i32_0 = arith.constant 0 : i32
    %c0_i32_1 = arith.constant 0 : i32
    return %c0_i32, %c0_i32_0 : i32, i32
  }
  func.func @transform_33(%arg0: i32) -> (i32, i32) {
    %c0_i32 = arith.constant 0 : i32
    %c0_i32_0 = arith.constant 0 : i32
    %c0_i32_1 = arith.constant 0 : i32
    return %c0_i32, %c0_i32_0 : i32, i32
  }
  func.func @transform_34(%arg0: i32) -> (i32, i32) {
    %c0_i32 = arith.constant 0 : i32
    %c0_i32_0 = arith.constant 0 : i32
    %c0_i32_1 = arith.constant 0 : i32
    return %c0_i32, %c0_i32_0 : i32, i32
  }
  func.func @transform_35(%arg0: i32) -> (i32, i32) {
    %c0_i32 = arith.constant 0 : i32
    %c0_i32_0 = arith.constant 0 : i32
    %c0_i32_1 = arith.constant 0 : i32
    return %c0_i32, %c0_i32_0 : i32, i32
  }
  func.func @transform_36(%arg0: i32) -> (i32, i32) {
    %c0_i32 = arith.constant 0 : i32
    %c0_i32_0 = arith.constant 0 : i32
    %c0_i32_1 = arith.constant 0 : i32
    return %c0_i32, %c0_i32_0 : i32, i32
  }
  func.func @transform_37(%arg0: i32) -> (i32, i32, i32) {
    %c0_i32 = arith.constant 0 : i32
    %c0_i32_0 = arith.constant 0 : i32
    %c0_i32_1 = arith.constant 0 : i32
    return %arg0, %c0_i32, %c0_i32_0 : i32, i32, i32
  }
}

</mosaic_0001>

<bundles_post_ra>
// kernel: tpu_custom_call.1
= control target key start
LH: loop header
LB: loop body
LE: loop exit
PB: predicated region body
PF: predicated region fallthrough
CT: control target
= control target key end

     0   :  { %s6944_s6 = smov 1   ;;  %s6945_s10 = smov 2   ;;  %s8035_s0 = inlined_call_operand.smem [shape: u32[38], index: -1, kind: input, shape index: {}] }
   0x1   :  { %s7014_s5 = sld [smem:[%s8035_s0]]   ;;  %s6946_s14 = smov 3  }
   0x2   :  { %s7019_s9 = sld [smem:[%s8035_s0 + %s6944_s6]]   ;;  %s6947_s18 = smov 4  }
   0x3   :  { %s7024_s13 = sld [smem:[%s8035_s0 + %s6945_s10]]   ;;  %s6948_s22 = smov 5  }
   0x4   :  { %s7029_s17 = sld [smem:[%s8035_s0 + %s6946_s14]]   ;;  %s6949_s26 = smov 6  }
   0x5   :  { %s7034_s21 = sld [smem:[%s8035_s0 + %s6947_s18]]   ;;  %s6950_s30 = smov 7  }
   0x6   :  { %s7039_s25 = sld [smem:[%s8035_s0 + %s6948_s22]]   ;;  %s6951_s4 = smov 8  }
   0x7   :  { %s7044_s29 = sld [smem:[%s8035_s0 + %s6949_s26]]   ;;  %s6952_s10 = smov 9  }
   0x8   :  { %8047 = sst [smem:[#allocation32_spill]] %s7019_s9  ;;  %s6953_s15 = smov 10  }
   0x9   :  { %8048 = sst [smem:[#allocation33_spill]] %s7024_s13  ;;  %s6954_s20 = smov 11  }
   0xa   :  { %s7049_s3 = sld [smem:[%s8035_s0 + %s6950_s30]]   ;;  %s6955_s26 = smov 12  }
   0xb   :  { %8049 = sst [smem:[#allocation34_spill]] %s7034_s21  ;;  %s6956_s1 = smov 13  }
   0xc   :  { %s7054_s8 = sld [smem:[%s8035_s0 + %s6951_s4]]   ;;  %s6957_s7 = smov 14  }
   0xd   :  { %8050 = sst [smem:[#allocation35_spill]] %s7044_s29  ;;  %s6959_s22 = smov 16  }
   0xe   :  { %s7059_s14 = sld [smem:[%s8035_s0 + %s6952_s10]]   ;;  %s6960_s28 = smov 17  }
   0xf   :  { %s7064_s19 = sld [smem:[%s8035_s0 + %s6953_s15]]   ;;  %s6958_s15 = smov 15  }
  0x10   :  { %8051 = sst [smem:[#allocation36_spill]] %s7049_s3 }
  0x11   :  { %s7069_s24 = sld [smem:[%s8035_s0 + %s6954_s20]]  }
  0x12   :  { %8052 = sst [smem:[#allocation37_spill]] %s7054_s8 }
  0x13   :  { %s7074_s30 = sld [smem:[%s8035_s0 + %s6955_s26]]  }
  0x14   :  { %s7079_s6 = sld [smem:[%s8035_s0 + %s6956_s1]]  }
  0x15   :  { %8053 = sst [smem:[#allocation38_spill]] %s7064_s19 }
  0x16   :  { %s7084_s12 = sld [smem:[%s8035_s0 + %s6957_s7]]   ;;  %s6961_s7 = smov 18  }
  0x17   :  { %s7089_s20 = sld [smem:[%s8035_s0 + %s6958_s15]]   ;;  %s6962_s15 = smov 19  }
  0x18   :  { %s7094_s27 = sld [smem:[%s8035_s0 + %s6959_s22]]   ;;  %s6963_s22 = smov 20  }
  0x19   :  { %8054 = sst [smem:[#allocation39_spill]] %s7074_s30 }
  0x1a   :  { %8055 = sst [smem:[#allocation40_spill]] %s7079_s6 }
  0x1b   :  { %s7099_s4 = sld [smem:[%s8035_s0 + %s6960_s28]]   ;;  %s6964_s28 = smov 21  }
  0x1c   :  { %8056 = sst [smem:[#allocation41_spill]] %s7084_s12 }
  0x1d   :  { %8057 = sst [smem:[#allocation42_spill]] %s7089_s20 }
  0x1e   :  { %8058 = sst [smem:[#allocation43_spill]] %s7094_s27 }
  0x1f   :  { %s7104_s12 = sld [smem:[%s8035_s0 + %s6961_s7]]   ;;  %s6965_s7 = smov 22  }
  0x20   :  { %s7109_s30 = sld [smem:[%s8035_s0 + %s6962_s15]]   ;;  %s6966_s15 = smov 23  }
  0x21   :  { %8059 = sst [smem:[#allocation44_spill]] %s7099_s4 }
  0x22   :  { %s7114_s27 = sld [smem:[%s8035_s0 + %s6963_s22]]   ;;  %s6967_s22 = smov 24  }
  0x23   :  { %s7119_s4 = sld [smem:[%s8035_s0 + %s6964_s28]]   ;;  %s6968_s28 = smov 25  }
  0x24   :  { %s7129_s20 = sld [smem:[%s8035_s0 + %s6966_s15]]   ;;  %s6970_s15 = smov 27  }
  0x25   :  { %8060 = sst [smem:[#allocation45_spill]] %s7104_s12 }
  0x26   :  { %s7124_s12 = sld [smem:[%s8035_s0 + %s6965_s7]]   ;;  %s6969_s7 = smov 26  }
  0x27   :  { %s7139_s19 = sld [smem:[%s8035_s0 + %s6968_s28]]   ;;  %s6972_s28 = smov 29  }
  0x28   :  { %8061 = sst [smem:[#allocation46_spill]] %s7114_s27 }
  0x29   :  { %8062 = sst [smem:[#allocation47_spill]] %s7119_s4 }
  0x2a   :  { %s7134_s27 = sld [smem:[%s8035_s0 + %s6967_s22]]   ;;  %s6971_s22 = smov 28  }
  0x2b   :  { %s7149_s8 = sld [smem:[%s8035_s0 + %s6970_s15]]   ;;  %s6974_s15 = smov 31  }
  0x2c   :  { %8063 = sst [smem:[#allocation48_spill]] %s7124_s12 }
  0x2d   :  { %s7144_s12 = sld [smem:[%s8035_s0 + %s6969_s7]]   ;;  %s6973_s7 = smov 30  }
  0x2e   :  { %s7159_s21 = sld [smem:[%s8035_s0 + %s6972_s28]]   ;;  %s6976_s28 = smov 33  }
  0x2f   :  { %s7169_s29 = sld [smem:[%s8035_s0 + %s6974_s15]]   ;;  %s6978_s15 = smov 35  }
  0x30   :  { %8064 = sst [smem:[#allocation49_spill]] %s7134_s27 }
  0x31   :  { %8066 = sst [smem:[#allocation51_spill]] %s7149_s8 }
  0x32   :  { %s7154_s27 = sld [smem:[%s8035_s0 + %s6971_s22]]   ;;  %s6975_s22 = smov 32  }
  0x33   :  { %8065 = sst [smem:[#allocation50_spill]] %s7144_s12 }
  0x34   :  { %s7164_s12 = sld [smem:[%s8035_s0 + %s6973_s7]]   ;;  %s6977_s7 = smov 34  }
  0x35   :  { %8069 = sst [smem:[#allocation54_spill]] %s7169_s29 }
  0x36   :  { %s7179_s13 = sld [smem:[%s8035_s0 + %s6976_s28]]   ;;  %s6980_s28 = smov 37  }
  0x37   :  { %s7189_s29 = sld [smem:[%s8035_s0 + %s6978_s15]]  }
  0x38   :  { %8067 = sst [smem:[#allocation52_spill]] %s7154_s27 }
  0x39   :  { %s7174_s27 = sld [smem:[%s8035_s0 + %s6975_s22]]   ;;  %s6979_s22 = smov 36  }
  0x3a   :  { %8068 = sst [smem:[#allocation53_spill]] %s7164_s12 }
  0x3b   :  { %s7184_s12 = sld [smem:[%s8035_s0 + %s6977_s7]]  }
  0x3c   :  { %8071 = sst [smem:[#allocation56_spill]] %s7179_s13 }
  0x3d   :  { %s7199_s13 = sld [smem:[%s8035_s0 + %s6980_s28]]  }
  0x3f   :  { %8070 = sst [smem:[#allocation55_spill]] %s7174_s27 }
  0x40   :  { %s7194_s27 = sld [smem:[%s8035_s0 + %s6979_s22]]  }
  0x41   :  { %8072 = sst [smem:[#allocation57_spill]] %s7184_s12 }
  0x43   :  { %8074 = sst [smem:[#allocation59_spill]] %s7199_s13 }
  0x46   :  { %8073 = sst [smem:[#allocation58_spill]] %s7194_s27 }
  0x47   :  { %80 = vsyncpa [#allocation3], 0 }
  0x48   :  { %82 = vsyncpa [#allocation3 + $0x1], 0 }
  0x49   :  { %83 = vsyncpa [#allocation6], 0 }
  0x4a   :  { %84 = vsyncpa [#allocation9], 0 }
  0x4b   :  { %85 = vsyncpa [#allocation12], 0 }
  0x4c   :  { %86 = vsyncpa [#allocation15], 0 }
  0x4d   :  { %87 = vsyncpa [#allocation18], 0 }
  0x4e   :  { %88 = vsyncpa [#allocation21], 0 }
  0x4f   :  { %89 = vsyncpa [#allocation4], 0 }
  0x50   :  { %91 = vsyncpa [#allocation4 + $0x1], 0  ;;  %s7201_s7 = smov 0   ;;  %s7203_s10 = smov 0  }
  0x51   :  { %s7205_s11 = smov 0   ;;  %s7207_s15 = smov 0  }
  0x52 LB: > { %s6981_s0 = smov [#allocation5]   ;;  %s7222_s18 = sadd.s32 4294967295, %s6942_s15   ;;  %s6942_s15 = sphi %s7207_s15, %s8136_s15   ;;  %s6938_s11 = sphi %s7205_s11, %s8135_s11   ;;  %s6934_s10 = sphi %s7203_s10, %s8134_s10   ;;  %s6930_s7 = sphi %s7201_s7, %s8133_s7  }
  0x53   : > { %s922_s16 = sshll.u32 %s6981_s0, 4  ;;  %p5506_p0 = scmp.ge.s32.totalorder %s6942_s15, 1  ;;  %s923_s16 = int_to_ptr.vmem [resolvable:$true] %s922_s16 }
  0x54   : > { %p8041_p1 = scmp.eq.s32.totalorder %s7222_s18, 0  ;;  %p910_p2 = scmp.lt.s32.totalorder %s6942_s15, 3 }
  0x55   : > { %s6982_s23 = smov [#allocation8]   ;;  %s6983_s1 = smov [#allocation11]  }
  0x56   : > { %p7227_p3 = pnand %p5506_p0, %p910_p2  ;;  %s960_s26 = sshll.u32 %s6982_s23, 4  ;;  %s7240_s26 = int_to_ptr.vmem [resolvable:$true] %s960_s26 }
  0x57   : > { %s992_s2 = sshll.u32 %s6983_s1, 4  ;;  %s6525_s13 = scalar_lea.vmem %s923_s16, 256  ;;  %s7242_s2 = int_to_ptr.vmem [resolvable:$true] %s992_s2 }
  0x58   : > { %s8075_s22 = scalar_select %p7227_p3, 1, 0 }
  0x59   : > { %p6311_p5 = pneg %p7227_p3  ;;  %p6526_p8 = scmp.ne.s32.totalorder %s923_s16, %s6525_s13 }
  0x5a   : > { %p6533_p11 = scmp.lt.s32.totalorder %s923_s16, %s923_s16  ;;  %p6534_p12 = scmp.lt.s32.totalorder %s6525_s13, %s6525_s13 }
  0x5b   : > { %p7236_p6 = pnand %p6311_p5, %p8041_p1 }
  0x5c   : > { %p6535_p13 = por %p6534_p12, %p6533_p11 }
  0x5d   : > { %p7246_p7 = pneg %p7236_p6 }
  0x5f   : > { %p6528_p9 = pnand %p6526_p8, %p7246_p7 }
  0x61   : > { %p6529_p10 = pneg %p6528_p9 }
  0x63   : > { %p6536_p0 = pnand %p6535_p13, %p6529_p10 }
  0x65   : > { %6539 = shalt.err (!%p6536_p0)
}
  0x66   : > { %s8037_s23 = smov 128   ;;  %s8078_s9 = sld [smem:[#allocation32_spill]] }
  0x67   : > { %s8039_s1 = smov 8   ;;  %s6551_s27 = scalar_lea.vmem %s7240_s26, 2048 }
  0x68   : > { %p6552_p2 = scmp.ne.s32.totalorder %s7240_s26, %s6551_s27  ;;  %p6559_p9 = scmp.lt.s32.totalorder %s7240_s26, %s7240_s26 }
  0x69   : > { %p6560_p10 = scmp.lt.s32.totalorder %s6551_s27, %s6551_s27 }
  0x6a   : > { %p6554_p5 = pnand %p6552_p2, %p7246_p7 }
  0x6b   : > { %p6561_p11 = por %p6560_p10, %p6559_p9 }
  0x6c   : > { %6314 = dma.hbm_to_vmem [thread:$0]  (!%p7236_p6), %s8078_s9, 256, %s923_s16, [#allocation6], %s8037_s23, %s8037_s23, %s8039_s1  }
  0x6d   : > { %p6555_p8 = pneg %p6554_p5 }
  0x6f   : > { %p6562_p12 = pnand %p6561_p11, %p6555_p8 }
  0x71   : > { %6565 = shalt.err (!%p6562_p12)
}
  0x72   : > { %s8079_s3 = sld [smem:[#allocation36_spill]]  ;;  %s6577_s13 = scalar_lea.vmem %s7242_s2, 4096 }
  0x73   : > { %p6578_p13 = scmp.ne.s32.totalorder %s7242_s2, %s6577_s13  ;;  %p6585_p5 = scmp.lt.s32.totalorder %s7242_s2, %s7242_s2 }
  0x74   : > { %p6586_p8 = scmp.lt.s32.totalorder %s6577_s13, %s6577_s13 }
  0x75   : > { %p6580_p0 = pnand %p6578_p13, %p7246_p7 }
  0x76   : > { %p6587_p9 = por %p6586_p8, %p6585_p5 }
  0x77   : > { %p6581_p2 = pneg %p6580_p0 }
  0x78   : > { %6320 = dma.hbm_to_vmem [thread:$0]  (!%p7236_p6), %s8079_s3, 2048, %s7240_s26, [#allocation9], %s8037_s23, %s8037_s23, %s8039_s1  }
  0x79   : > { %p6588_p10 = pnand %p6587_p9, %p6581_p2 }
  0x7b   : > { %6591 = shalt.err (!%p6588_p10)
}
  0x7c   : > { %s8042_s27 = smov 256   ;;  %s6987_s16 = smov 16  }
  0x7d   : > { %6326 = dma.hbm_to_vmem [thread:$0]  (!%p7236_p6), %s7069_s24, 4096, %s7242_s2, [#allocation12], %s8042_s27, %s8042_s27, %s6987_s16  }
  0x7e   : > { %s6988_s26 = smov [#allocation14]   ;;  %s6989_s1 = smov [#allocation17]  }
  0x7f   : > { %s1036_s23 = sshll.u32 %s6988_s26, 4  ;;  %s1068_s3 = sshll.u32 %s6989_s1, 4  ;;  %s1037_s23 = int_to_ptr.vmem [resolvable:$true] %s1036_s23  ;;  %s1069_s3 = int_to_ptr.vmem [resolvable:$true] %s1068_s3 }
  0x80   : > { %s6603_s13 = scalar_lea.vmem %s1037_s23, 2048  ;;  %p6611_p0 = scmp.lt.s32.totalorder %s1037_s23, %s1037_s23 }
  0x81   : > { %p6604_p11 = scmp.ne.s32.totalorder %s1037_s23, %s6603_s13  ;;  %p6612_p2 = scmp.lt.s32.totalorder %s6603_s13, %s6603_s13 }
  0x83   : > { %p6606_p12 = pnand %p6604_p11, %p7246_p7  ;;  %p6613_p5 = por %p6612_p2, %p6611_p0 }
  0x85   : > { %p6607_p13 = pneg %p6606_p12 }
  0x87   : > { %p6614_p8 = pnand %p6613_p5, %p6607_p13 }
  0x89   : > { %6617 = shalt.err (!%p6614_p8)
}
  0x8a   : > { %s8080_s9 = smov 8   ;;  %s8081_s12 = smov 128  }
  0x8b   : > { %6332 = dma.hbm_to_vmem [thread:$0]  (!%p7236_p6), %s7109_s30, 2048, %s1037_s23, [#allocation15], %s8081_s12, %s8081_s12, %s8080_s9  }
  0x8c   : > { %s6629_s2 = scalar_lea.vmem %s1069_s3, 2048  ;;  %p6637_p12 = scmp.lt.s32.totalorder %s1069_s3, %s1069_s3 }
  0x8d   : > { %p6630_p9 = scmp.ne.s32.totalorder %s1069_s3, %s6629_s2  ;;  %p6638_p4 = scmp.lt.s32.totalorder %s6629_s2, %s6629_s2 }
  0x8f   : > { %p6632_p10 = pnand %p6630_p9, %p7246_p7  ;;  %p6639_p1 = por %p6638_p4, %p6637_p12 }
  0x91   : > { %p6633_p11 = pneg %p6632_p10 }
  0x93   : > { %p6640_p0 = pnand %p6639_p1, %p6633_p11 }
  0x95   : > { %6643 = shalt.err (!%p6640_p0)
}
  0x96   : > { %6338 = dma.hbm_to_vmem [thread:$0]  (!%p7236_p6), %s7129_s20, 2048, %s1069_s3, [#allocation18], %s8081_s12, %s8081_s12, %s8080_s9  }
  0x97   : > { %s6990_s23 = smov [#allocation20]   ;;  %s6991_s26 = smov [#allocation7]  }
  0x98   : > { %s1100_s1 = sshll.u32 %s6990_s23, 4  ;;  %s944_s13 = sshll.u32 %s6991_s26, 4  ;;  %s1101_s1 = int_to_ptr.vmem [resolvable:$true] %s1100_s1  ;;  %s945_s13 = int_to_ptr.vmem [resolvable:$true] %s944_s13 }
  0x99   : > { %s6655_s27 = scalar_lea.vmem %s1101_s1, 4096  ;;  %p6663_p1 = scmp.lt.s32.totalorder %s1101_s1, %s1101_s1 }
  0x9a   : > { %p6656_p13 = scmp.ne.s32.totalorder %s1101_s1, %s6655_s27  ;;  %p6664_p5 = scmp.lt.s32.totalorder %s6655_s27, %s6655_s27 }
  0x9c   : > { %p6658_p2 = pnand %p6656_p13, %p7246_p7  ;;  %p6665_p8 = por %p6664_p5, %p6663_p1 }
  0x9e   : > { %p6659_p4 = pneg %p6658_p2 }
  0xa0   : > { %p6666_p9 = pnand %p6665_p8, %p6659_p4 }
  0xa2   : > { %6669 = shalt.err (!%p6666_p9)
}
  0xa3   : > { %s8082_s2 = smov 256   ;;  %s8083_s8 = sld [smem:[#allocation51_spill]] }
  0xa4   : > { %s6681_s3 = scalar_lea.vmem %s945_s13, 2048  ;;  %p6689_p0 = scmp.lt.s32.totalorder %s945_s13, %s945_s13 }
  0xa5   : > { %p6682_p10 = scmp.ne.s32.totalorder %s945_s13, %s6681_s3  ;;  %p6690_p13 = scmp.lt.s32.totalorder %s6681_s3, %s6681_s3 }
  0xa7   : > { %p6684_p11 = pnand %p6682_p10, %p7246_p7  ;;  %p6691_p2 = por %p6690_p13, %p6689_p0 }
  0xa9   : > { %6344 = dma.hbm_to_vmem [thread:$0]  (!%p7236_p6), %s8083_s8, 4096, %s1101_s1, [#allocation21], %s8082_s2, %s8082_s2, %s6987_s16  }
  0xaa   : > { %p6685_p12 = pneg %p6684_p11 }
  0xac   : > { %p6692_p1 = pnand %p6691_p2, %p6685_p12 }
  0xae   : > { %6695 = shalt.err (!%p6692_p1)
}
  0xaf   : > { %6317 = dma.hbm_to_vmem [thread:$0]  (!%p7236_p6), %s7039_s25, 2048, %s945_s13, [#allocation6], %s8081_s12, %s8081_s12, %s8080_s9  }
  0xb0   : > { %s6992_s27 = smov [#allocation10]   ;;  %s6993_s23 = smov [#allocation13]  }
  0xb1   : > { %s976_s16 = sshll.u32 %s6992_s27, 4  ;;  %s1008_s1 = sshll.u32 %s6993_s23, 4  ;;  %s977_s16 = int_to_ptr.vmem [resolvable:$true] %s976_s16  ;;  %s1009_s1 = int_to_ptr.vmem [resolvable:$true] %s1008_s1 }
  0xb2   : > { %s6707_s26 = scalar_lea.vmem %s977_s16, 2048  ;;  %p6715_p9 = scmp.lt.s32.totalorder %s977_s16, %s977_s16 }
  0xb3   : > { %p6708_p4 = scmp.ne.s32.totalorder %s977_s16, %s6707_s26  ;;  %p6716_p10 = scmp.lt.s32.totalorder %s6707_s26, %s6707_s26 }
  0xb5   : > { %p6710_p5 = pnand %p6708_p4, %p7246_p7  ;;  %p6717_p11 = por %p6716_p10, %p6715_p9 }
  0xb7   : > { %p6711_p8 = pneg %p6710_p5 }
  0xb9   : > { %p6718_p12 = pnand %p6717_p11, %p6711_p8 }
  0xbb   : > { %6721 = shalt.err (!%p6718_p12)
}
  0xbc   : > { %6323 = dma.hbm_to_vmem [thread:$0]  (!%p7236_p6), %s7059_s14, 2048, %s977_s16, [#allocation9], %s8081_s12, %s8081_s12, %s8080_s9  }
  0xbd   : > { %s6733_s13 = scalar_lea.vmem %s1009_s1, 4096  ;;  %p6741_p1 = scmp.lt.s32.totalorder %s1009_s1, %s1009_s1 }
  0xbe   : > { %p6734_p0 = scmp.ne.s32.totalorder %s1009_s1, %s6733_s13  ;;  %p6742_p4 = scmp.lt.s32.totalorder %s6733_s13, %s6733_s13 }
  0xc0   : > { %p6736_p13 = pnand %p6734_p0, %p7246_p7  ;;  %p6743_p5 = por %p6742_p4, %p6741_p1 }
  0xc2   : > { %p6737_p2 = pneg %p6736_p13 }
  0xc4   : > { %p6744_p9 = pnand %p6743_p5, %p6737_p2 }
  0xc6   : > { %6747 = shalt.err (!%p6744_p9)
}
  0xc7   : > { %s8084_s6 = sld [smem:[#allocation40_spill]]  ;;  %s6994_s2 = smov [#allocation16]  }
  0xc8   : > { %s1052_s3 = sshll.u32 %s6994_s2, 4  ;;  %s6995_s27 = smov [#allocation19]   ;;  %s1053_s3 = int_to_ptr.vmem [resolvable:$true] %s1052_s3 }
  0xc9   : > { %s1084_s16 = sshll.u32 %s6995_s27, 4  ;;  %s6759_s23 = scalar_lea.vmem %s1053_s3, 2048  ;;  %s1085_s16 = int_to_ptr.vmem [resolvable:$true] %s1084_s16 }
  0xca   : > { %p6760_p8 = scmp.ne.s32.totalorder %s1053_s3, %s6759_s23  ;;  %p6767_p12 = scmp.lt.s32.totalorder %s1053_s3, %s1053_s3 }
  0xcb   : > { %p6768_p0 = scmp.lt.s32.totalorder %s6759_s23, %s6759_s23 }
  0xcc   : > { %p6762_p10 = pnand %p6760_p8, %p7246_p7 }
  0xcd   : > { %6329 = dma.hbm_to_vmem [thread:$0]  (!%p7236_p6), %s8084_s6, 4096, %s1009_s1, [#allocation12], %s8081_s12, %s8081_s12, %s8080_s9  }
  0xce   : > { %p6763_p11 = pneg %p6762_p10  ;;  %p6769_p13 = por %p6768_p0, %p6767_p12 }
  0xd0   : > { %p6770_p2 = pnand %p6769_p13, %p6763_p11 }
  0xd2   : > { %6773 = shalt.err (!%p6770_p2)
}
  0xd3   : > { %s8085_s4 = sld [smem:[#allocation47_spill]]  ;;  %s6785_s1 = scalar_lea.vmem %s1085_s16, 2048 }
  0xd4   : > { %p6786_p1 = scmp.ne.s32.totalorder %s1085_s16, %s6785_s1  ;;  %p6793_p9 = scmp.lt.s32.totalorder %s1085_s16, %s1085_s16 }
  0xd5   : > { %p6794_p8 = scmp.lt.s32.totalorder %s6785_s1, %s6785_s1 }
  0xd6   : > { %p6788_p4 = pnand %p6786_p1, %p7246_p7 }
  0xd7   : > { %p6795_p10 = por %p6794_p8, %p6793_p9 }
  0xd8   : > { %p6789_p5 = pneg %p6788_p4 }
  0xd9   : > { %6335 = dma.hbm_to_vmem [thread:$0]  (!%p7236_p6), %s8085_s4, 2048, %s1053_s3, [#allocation15], %s8081_s12, %s8081_s12, %s8080_s9  }
  0xda   : > { %p6796_p12 = pnand %p6795_p10, %p6789_p5 }
  0xdc   : > { %6799 = shalt.err (!%p6796_p12)
}
  0xdd   : > { %6341 = dma.hbm_to_vmem [thread:$0]  (!%p7236_p6), %s7139_s19, 2048, %s1085_s16, [#allocation18], %s8081_s12, %s8081_s12, %s8080_s9  }
  0xde   : > { %s6996_s26 = smov [#allocation22]  }
  0xdf   : > { %s1116_s13 = sshll.u32 %s6996_s26, 4  ;;  %s1117_s13 = int_to_ptr.vmem [resolvable:$true] %s1116_s13 }
  0xe0   : > { %s6811_s2 = scalar_lea.vmem %s1117_s13, 4096  ;;  %p6819_p2 = scmp.lt.s32.totalorder %s1117_s13, %s1117_s13 }
  0xe1   : > { %p6812_p11 = scmp.ne.s32.totalorder %s1117_s13, %s6811_s2  ;;  %p6820_p1 = scmp.lt.s32.totalorder %s6811_s2, %s6811_s2 }
  0xe3   : > { %p6814_p0 = pnand %p6812_p11, %p7246_p7  ;;  %p6821_p4 = por %p6820_p1, %p6819_p2 }
  0xe5   : > { %p6815_p13 = pneg %p6814_p0 }
  0xe7   : > { %p6822_p5 = pnand %p6821_p4, %p6815_p13 }
  0xe9   : > { %6825 = shalt.err (!%p6822_p5)
}
  0xea   : > { %6347 = dma.hbm_to_vmem [thread:$0]  (!%p7236_p6), %s7159_s21, 4096, %s1117_s13, [#allocation21], %s8081_s12, %s8081_s12, %s8080_s9  }
  0xeb   : > { %s5505_s28 = sadd.s32 4294967294, %s6942_s15   ;;  %s7358_s0 = sadd.s32 1, %s6942_s15  }
  0xec   : > { %s101_s3 = ssub.s32 %s6942_s15, %s7358_s0  ;;  %s104_s27 = sadd.s32 1, %s6938_s11 }
  0xed   : > { %p102_p7 = scmp.eq.s32.totalorder %s101_s3, 0  ;;  %p111_p9 = scmp.ne.s32.totalorder %s6938_s11, %s6934_s10 }
  0xee   : > { %p112_p8 = scmp.eq.s32.totalorder %s6942_s15, 0  ;;  %p117_p10 = scmp.ne.s32.totalorder %s6934_s10, %s6930_s7 }
  0xef   : > { %s7369_s16 = scalar_select %p102_p7, %s6938_s11, %s104_s27  }
  0xf0   : > { %p7371_p12 = por %p112_p8, %p111_p9  ;;  %p8087_p11 = scmp.eq.s32.totalorder %s7222_s18, 0 }
  0xf1   : > { %p897_p0 = scmp.eq.s32.totalorder %s7222_s18, 1  ;;  %p903_p13 = scmp.eq.s32.totalorder %s5505_s28, 1 }
  0xf2   : > { %p7377_p6 = por %p8087_p11, %p117_p10  ;;  %p6368_p2 = scmp.lt.s32.totalorder %s6942_s15, 2 }
  0xf3   : > { %s1151_s12 = sand.u32 1, %s6938_s11   ;;  %p7384_p1 = por %p897_p0, %p111_p9 }
  0xf4   : > { %s8088_s9 = scalar_select %p7377_p6, 1, 0 }
  0xf5   : > { %s8089_s1 = scalar_select %p7384_p1, 1, 0 }
  0xf6   : > { %p7388_p4 = por %p903_p13, %p117_p10  ;;  %s5520_s13 = sshll.u32 %s1151_s12, 3 }
  0xf7   : > { %s5521_s2 = sshll.u32 %s6942_s15, 7  ;;  %s1155_s28 = scalar_lea.vmem [#allocation2], %s5520_s13 }
  0xf8   : > { %s8090_s26 = scalar_select %p7388_p4, 1, 0 }
  0xf9   : > { %s7394_s3 = scalar_lea.hbm %s7014_s5, %s5521_s2  ;;  %s1162_s27 = sshll.u32 %s1155_s28, 4  ;;  %s1163_s27 = int_to_ptr.vmem [resolvable:$true] %s1162_s27 }
  0xfa   : > { %p7398_p5 = pnand %p6368_p2, %p7371_p12  ;;  %s1152_s6 = scalar_lea.sflag [#allocation3], %s1151_s12 }
  0xfb   : > { %s6826_s8 = scalar_lea.hbm %s7394_s3, 128  ;;  %s6831_s2 = scalar_lea.hbm %s7014_s5, 256 }
  0xfc   : > { %s8091_s4 = scalar_select %p7398_p5, 1, 0 }
  0xfd   : > { %p6827_p7 = scmp.ne.s32.totalorder %s7394_s3, %s6826_s8  ;;  %p6828_p9 = pneg %p7398_p5 }
  0xfe   : > { %p6832_p11 = scmp.lt.s32.totalorder %s7394_s3, %s7014_s5  ;;  %p6833_p0 = scmp.lt.s32.totalorder %s6831_s2, %s6826_s8 }
  0xff   : > { %p6829_p8 = pnand %p6828_p9, %p6827_p7 }
 0x100   : > { %p6834_p13 = por %p6833_p0, %p6832_p11 }
 0x101   : > { %p6830_p10 = pneg %p6829_p8 }
 0x103   : > { %p6835_p4 = pnand %p6834_p13, %p6830_p10 }
 0x105   : > { %6838 = shalt.err (!%p6835_p4)
}
 0x106   : > { %s6839_s13 = scalar_lea.vmem %s1163_s27, 128  ;;  %s6997_s23 = smov [#allocation2]  }
 0x107   : > { %p6840_p1 = scmp.ne.s32.totalorder %s1163_s27, %s6839_s13  ;;  %s6844_s28 = sshll.u32 %s6997_s23, 4  ;;  %s6845_s28 = int_to_ptr.vmem [resolvable:$false] %s6844_s28 }
 0x108   : > { %s6846_s12 = scalar_lea.vmem %s6845_s28, 256  ;;  %p6847_p6 = scmp.lt.s32.totalorder %s1163_s27, %s6845_s28 }
 0x109   : > { %p6842_p12 = pnand %p6840_p1, %p6828_p9  ;;  %p6848_p3 = scmp.lt.s32.totalorder %s6846_s12, %s6839_s13 }
 0x10b   : > { %p6843_p2 = pneg %p6842_p12  ;;  %p6849_p5 = por %p6848_p3, %p6847_p6 }
 0x10d   : > { %p6850_p7 = pnand %p6849_p5, %p6843_p2 }
 0x10f   : > { %6853 = shalt.err (!%p6850_p7)
}
 0x110   : > { %p8092_p8 = scmp.ne.s32.totalorder %s8091_s4, 0  ;;  %p8093_p10 = scmp.ne.s32.totalorder %s8075_s22, 0 }
 0x111   : > { %s7415_s8 = sand.u32 (!%p8093_p10), 1, %s6934_s10   ;;  %p8094_p1 = scmp.ne.s32.totalorder (!%p8093_p10), %s8088_s9, 0 }
 0x112   : > { %6351 = dma.hbm_to_vmem [thread:$0]  (!%p8092_p8), %s7394_s3, 128, %s1163_s27, %s1152_s6  }
 0x113   : > { %1171 = sbr.rel (%p8093_p10) target bundleno = 5027 (0x13a3), region = 168  ;;  %s5523_s2 = sshll.u32 (!%p8093_p10), %s7415_s8, 3 }
 0x114   : > { %s1174_s23 = scalar_lea.sflag (!%p8093_p10), [#allocation3], %s7415_s8  ;;  %s1177_s28 = scalar_lea.vmem (!%p8093_p10), [#allocation2], %s5523_s2 }
 0x118   : > { %6897 = dma.done.wait (%p8094_p1), %s1174_s23, 128  }
 0x119   : > { %6899 = vsyncadd (%p8094_p1), %s1174_s23, 4294967168  ;;  %p8095_p3 = scmp.eq.s32.totalorder %s7222_s18, 0 }
 0x11b   : > { %6901 = dma.done.wait (%p8095_p3), [#allocation6], 2304   ;;  %p8096_p6 = pmov %p8095_p3 }
 0x11c   : > { %p8097_p4 = pmov %p8095_p3 }
 0x11d   : > { %6903 = vsyncadd (%p8096_p6), [#allocation6], 4294964992 }
 0x11e   : > { %6905 = dma.done.wait (%p8097_p4), [#allocation9], 4096   ;;  %p8098_p5 = pmov %p8095_p3 }
 0x11f   : > { %p8099_p9 = pmov %p8095_p3 }
 0x120   : > { %6907 = vsyncadd (%p8098_p5), [#allocation9], 4294963200 }
 0x121   : > { %6909 = dma.done.wait (%p8099_p9), [#allocation12], 8192   ;;  %p8100_p11 = pmov %p8095_p3 }
 0x122   : > { %p8101_p0 = pmov %p8095_p3 }
 0x123   : > { %6911 = vsyncadd (%p8100_p11), [#allocation12], 4294959104 }
 0x124   : > { %6913 = dma.done.wait (%p8101_p0), [#allocation15], 4096   ;;  %p8102_p13 = pmov %p8101_p0 }
 0x125   : > { %p8103_p12 = pmov %p8101_p0 }
 0x126   : > { %6915 = vsyncadd (%p8102_p13), [#allocation15], 4294963200 }
 0x127   : > { %6917 = dma.done.wait (%p8103_p12), [#allocation18], 4096   ;;  %p8104_p2 = pmov %p8101_p0 }
 0x128   : > { %p8105_p7 = pmov %p8101_p0 }
 0x129   : > { %6919 = vsyncadd (%p8104_p2), [#allocation18], 4294963200 }
 0x12a   : > { %6921 = dma.done.wait (%p8105_p7), [#allocation21], 8192   ;;  %p8106_p8 = pmov %p8101_p0 }
 0x12b   : > { %v6998_v0 = vmov 0.0   ;;  %vm6999_vm0 = vmmov 0   ;;  %v1317_v1 = vld [vmem:[#allocation5 + $0x8] sm:$0xff]  ;;  %v1316_v2 = vld [vmem:[#allocation5] sm:$0xff]  ;;  %v1315_v3 = vld [vmem:[%s1177_s28] sm:$0xff]  ;;  %vm1325_vm1 = vcmask 130048  }
 0x12c   : > { %6923 = vsyncadd (%p8106_p8), [#allocation21], 4294959104  ;;  %5857 = vmatprep.subr.mxu0 %v6998_v0  ;;  %5861 = vmatprep.mubr.msk.f32.mxu0 %vm6999_vm0, %v6998_v0  ;;  %v1414_v4 = vld [vmem:[%s7029_s17 + $0x78] sm:$0xff]  ;;  %v1413_v6 = vld [vmem:[%s7029_s17 + $0x70] sm:$0xff]  ;;  %s8107_s6 = sld [smem:[#allocation33_spill]]  ;;  %s7000_s9 = smov 32  }
 0x12d   : > { %5864 = vmatprep.subr.mxu1 %v6998_v0  ;;  %5896 = vmatprep.mubr.msk.f32.mxu1 %vm6999_vm0, %v6998_v0  ;;  %v1507_v5 = vld [vmem:[#allocation7 + $0x78] sm:$0xff]  ;;  %v1506_v7 = vld [vmem:[#allocation7 + $0x70] sm:$0xff]  ;;  %v1412_v8 = vld [vmem:[%s7029_s17 + $0x68] sm:$0xff]  ;;  %s8108_s4 = sld [smem:[#allocation35_spill]]  ;;  %s7001_s3 = smov 96   ;;  %vm2116_vm2 = vcmask 261120  }
 0x12e   : > { %5858 = vmatpush3.msra.mxu0 %v1317_v1  ;;  %5865 = vmatpush3.msra.mxu1 %v1414_v4  ;;  %v1505_v9 = vld [vmem:[#allocation7 + $0x68] sm:$0xff]  ;;  %v1411_v10 = vld [vmem:[%s7029_s17 + $0x60] sm:$0xff]  ;;  %v1410_v12 = vld [vmem:[%s7029_s17 + $0x58] sm:$0xff]  ;;  %s8109_s22 = sld [smem:[#allocation34_spill]]  ;;  %s7002_s27 = smov 64   ;;  %vm2421_vm3 = vcmask 64512  }
 0x12f   : > { %5859 = vmatprep.subr.mxu0 %v6998_v0  ;;  %5866 = vmatprep.subr.mxu1 %v6998_v0  ;;  %v1504_v11 = vld [vmem:[#allocation7 + $0x60] sm:$0xff]  ;;  %v1503_v13 = vld [vmem:[#allocation7 + $0x58] sm:$0xff]  ;;  %v1409_v14 = vld [vmem:[%s7029_s17 + $0x50] sm:$0xff]  ;;  %s8110_s13 = sld [smem:[#allocation37_spill]]  ;;  %vm2907_vm4 = vcmask 523264   ;;  %vm2909_vm5 = vcmask 785408  }
 0x130   : > { %5860 = vmatpush3.msra.mxu0 %v1316_v2  ;;  %5867 = vmatpush3.msra.mxu1 %v1413_v6  ;;  %v1502_v15 = vld [vmem:[#allocation7 + $0x50] sm:$0xff]  ;;  %v1408_v16 = vld [vmem:[%s7029_s17 + $0x48] sm:$0xff]  ;;  %v1407_v18 = vld [vmem:[%s7029_s17 + $0x40] sm:$0xff]  ;;  %v7004_v6 = vmov 1934713408   ;;  %s8111_s12 = sld [smem:[#allocation38_spill]] }
 0x131   : > { %5862 = vmatmul.mubr.msk.f32.vlgmr.msra.gmra.mxu0 %vm1325_vm1, %v1315_v3  ;;  %5899 = vmatprep.subr.mxu0 %v6998_v0  ;;  %v1501_v17 = vld [vmem:[#allocation7 + $0x48] sm:$0xff]  ;;  %v1500_v19 = vld [vmem:[#allocation7 + $0x40] sm:$0xff]  ;;  %v1406_v20 = vld [vmem:[%s7029_s17 + $0x38] sm:$0xff]  ;;  %v7003_v3 = vmov 1983009808   ;;  %s8112_s2 = sld [smem:[#allocation42_spill]] }
 0x132   : > { %5900 = vmatpush3.msra.mxu0 %v1507_v5  ;;  %5868 = vmatprep.subr.mxu1 %v6998_v0  ;;  %v1499_v21 = vld [vmem:[#allocation7 + $0x38] sm:$0xff]  ;;  %v1405_v22 = vld [vmem:[%s7029_s17 + $0x30] sm:$0xff]  ;;  %v1404_v24 = vld [vmem:[%s7029_s17 + $0x28] sm:$0xff]  ;;  %v1691_v4 = vunpack.c.l.s4 %v7003_v3  ;;  %v1693_v5 = vlaneseq  ;;  %s8113_s23 = sld [smem:[#allocation43_spill]]  ;;  %vm5273_vm6 = vcmask 8192   ;;  %p8130_p1 = scmp.ne.s32.totalorder %s8089_s1, 0 }
 0x133   : > { %5901 = vmatprep.subr.mxu0 %v6998_v0  ;;  %5869 = vmatpush3.msra.mxu1 %v1412_v8  ;;  %v1498_v23 = vld [vmem:[#allocation7 + $0x30] sm:$0xff]  ;;  %v1497_v25 = vld [vmem:[#allocation7 + $0x28] sm:$0xff]  ;;  %v1403_v26 = vld [vmem:[%s7029_s17 + $0x20] sm:$0xff]  ;;  %s8114_s28 = sld [smem:[#allocation39_spill]] }
 0x134   : > { %5902 = vmatpush3.msra.mxu0 %v1506_v7  ;;  %5870 = vmatprep.subr.mxu1 %v6998_v0  ;;  %v1496_v27 = vld [vmem:[#allocation7 + $0x20] sm:$0xff]  ;;  %v1402_v28 = vld [vmem:[%s7029_s17 + $0x18] sm:$0xff]  ;;  %v1401_v30 = vld [vmem:[%s7029_s17 + $0x10] sm:$0xff]  ;;  %v1723_v7 = vunpack.c.l.s4 %v7004_v6  ;;  %v1692_v8 = vunpack.c.0.s8 %v1691_v4 }
 0x135   : > { %5903 = vmatprep.subr.mxu0 %v6998_v0  ;;  %5871 = vmatpush3.msra.mxu1 %v1411_v10  ;;  %v1495_v29 = vld [vmem:[#allocation7 + $0x18] sm:$0xff]  ;;  %v1494_v31 = vld [vmem:[#allocation7 + $0x10] sm:$0xff]  ;;  %v1400_v32 = vld [vmem:[%s7029_s17 + $0x8] sm:$0xff] }
 0x136   : > { %5904 = vmatpush3.msra.mxu0 %v1505_v9  ;;  %5872 = vmatprep.subr.mxu1 %v6998_v0  ;;  %v1493_v33 = vld [vmem:[#allocation7 + $0x8] sm:$0xff]  ;;  %v1399_v34 = vld [vmem:[%s7029_s17] sm:$0xff]  ;;  %v1600_v39 = vld [vmem:[#allocation8 + $0x78] sm:$0xff]  ;;  %v7543_v9 = vshrl.u32 %v1693_v5, 7 }
 0x137   : > { %5905 = vmatprep.subr.mxu0 %v6998_v0  ;;  %5873 = vmatpush3.msra.mxu1 %v1410_v12  ;;  %v1492_v35 = vld [vmem:[#allocation7] sm:$0xff]  ;;  %v1599_v41 = vld [vmem:[#allocation8 + $0x70] sm:$0xff]  ;;  %v1598_v42 = vld [vmem:[#allocation8 + $0x68] sm:$0xff]  ;;  %v1724_v12 = vunpack.c.0.s8 %v1723_v7 }
 0x138   : > { %5906 = vmatpush3.msra.mxu0 %v1504_v11  ;;  %5874 = vmatprep.subr.mxu1 %v6998_v0  ;;  %v5536_v36 = vld [vmem:[%s8107_s6] ss:$0 sm:$0xff]  ;;  %v1596_v44 = vld [vmem:[#allocation8 + $0x58] sm:$0xff]  ;;  %v1595_v45 = vld [vmem:[#allocation8 + $0x50] sm:$0xff]  ;;  %s8115_s6 = sld [smem:[#allocation41_spill]] }
 0x139   : > { %5907 = vmatprep.subr.mxu0 %v6998_v0  ;;  %5875 = vmatpush3.msra.mxu1 %v1409_v14  ;;  %v1597_v43 = vld [vmem:[#allocation8 + $0x60] sm:$0xff]  ;;  %v1594_v46 = vld [vmem:[#allocation8 + $0x48] sm:$0xff]  ;;  %v1592_v48 = vld [vmem:[#allocation8 + $0x38] sm:$0xff] }
 0x13a   : > { %5908 = vmatpush3.msra.mxu0 %v1503_v13  ;;  %5876 = vmatprep.subr.mxu1 %v6998_v0  ;;  %v1593_v47 = vld [vmem:[#allocation8 + $0x40] sm:$0xff]  ;;  %v1591_v49 = vld [vmem:[#allocation8 + $0x30] sm:$0xff]  ;;  %v1590_v50 = vld [vmem:[#allocation8 + $0x28] sm:$0xff]  ;;  %v7546_v13 = vsub.s32 %v1692_v8, %v7543_v9 }
 0x13b   : > { %5909 = vmatprep.subr.mxu0 %v6998_v0  ;;  %5877 = vmatpush3.msra.mxu1 %v1408_v16  ;;  %v1589_v51 = vld [vmem:[#allocation8 + $0x20] sm:$0xff]  ;;  %v1588_v52 = vld [vmem:[#allocation8 + $0x18] sm:$0xff]  ;;  %v1587_v53 = vld [vmem:[#allocation8 + $0x10] sm:$0xff] }
 0x13c   : > { %5910 = vmatpush3.msra.mxu0 %v1502_v15  ;;  %5878 = vmatprep.subr.mxu1 %v6998_v0  ;;  %v1586_v54 = vld [vmem:[#allocation8 + $0x8] sm:$0xff]  ;;  %v1585_v55 = vld [vmem:[#allocation8] sm:$0xff] }
 0x13d   : > { %5911 = vmatprep.subr.mxu0 %v6998_v0  ;;  %5879 = vmatpush3.msra.mxu1 %v1407_v18  ;;  %v5539_v56 = vld [vmem:[%s8108_s4] ss:$0 sm:$0xff]  ;;  %s8116_s4 = sld [smem:[#allocation44_spill]] }
 0x13e   : > { %5912 = vmatpush3.msra.mxu0 %v1501_v17  ;;  %5880 = vmatprep.subr.mxu1 %v6998_v0  ;;  %v5538_v60 = vld [vmem:[%s8109_s22] ss:$0 sm:$0xff]  ;;  %s8117_s22 = sld [smem:[#allocation45_spill]] }
 0x13f   : > { %5913 = vmatprep.subr.mxu0 %v6998_v0  ;;  %5881 = vmatpush3.msra.mxu1 %v1406_v20  ;;  %v7549_v20 = vsub.s32 %v1724_v12, %v7543_v9 }
 0x140   : > { %5914 = vmatpush3.msra.mxu0 %v1500_v19  ;;  %5882 = vmatprep.subr.mxu1 %v6998_v0 }
 0x141   : > { %5915 = vmatprep.subr.mxu0 %v6998_v0  ;;  %5883 = vmatpush3.msra.mxu1 %v1405_v22 }
 0x142   : > { %5916 = vmatpush3.msra.mxu0 %v1499_v21  ;;  %5884 = vmatprep.subr.mxu1 %v6998_v0 }
 0x143   : > { %5917 = vmatprep.subr.mxu0 %v6998_v0  ;;  %5885 = vmatpush3.msra.mxu1 %v1404_v24 }
 0x144   : > { %5918 = vmatpush3.msra.mxu0 %v1498_v23  ;;  %5886 = vmatprep.subr.mxu1 %v6998_v0 }
 0x145   : > { %5919 = vmatprep.subr.mxu0 %v6998_v0  ;;  %5887 = vmatpush3.msra.mxu1 %v1403_v26 }
 0x146   : > { %5920 = vmatpush3.msra.mxu0 %v1497_v25  ;;  %5888 = vmatprep.subr.mxu1 %v6998_v0 }
 0x147   : > { %5921 = vmatprep.subr.mxu0 %v6998_v0  ;;  %5889 = vmatpush3.msra.mxu1 %v1402_v28 }
 0x148   : > { %5922 = vmatpush3.msra.mxu0 %v1496_v27  ;;  %5890 = vmatprep.subr.mxu1 %v6998_v0 }
 0x149   : > { %5923 = vmatprep.subr.mxu0 %v6998_v0  ;;  %5891 = vmatpush3.msra.mxu1 %v1401_v30 }
 0x14a   : > { %5924 = vmatpush3.msra.mxu0 %v1495_v29  ;;  %5892 = vmatprep.subr.mxu1 %v6998_v0 }
 0x14b   : > { %5925 = vmatprep.subr.mxu0 %v6998_v0  ;;  %5893 = vmatpush3.msra.mxu1 %v1400_v32 }
 0x14c   : > { %5926 = vmatpush3.msra.mxu0 %v1494_v31  ;;  %5894 = vmatprep.subr.mxu1 %v6998_v0 }
 0x14d   : > { %5927 = vmatprep.subr.mxu0 %v6998_v0  ;;  %5931 = vmatprep.mubr.msk.f32.mxu0 %vm6999_vm0, %v6998_v0 }
 0x14e   : > { %5928 = vmatpush3.msra.mxu0 %v1493_v33  ;;  %5895 = vmatpush3.msra.mxu1 %v1399_v34 }
 0x14f   : > { %5929 = vmatprep.subr.mxu0 %v6998_v0  ;;  %5934 = vmatprep.subr.mxu1 %v6998_v0 }
 0x150   : > { %5930 = vmatpush3.msra.mxu0 %v1492_v35 }
 0x151   : > { %5969 = vmatprep.subr.mxu0 %v6998_v0 }
 0x1f1   : > { %v1395_v37 = vpop.f32.mrf.mxu0 }
 0x1f2   : > { %v7506_v38 = vadd.f32 %v5536_v36, %v1395_v37 }
 0x1f3   : > { %v5863_v40 = vpop.f32.mrf.mxu0 }
 0x1f4   : > { %5897 = vmatmul.mubr.f32.vlgmr.msra.gmra.mxu1 %v7506_v38  ;;  %5932 = vmatmul.mubr.f32.vlgmr.msra.gmra.mxu0 %v7506_v38 }
 0x1f5   : > { %5935 = vmatpush3.msra.mxu1 %v1600_v39  ;;  %5966 = vmatprep.mubr.msk.f32.mxu1 %vm6999_vm0, %v6998_v0 }
 0x1f6   : > { %5936 = vmatprep.subr.mxu1 %v6998_v0  ;;  %5971 = vmatprep.mubr.msk.f32.mxu0 %vm6999_vm0, %v6998_v0 }
 0x1f7   : > { %5937 = vmatpush3.msra.mxu1 %v1599_v41 }
 0x1f8   : > { %5938 = vmatprep.subr.mxu1 %v6998_v0 }
 0x1f9   : > { %5939 = vmatpush3.msra.mxu1 %v1598_v42 }
 0x1fa   : > { %5940 = vmatprep.subr.mxu1 %v6998_v0 }
 0x1fb   : > { %5941 = vmatpush3.msra.mxu1 %v1597_v43 }
 0x1fc   : > { %5942 = vmatprep.subr.mxu1 %v6998_v0 }
 0x1fd   : > { %5943 = vmatpush3.msra.mxu1 %v1596_v44 }
 0x1fe   : > { %5944 = vmatprep.subr.mxu1 %v6998_v0 }
 0x1ff   : > { %5945 = vmatpush3.msra.mxu1 %v1595_v45 }
 0x200   : > { %5946 = vmatprep.subr.mxu1 %v6998_v0 }
 0x201   : > { %5947 = vmatpush3.msra.mxu1 %v1594_v46 }
 0x202   : > { %5948 = vmatprep.subr.mxu1 %v6998_v0 }
 0x203   : > { %5949 = vmatpush3.msra.mxu1 %v1593_v47 }
 0x204   : > { %5950 = vmatprep.subr.mxu1 %v6998_v0 }
 0x205   : > { %5951 = vmatpush3.msra.mxu1 %v1592_v48 }
 0x206   : > { %5952 = vmatprep.subr.mxu1 %v6998_v0 }
 0x207   : > { %5953 = vmatpush3.msra.mxu1 %v1591_v49 }
 0x208   : > { %5954 = vmatprep.subr.mxu1 %v6998_v0 }
 0x209   : > { %5955 = vmatpush3.msra.mxu1 %v1590_v50 }
 0x20a   : > { %5956 = vmatprep.subr.mxu1 %v6998_v0 }
 0x20b   : > { %5957 = vmatpush3.msra.mxu1 %v1589_v51 }
 0x20c   : > { %5958 = vmatprep.subr.mxu1 %v6998_v0 }
 0x20d   : > { %5959 = vmatpush3.msra.mxu1 %v1588_v52 }
 0x20e   : > { %5960 = vmatprep.subr.mxu1 %v6998_v0 }
 0x20f   : > { %5961 = vmatpush3.msra.mxu1 %v1587_v53 }
 0x210   : > { %5962 = vmatprep.subr.mxu1 %v6998_v0 }
 0x211   : > { %5963 = vmatpush3.msra.mxu1 %v1586_v54 }
 0x212   : > { %5964 = vmatprep.subr.mxu1 %v6998_v0 }
 0x213   : > { %5965 = vmatpush3.msra.mxu1 %v1585_v55 }
 0x214   : > { %5967 = vmatmul.mubr.f32.vlgmr.msra.gmra.mxu1 %v7506_v38  ;;  %6009 = vmatprep.subr.mxu1 %v6998_v0 }
 0x215   : > { %6041 = vmatprep.mubr.msk.f32.mxu1 %vm6999_vm0, %v6998_v0 }
 0x2b4   : > { %v1488_v57 = vpop.f32.mrf.mxu1  ;;  %v1581_v58 = vpop.f32.mrf.mxu0 }
 0x2b5   : > { %v1582_v59 = vadd.f32 %v5539_v56, %v1581_v58  ;;  %v1489_v63 = vadd.f32 %v5538_v60, %v1488_v57 }
 0x2b6   : > { %v5898_v61 = vpop.f32.mrf.mxu1  ;;  %v5933_v62 = vpop.f32.mrf.mxu0 }
 0x2b7   : > { %1831 = vrot.lane.b32.xlu1 %v1582_v59, %s7000_s9  ;;  %1825 = vrot.lane.b32.xlu0 %v1582_v59, %s7001_s3 }
 0x2bb   : > { %1679 = vrot.lane.b32.xlu1 %v1489_v63, %s7001_s3  ;;  %1828 = vrot.lane.b32.xlu0 %v1582_v59, %s7002_s27 }
 0x2bf   : > { %1685 = vrot.lane.b32.xlu1 %v1489_v63, %s7000_s9  ;;  %1682 = vrot.lane.b32.xlu0 %v1489_v63, %s7002_s27 }
 0x2d4   : > { %v7541_v1 = vpop.f32.mrf.mxu1 }
 0x2d6   : > { %v5968_v2 = vpop.f32.mrf.mxu1 }
 0x329   : > { %v1832_v10 = vpop.permute.xlu1 %1831  ;;  %v1826_v11 = vpop.permute.xlu0 %1825 }
 0x32a   : > { %v1850_v14 = vcombine.low %v1826_v11, %v1832_v10  ;;  %v1851_v15 = vcombine.high %v1826_v11, %v1832_v10 }
 0x32c   : > { %v1858_v21 = vrot.slane %v1850_v14, %v7546_v13  ;;  %v1865_v22 = vrot.slane %v1851_v15, %v7546_v13 }
 0x32d   : > { %v1680_v16 = vpop.permute.xlu1 %1679  ;;  %v1829_v17 = vpop.permute.xlu0 %1828 }
 0x32e   : > { %v1834_v18 = vcombine.low %v1582_v59, %v1829_v17  ;;  %v1835_v19 = vcombine.high %v1582_v59, %v1829_v17 }
 0x330   : > { %v1842_v23 = vrot.slane %v1834_v18, %v7546_v13  ;;  %v1849_v24 = vrot.slane %v1835_v19, %v7546_v13 }
 0x331   : > { %v1686_v25 = vpop.permute.xlu1 %1685  ;;  %v1683_v26 = vpop.permute.xlu0 %1682 }
 0x332   : > { %v1866_v27 = vcombine.low %v1842_v23, %v1858_v21  ;;  %v1867_v28 = vcombine.high %v1842_v23, %v1858_v21  ;;  %v1882_v29 = vcombine.low %v1849_v24, %v1865_v22  ;;  %v1883_v30 = vcombine.high %v1849_v24, %v1865_v22 }
 0x333   : > { %v1704_v31 = vcombine.low %v1680_v16, %v1686_v25  ;;  %v1705_v32 = vcombine.high %v1680_v16, %v1686_v25  ;;  %v1688_v33 = vcombine.low %v1489_v63, %v1683_v26  ;;  %v1689_v34 = vcombine.high %v1489_v63, %v1683_v26 }
 0x334   : > { %v1874_v35 = vrot.slane %v1866_v27, %v7549_v20  ;;  %v1881_v36 = vrot.slane %v1867_v28, %v7549_v20  ;;  %v1890_v37 = vrot.slane %v1882_v29, %v7549_v20  ;;  %v1897_v39 = vrot.slane %v1883_v30, %v7549_v20 }
 0x335   : > { %v1712_v40 = vrot.slane %v1704_v31, %v7546_v13  ;;  %v1719_v41 = vrot.slane %v1705_v32, %v7546_v13  ;;  %v1696_v42 = vrot.slane %v1688_v33, %v7546_v13  ;;  %v1703_v43 = vrot.slane %v1689_v34, %v7546_v13 }
 0x336   : > { %v1902_v44 = vcombine.low %v1874_v35, %v1881_v36  ;;  %v5543_v45 = vcombine.high %v1874_v35, %v1881_v36  ;;  %v1918_v46 = vcombine.low %v1890_v37, %v1897_v39  ;;  %v5544_v47 = vcombine.high %v1890_v37, %v1897_v39 }
 0x337   : > { %v1720_v48 = vcombine.low %v1696_v42, %v1712_v40  ;;  %v1721_v49 = vcombine.high %v1696_v42, %v1712_v40  ;;  %v1736_v50 = vcombine.low %v1703_v43, %v1719_v41  ;;  %v1737_v51 = vcombine.high %v1703_v43, %v1719_v41 }
 0x338   : > { %v1909_v52 = vrot.slane %v1902_v44, %v7546_v13  ;;  %v1917_v53 = vrot.slane %v5543_v45, %v7546_v13  ;;  %v1925_v54 = vrot.slane %v1918_v46, %v7546_v13  ;;  %v1933_v55 = vrot.slane %v5544_v47, %v7546_v13 }
 0x339   : > { %v1728_v56 = vrot.slane %v1720_v48, %v7549_v20  ;;  %v1735_v57 = vrot.slane %v1721_v49, %v7549_v20  ;;  %v1744_v58 = vrot.slane %v1736_v50, %v7549_v20  ;;  %v1751_v59 = vrot.slane %v1737_v51, %v7549_v20 }
 0x33a   : > { %v1934_v60 = vcombine.low %v1909_v52, %v1917_v53  ;;  %v1950_v61 = vcombine.low %v1925_v54, %v1933_v55  ;;  %v1935_v15 = vcombine.high %v1909_v52, %v1917_v53  ;;  %v1951_v16 = vcombine.high %v1925_v54, %v1933_v55 }
 0x33b   : > { %v1756_v62 = vcombine.low %v1728_v56, %v1735_v57  ;;  %v5541_v63 = vcombine.high %v1728_v56, %v1735_v57  ;;  %v1772_v2 = vcombine.low %v1744_v58, %v1751_v59  ;;  %v5542_v3 = vcombine.high %v1744_v58, %v1751_v59  ;;  %v5540_v56 = vld [vmem:[%s8110_s13] ss:$0 sm:$0xff]  ;;  %s8118_s13 = sld [smem:[#allocation48_spill]] }
 0x33c   : > { %v1942_v4 = vrot.slane %v1934_v60, %v7549_v20  ;;  %v1958_v5 = vrot.slane %v1950_v61, %v7549_v20  ;;  %v1949_v24 = vrot.slane %v1935_v15, %v7549_v20  ;;  %v1965_v25 = vrot.slane %v1951_v16, %v7549_v20 }
 0x33d   : > { %v1763_v6 = vrot.slane %v1756_v62, %v7546_v13  ;;  %v1771_v7 = vrot.slane %v5541_v63, %v7546_v13  ;;  %v1779_v8 = vrot.slane %v1772_v2, %v7546_v13  ;;  %v1787_v10 = vrot.slane %v5542_v3, %v7546_v13 }
 0x33e   : > { %v1966_v11 = vcombine.low %v1942_v4, %v1958_v5  ;;  %v1967_v23 = vcombine.high %v1942_v4, %v1958_v5  ;;  %v1968_v29 = vcombine.low %v1949_v24, %v1965_v25  ;;  %v1969_v31 = vcombine.high %v1949_v24, %v1965_v25 }
 0x33f   : > { %v1788_v12 = vcombine.low %v1763_v6, %v1771_v7  ;;  %v1804_v14 = vcombine.low %v1779_v8, %v1787_v10  ;;  %v1789_v19 = vcombine.high %v1763_v6, %v1771_v7  ;;  %v1805_v21 = vcombine.high %v1779_v8, %v1787_v10 }
 0x340   : > { %5970 = vmatpush3.xpose.msk.msra.mxu0 %vm2116_vm2, %v1966_v11  ;;  %v1675_v57 = vadd.f32 %v5540_v56, %v7541_v1 }
 0x341   : > { %5974 = vmatprep.subr.mxu0 %v6998_v0  ;;  %v1796_v17 = vrot.slane %v1788_v12, %v7549_v20  ;;  %v1812_v18 = vrot.slane %v1804_v14, %v7549_v20  ;;  %v1803_v27 = vrot.slane %v1789_v19, %v7549_v20  ;;  %v1819_v28 = vrot.slane %v1805_v21, %v7549_v20 }
 0x343   : > { %v1820_v22 = vcombine.low %v1796_v17, %v1812_v18  ;;  %v1821_v26 = vcombine.high %v1796_v17, %v1812_v18  ;;  %v1822_v30 = vcombine.low %v1803_v27, %v1819_v28  ;;  %v1823_v32 = vcombine.high %v1803_v27, %v1819_v28 }
 0x345   : > { %5972 = vmatmul.mubr.msk.f32.vlgmr.msra.gmra.mxu0 %vm2116_vm2, %v1820_v22 }
 0x346   : > { %5975 = vmatpush3.xpose.msk.msra.mxu0 %vm2116_vm2, %v1967_v23  ;;  %5976 = vmatprep.mubr.msk.f32.mxu0 %vm6999_vm0, %v6998_v0 }
 0x347   : > { %5979 = vmatprep.subr.mxu0 %v6998_v0 }
 0x349   : > { %5977 = vmatmul.mubr.msk.f32.vlgmr.msra.gmra.mxu0 %vm2116_vm2, %v1821_v26 }
 0x34a   : > { %5980 = vmatpush3.xpose.msk.msra.mxu0 %vm2116_vm2, %v1968_v29  ;;  %5981 = vmatprep.mubr.msk.f32.mxu0 %vm6999_vm0, %v6998_v0 }
 0x34b   : > { %5984 = vmatprep.subr.mxu0 %v6998_v0 }
 0x34d   : > { %5982 = vmatmul.mubr.msk.f32.vlgmr.msra.gmra.mxu0 %vm2116_vm2, %v1822_v30 }
 0x34e   : > { %5985 = vmatpush3.xpose.msk.msra.mxu0 %vm2116_vm2, %v1969_v31  ;;  %5986 = vmatprep.mubr.msk.f32.mxu0 %vm6999_vm0, %v6998_v0 }
 0x34f   : > { %5989 = vmatprep.subr.mxu0 %v6998_v0 }
 0x351   : > { %5987 = vmatmul.mubr.msk.f32.vlgmr.msra.gmra.mxu0 %vm2116_vm2, %v1823_v32 }
 0x352   : > { %5991 = vmatprep.mubr.msk.f32.mxu0 %vm6999_vm0, %v6998_v0 }
 0x405   : > { %v2189_v33 = vpop.f32.mrf.mxu0 }
 0x406   : > { %v2422_v34 = vsel %vm2421_vm3, %v2189_v33, -inf }
 0x407   : > { %2423 = vmax.xlane.f32.xlu0 %v2422_v34  ;;  %v5973_v35 = vpop.f32.mrf.mxu0 }
 0x409   : > { %v2265_v36 = vpop.f32.mrf.mxu0 }
 0x40a   : > { %v2425_v37 = vsel %vm2421_vm3, %v2265_v36, -inf }
 0x40b   : > { %2426 = vmax.xlane.f32.xlu1 %v2425_v37  ;;  %v5978_v39 = vpop.f32.mrf.mxu0 }
 0x40d   : > { %v2341_v40 = vpop.f32.mrf.mxu0 }
 0x40e   : > { %v2428_v41 = vsel %vm2421_vm3, %v2341_v40, -inf }
 0x40f   : > { %2429 = vmax.xlane.f32.xlu0 %v2428_v41  ;;  %v5983_v42 = vpop.f32.mrf.mxu0 }
 0x411   : > { %v2417_v43 = vpop.f32.mrf.mxu0 }
 0x412   : > { %v2431_v44 = vsel %vm2421_vm3, %v2417_v43, -inf }
 0x413   : > { %2432 = vmax.xlane.f32.xlu0 %v2431_v44  ;;  %v5988_v45 = vpop.f32.mrf.mxu0 }
 0x490   : > { %v2424_v46 = vpop.xlane.xlu0 %2423 }
 0x491   : > { %v2434_v47 = vsub.f32 %v2189_v33, %v2424_v46 }
 0x493   : > { %v2438_v48 = vmul.f32 1.442695, %v2434_v47 }
 0x494   : > { %v2427_v49 = vpop.xlane.xlu1 %2426 }
 0x495   : > { %6474 = vpow2.f32 %v2438_v48  ;;  %v2435_v50 = vsub.f32 %v2265_v36, %v2427_v49 }
 0x497   : > { %v2440_v51 = vmul.f32 1.442695, %v2435_v50 }
 0x498   : > { %v2430_v58 = vpop.xlane.xlu0 %2429 }
 0x499   : > { %6476 = vpow2.f32 %v2440_v51  ;;  %v2436_v59 = vsub.f32 %v2341_v40, %v2430_v58 }
 0x49b   : > { %v2442_v61 = vmul.f32 1.442695, %v2436_v59 }
 0x49c   : > { %v2433_v60 = vpop.xlane.xlu0 %2432 }
 0x49d   : > { %v2437_v62 = vsub.f32 %v2417_v43, %v2433_v60  ;;  %6478 = vpow2.f32 %v2442_v61  ;;  %v2926_v60 = vld [vmem:[#allocation10 + $0x78] sm:$0xff]  ;;  %v2925_v61 = vld [vmem:[#allocation10 + $0x70] sm:$0xff] }
 0x49e   : > { %6010 = vmatpush3.msra.mxu1 %v2926_v60 }
 0x49f   : > { %v2444_v63 = vmul.f32 1.442695, %v2437_v62  ;;  %6011 = vmatprep.subr.mxu1 %v6998_v0  ;;  %v2924_v62 = vld [vmem:[#allocation10 + $0x68] sm:$0xff] }
 0x4a0   : > { %6012 = vmatpush3.msra.mxu1 %v2925_v61 }
 0x4a1   : > { %6480 = vpow2.f32 %v2444_v63  ;;  %6013 = vmatprep.subr.mxu1 %v6998_v0  ;;  %v2923_v63 = vld [vmem:[#allocation10 + $0x60] sm:$0xff] }
 0x4a2   : > { %v7607_v52 = vpop.eup %6474  ;;  %6014 = vmatpush3.msra.mxu1 %v2924_v62 }
 0x4a3   : > { %v2446_v53 = vsel %vm2421_vm3, %v7607_v52, 0.0  ;;  %6015 = vmatprep.subr.mxu1 %v6998_v0 }
 0x4a4   : > { %2447 = vadd.xlane.f32.xlu1 %v2446_v53  ;;  %6016 = vmatpush3.msra.mxu1 %v2923_v63 }
 0x4a5   : > { %6017 = vmatprep.subr.mxu1 %v6998_v0 }
 0x4a6   : > { %v7611_v54 = vpop.eup %6476 }
 0x4a7   : > { %v2449_v55 = vsel %vm2421_vm3, %v7611_v54, 0.0 }
 0x4a8   : > { %2450 = vadd.xlane.f32.xlu0 %v2449_v55 }
 0x4aa   : > { %v7619_v2 = vpop.eup %6478 }
 0x4ab   : > { %v2452_v3 = vsel %vm2421_vm3, %v7619_v2, 0.0 }
 0x4ae   : > { %v7623_v4 = vpop.eup %6480 }
 0x4af   : > { %v2455_v1 = vsel %vm2421_vm3, %v7623_v4, 0.0 }
 0x4b5   : > { %1974 = vrot.lane.b32.xlu1 %v1675_v57, %s7002_s27 }
 0x4be   : > { %1971 = vrot.lane.b32.xlu0 %v1675_v57, %s7001_s3 }
 0x4d9   : > { %2453 = vadd.xlane.f32.xlu1 %v2452_v3  ;;  %v2921_v3 = vld [vmem:[#allocation10 + $0x50] sm:$0xff] }
 0x4dd   : > { %2456 = vadd.xlane.f32.xlu0 %v2455_v1  ;;  %v2919_v1 = vld [vmem:[#allocation10 + $0x40] sm:$0xff] }
 0x4ea   : > { %1977 = vrot.lane.b32.xlu1 %v1675_v57, %s7000_s9 }
 0x52d   : > { %v2448_v5 = vpop.xlane.xlu1 %2447 }
 0x52e   : > { %6482 = vrcp.f32 %v2448_v5  ;;  %v2918_v5 = vld [vmem:[#allocation10 + $0x38] sm:$0xff] }
 0x531   : > { %v1975_v6 = vpop.permute.xlu1 %1974  ;;  %v2451_v7 = vpop.xlane.xlu0 %2450 }
 0x532   : > { %v1980_v10 = vcombine.low %v1675_v57, %v1975_v6  ;;  %v1981_v11 = vcombine.high %v1675_v57, %v1975_v6  ;;  %6484 = vrcp.f32 %v2451_v7  ;;  %v2917_v6 = vld [vmem:[#allocation10 + $0x30] sm:$0xff]  ;;  %v2916_v7 = vld [vmem:[#allocation10 + $0x28] sm:$0xff] }
 0x534   : > { %v1988_v17 = vrot.slane %v1980_v10, %v7546_v13  ;;  %v1995_v18 = vrot.slane %v1981_v11, %v7546_v13 }
 0x535   : > { %v1972_v12 = vpop.permute.xlu0 %1971 }
 0x53b   : > { %v6483_v42 = vpop.eup %6482 }
 0x53c   : > { %v2462_v48 = vmul.f32 %v6483_v42, %v7607_v52  ;;  %v2913_v42 = vld [vmem:[#allocation10 + $0x10] sm:$0xff] }
 0x53f   : > { %v6485_v49 = vpop.eup %6484 }
 0x540   : > { %v2463_v55 = vmul.f32 %v6485_v49, %v7611_v54 }
 0x562   : > { %v2454_v8 = vpop.xlane.xlu1 %2453 }
 0x563   : > { %6486 = vrcp.f32 %v2454_v8 }
 0x566   : > { %v1978_v14 = vpop.permute.xlu1 %1977  ;;  %v2457_v39 = vpop.xlane.xlu0 %2456 }
 0x567   : > { %v1996_v15 = vcombine.low %v1972_v12, %v1978_v14  ;;  %v1997_v16 = vcombine.high %v1972_v12, %v1978_v14  ;;  %6488 = vrcp.f32 %v2457_v39 }
 0x569   : > { %v2004_v19 = vrot.slane %v1996_v15, %v7546_v13  ;;  %v2011_v21 = vrot.slane %v1997_v16, %v7546_v13 }
 0x56b   : > { %v2012_v22 = vcombine.low %v1988_v17, %v2004_v19  ;;  %v2013_v23 = vcombine.high %v1988_v17, %v2004_v19  ;;  %v2028_v24 = vcombine.low %v1995_v18, %v2011_v21  ;;  %v2029_v25 = vcombine.high %v1995_v18, %v2011_v21 }
 0x56d   : > { %v2020_v26 = vrot.slane %v2012_v22, %v7549_v20  ;;  %v2027_v27 = vrot.slane %v2013_v23, %v7549_v20  ;;  %v2036_v28 = vrot.slane %v2028_v24, %v7549_v20  ;;  %v2043_v29 = vrot.slane %v2029_v25, %v7549_v20 }
 0x56f   : > { %v2048_v30 = vcombine.low %v2020_v26, %v2027_v27  ;;  %v5545_v31 = vcombine.high %v2020_v26, %v2027_v27  ;;  %v2064_v32 = vcombine.low %v2036_v28, %v2043_v29  ;;  %v5546_v33 = vcombine.high %v2036_v28, %v2043_v29 }
 0x570   : > { %v6487_v52 = vpop.eup %6486 }
 0x571   : > { %v2055_v34 = vrot.slane %v2048_v30, %v7546_v13  ;;  %v2063_v35 = vrot.slane %v5545_v31, %v7546_v13  ;;  %v2071_v36 = vrot.slane %v2064_v32, %v7546_v13  ;;  %v2079_v37 = vrot.slane %v5546_v33, %v7546_v13  ;;  %v2915_v31 = vld [vmem:[#allocation10 + $0x20] sm:$0xff]  ;;  %v2914_v32 = vld [vmem:[#allocation10 + $0x18] sm:$0xff] }
 0x572   : > { %v2464_v57 = vmul.f32 %v6487_v52, %v7619_v2  ;;  %v2922_v2 = vld [vmem:[#allocation10 + $0x58] sm:$0xff] }
 0x573   : > { %v2080_v40 = vcombine.low %v2055_v34, %v2063_v35  ;;  %v2096_v41 = vcombine.low %v2071_v36, %v2079_v37  ;;  %v2081_v45 = vcombine.high %v2055_v34, %v2063_v35  ;;  %v2097_v46 = vcombine.high %v2071_v36, %v2079_v37  ;;  %6018 = vmatpush3.msra.mxu1 %v2922_v2 }
 0x574   : > { %v6489_v58 = vpop.eup %6488  ;;  %6019 = vmatprep.subr.mxu1 %v6998_v0 }
 0x575   : > { %v2088_v43 = vrot.slane %v2080_v40, %v7549_v20  ;;  %v2104_v44 = vrot.slane %v2096_v41, %v7549_v20  ;;  %v2095_v51 = vrot.slane %v2081_v45, %v7549_v20  ;;  %v2111_v53 = vrot.slane %v2097_v46, %v7549_v20  ;;  %6020 = vmatpush3.msra.mxu1 %v2921_v3 }
 0x576   : > { %v2465_v54 = vmul.f32 %v6489_v58, %v7623_v4  ;;  %v2920_v4 = vld [vmem:[#allocation10 + $0x48] sm:$0xff]  ;;  %6021 = vmatprep.subr.mxu1 %v6998_v0 }
 0x577   : > { %v2112_v47 = vcombine.low %v2088_v43, %v2104_v44  ;;  %v2113_v50 = vcombine.high %v2088_v43, %v2104_v44  ;;  %v2114_v56 = vcombine.low %v2095_v51, %v2111_v53  ;;  %v2115_v59 = vcombine.high %v2095_v51, %v2111_v53  ;;  %6022 = vmatpush3.msra.mxu1 %v2920_v4  ;;  %v2912_v43 = vld [vmem:[#allocation10 + $0x8] sm:$0xff]  ;;  %v2911_v53 = vld [vmem:[#allocation10] sm:$0xff] }
 0x578   : > { %6023 = vmatprep.subr.mxu1 %v6998_v0 }
 0x579   : > { %5990 = vmatpush3.msra.mxu0 %v2112_v47  ;;  %6024 = vmatpush3.msra.mxu1 %v2919_v1  ;;  %v3066_v1 = vld [vmem:[#allocation11 + $0xf8] sm:$0xff] }
 0x57a   : > { %5992 = vmatmul.mubr.msk.f32.vlgmr.msra.gmra.mxu0 %vm2421_vm3, %v2462_v48  ;;  %5994 = vmatprep.subr.mxu0 %v6998_v0 }
 0x57b   : > { %5995 = vmatpush3.msra.mxu0 %v2113_v50  ;;  %5996 = vmatprep.mubr.msk.f32.mxu0 %vm6999_vm0, %v6998_v0 }
 0x57c   : > { %5999 = vmatprep.subr.mxu0 %v6998_v0  ;;  %6025 = vmatprep.subr.mxu1 %v6998_v0 }
 0x57d   : > { %6026 = vmatpush3.msra.mxu1 %v2918_v5  ;;  %v3065_v5 = vld [vmem:[#allocation11 + $0xf0] sm:$0xff] }
 0x57e   : > { %5997 = vmatmul.mubr.msk.f32.vlgmr.msra.gmra.mxu0 %vm2421_vm3, %v2463_v55  ;;  %6027 = vmatprep.subr.mxu1 %v6998_v0 }
 0x57f   : > { %6000 = vmatpush3.msra.mxu0 %v2114_v56  ;;  %6001 = vmatprep.mubr.msk.f32.mxu0 %vm6999_vm0, %v6998_v0 }
 0x580   : > { %6004 = vmatprep.subr.mxu0 %v6998_v0  ;;  %6028 = vmatpush3.msra.mxu1 %v2917_v6  ;;  %v3064_v6 = vld [vmem:[#allocation11 + $0xe8] sm:$0xff] }
 0x581   : > { %6029 = vmatprep.subr.mxu1 %v6998_v0 }
 0x582   : > { %6002 = vmatmul.mubr.msk.f32.vlgmr.msra.gmra.mxu0 %vm2421_vm3, %v2464_v57  ;;  %6030 = vmatpush3.msra.mxu1 %v2916_v7  ;;  %v3063_v7 = vld [vmem:[#allocation11 + $0xe0] sm:$0xff] }
 0x583   : > { %6005 = vmatpush3.msra.mxu0 %v2115_v59  ;;  %6006 = vmatprep.mubr.msk.f32.mxu0 %vm6999_vm0, %v6998_v0 }
 0x584   : > { %6031 = vmatprep.subr.mxu1 %v6998_v0  ;;  %3079 = vmatprep.subr.mxu0 %v3066_v1  ;;  %v3172_v1 = vld [vmem:[#allocation13 + $0xa0] sm:$0xff] }
 0x585   : > { %6032 = vmatpush3.msra.mxu1 %v2915_v31  ;;  %v3047_v31 = vld [vmem:[#allocation11 + $0x60] sm:$0xff] }
 0x586   : > { %6007 = vmatmul.mubr.msk.f32.vlgmr.msra.gmra.mxu0 %vm2421_vm3, %v2465_v54  ;;  %6033 = vmatprep.subr.mxu1 %v6998_v0 }
 0x587   : > { %3143 = vmatprep.mubr.f32.mxu0 %v6998_v0  ;;  %6034 = vmatpush3.msra.mxu1 %v2914_v32  ;;  %v3046_v32 = vld [vmem:[#allocation11 + $0x58] sm:$0xff] }
 0x588   : > { %6035 = vmatprep.subr.mxu1 %v6998_v0  ;;  %3080 = vmatpush1.msra.mxu0 %v3065_v5  ;;  %v3156_v5 = vld [vmem:[#allocation13 + $0x20] sm:$0xff] }
 0x589   : > { %6036 = vmatpush3.msra.mxu1 %v2913_v42  ;;  %3081 = vmatprep.subr.mxu0 %v3064_v6  ;;  %v3037_v42 = vld [vmem:[#allocation11 + $0x10] sm:$0xff] }
 0x58a   : > { %6037 = vmatprep.subr.mxu1 %v6998_v0  ;;  %3082 = vmatpush1.msra.mxu0 %v3063_v7 }
 0x58b   : > { %6038 = vmatpush3.msra.mxu1 %v2912_v43  ;;  %v3036_v43 = vld [vmem:[#allocation11 + $0x8] sm:$0xff] }
 0x58c   : > { %6039 = vmatprep.subr.mxu1 %v6998_v0 }
 0x58d   : > { %6040 = vmatpush3.msra.mxu1 %v2911_v53  ;;  %v3164_v53 = vld [vmem:[#allocation13 + $0x60] sm:$0xff] }
 0x63a   : > { %v2535_v8 = vpop.f32.mrf.mxu0 }
 0x63c   : > { %v5993_v10 = vpop.f32.mrf.mxu0 }
 0x63e   : > { %v2608_v11 = vpop.f32.mrf.mxu0 }
 0x640   : > { %v5998_v12 = vpop.f32.mrf.mxu0 }
 0x642   : > { %v2681_v14 = vpop.f32.mrf.mxu0 }
 0x643   : > { %v2758_v16 = vcombine.low %v2535_v8, %v2681_v14  ;;  %v2759_v17 = vcombine.high %v2535_v8, %v2681_v14  ;;  %v5561_v8 = vld [vmem:[%s8111_s12] ss:$0 sm:$0xff]  ;;  %s8119_s12 = sld [smem:[#allocation46_spill]] }
 0x644   : > { %v6003_v15 = vpop.f32.mrf.mxu0 }
 0x645   : > { %v2766_v23 = vrot.slane %v2758_v16, %v7546_v13  ;;  %v2773_v24 = vrot.slane %v2759_v17, %v7546_v13  ;;  %v3062_v16 = vld [vmem:[#allocation11 + $0xd8] sm:$0xff]  ;;  %v3061_v17 = vld [vmem:[#allocation11 + $0xd0] sm:$0xff] }
 0x646   : > { %v2754_v18 = vpop.f32.mrf.mxu0  ;;  %3083 = vmatprep.subr.mxu0 %v3062_v16 }
 0x647   : > { %v2774_v19 = vcombine.low %v2608_v11, %v2754_v18  ;;  %v2775_v21 = vcombine.high %v2608_v11, %v2754_v18  ;;  %3084 = vmatpush1.msra.mxu0 %v3061_v17  ;;  %v3060_v18 = vld [vmem:[#allocation11 + $0xc8] sm:$0xff] }
 0x648   : > { %v6008_v22 = vpop.f32.mrf.mxu0  ;;  %3085 = vmatprep.subr.mxu0 %v3060_v18  ;;  %v5562_v18 = vld [vmem:[%s8112_s2] ss:$0 sm:$0xff]  ;;  %s8120_s2 = sld [smem:[#allocation49_spill]] }
 0x649   : > { %v2782_v25 = vrot.slane %v2774_v19, %v7546_v13  ;;  %v2789_v26 = vrot.slane %v2775_v21, %v7546_v13  ;;  %v3059_v19 = vld [vmem:[#allocation11 + $0xc0] sm:$0xff]  ;;  %v3058_v21 = vld [vmem:[#allocation11 + $0xb8] sm:$0xff]  ;;  %v3057_v22 = vld [vmem:[#allocation11 + $0xb0] sm:$0xff] }
 0x64a   : > { %3086 = vmatpush1.msra.mxu0 %v3059_v19 }
 0x64b   : > { %v2790_v27 = vcombine.low %v2766_v23, %v2782_v25  ;;  %v2791_v28 = vcombine.high %v2766_v23, %v2782_v25  ;;  %v2806_v29 = vcombine.low %v2773_v24, %v2789_v26  ;;  %v2807_v30 = vcombine.high %v2773_v24, %v2789_v26  ;;  %3087 = vmatprep.subr.mxu0 %v3058_v21  ;;  %v3055_v23 = vld [vmem:[#allocation11 + $0xa0] sm:$0xff]  ;;  %v3054_v24 = vld [vmem:[#allocation11 + $0x98] sm:$0xff]  ;;  %v3053_v25 = vld [vmem:[#allocation11 + $0x90] sm:$0xff] }
 0x64c   : > { %3088 = vmatpush1.msra.mxu0 %v3057_v22  ;;  %v3052_v26 = vld [vmem:[#allocation11 + $0x88] sm:$0xff]  ;;  %v5563_v21 = vld [vmem:[%s8113_s23] ss:$0 sm:$0xff]  ;;  %s8121_s23 = sld [smem:[#allocation50_spill]] }
 0x64d   : > { %v2798_v33 = vrot.slane %v2790_v27, %v7549_v20  ;;  %v2805_v34 = vrot.slane %v2791_v28, %v7549_v20  ;;  %v2814_v35 = vrot.slane %v2806_v29, %v7549_v20  ;;  %v2821_v36 = vrot.slane %v2807_v30, %v7549_v20  ;;  %v3051_v27 = vld [vmem:[#allocation11 + $0x80] sm:$0xff]  ;;  %v3050_v28 = vld [vmem:[#allocation11 + $0x78] sm:$0xff]  ;;  %v3049_v29 = vld [vmem:[#allocation11 + $0x70] sm:$0xff] }
 0x64e   : > { %v3048_v30 = vld [vmem:[#allocation11 + $0x68] sm:$0xff] }
 0x64f   : > { %v2826_v37 = vcombine.low %v2798_v33, %v2805_v34  ;;  %v5559_v39 = vcombine.high %v2798_v33, %v2805_v34  ;;  %v2842_v40 = vcombine.low %v2814_v35, %v2821_v36  ;;  %v5560_v41 = vcombine.high %v2814_v35, %v2821_v36  ;;  %v3045_v33 = vld [vmem:[#allocation11 + $0x50] sm:$0xff]  ;;  %v3044_v34 = vld [vmem:[#allocation11 + $0x48] sm:$0xff]  ;;  %v3043_v35 = vld [vmem:[#allocation11 + $0x40] sm:$0xff] }
 0x650   : > { %v3042_v36 = vld [vmem:[#allocation11 + $0x38] sm:$0xff] }
 0x651   : > { %v2833_v44 = vrot.slane %v2826_v37, %v7546_v13  ;;  %v2841_v45 = vrot.slane %v5559_v39, %v7546_v13  ;;  %v2849_v46 = vrot.slane %v2842_v40, %v7546_v13  ;;  %v2857_v47 = vrot.slane %v5560_v41, %v7546_v13  ;;  %v3041_v37 = vld [vmem:[#allocation11 + $0x30] sm:$0xff]  ;;  %v3040_v39 = vld [vmem:[#allocation11 + $0x28] sm:$0xff]  ;;  %v3039_v40 = vld [vmem:[#allocation11 + $0x20] sm:$0xff] }
 0x652   : > { %v3038_v41 = vld [vmem:[#allocation11 + $0x18] sm:$0xff] }
 0x653   : > { %v2858_v48 = vcombine.low %v2833_v44, %v2841_v45  ;;  %v2874_v49 = vcombine.low %v2849_v46, %v2857_v47  ;;  %v2859_v50 = vcombine.high %v2833_v44, %v2841_v45  ;;  %v2875_v51 = vcombine.high %v2849_v46, %v2857_v47  ;;  %v3035_v44 = vld [vmem:[#allocation11] sm:$0xff]  ;;  %v3183_v45 = vld [vmem:[#allocation13 + $0xf8] sm:$0xff]  ;;  %v3182_v47 = vld [vmem:[#allocation13 + $0xf0] sm:$0xff] }
 0x654   : > { %v3167_v46 = vld [vmem:[#allocation13 + $0x78] sm:$0xff]  ;;  %5686 = vmatprep.subr.mxu1 %v3183_v45  ;;  %v5564_v45 = vld [vmem:[%s8115_s6] ss:$0 sm:$0xff]  ;;  %s8126_s6 = sld [smem:[#allocation56_spill]] }
 0x655   : > { %v2866_v55 = vrot.slane %v2858_v48, %v7549_v20  ;;  %v2882_v52 = vrot.slane %v2874_v49, %v7549_v20  ;;  %v2873_v57 = vrot.slane %v2859_v50, %v7549_v20  ;;  %v2889_v58 = vrot.slane %v2875_v51, %v7549_v20  ;;  %v3166_v48 = vld [vmem:[#allocation13 + $0x70] sm:$0xff]  ;;  %v3181_v49 = vld [vmem:[#allocation13 + $0xe8] sm:$0xff]  ;;  %v3180_v51 = vld [vmem:[#allocation13 + $0xe0] sm:$0xff] }
 0x656   : > { %v3165_v50 = vld [vmem:[#allocation13 + $0x68] sm:$0xff] }
 0x657   : > { %v2891_v56 = vcombine.high %v2866_v55, %v2882_v52  ;;  %v2890_v59 = vcombine.low %v2866_v55, %v2882_v52  ;;  %v2892_v54 = vcombine.low %v2873_v57, %v2889_v58  ;;  %v2893_v60 = vcombine.high %v2873_v57, %v2889_v58  ;;  %v3179_v55 = vld [vmem:[#allocation13 + $0xd8] sm:$0xff]  ;;  %v3162_v57 = vld [vmem:[#allocation13 + $0x50] sm:$0xff]  ;;  %v3177_v58 = vld [vmem:[#allocation13 + $0xc8] sm:$0xff] }
 0x658   : > { %v3163_v52 = vld [vmem:[#allocation13 + $0x58] sm:$0xff] }
 0x659   : > { %2895 = vrot.lane.b32.xlu1 %v2891_v56, %s7000_s9  ;;  %v3178_v56 = vld [vmem:[#allocation13 + $0xd0] sm:$0xff] }
 0x65d   : > { %2899 = vrot.lane.b32.xlu1 %v2892_v54, %s7002_s27  ;;  %v3176_v54 = vld [vmem:[#allocation13 + $0xc0] sm:$0xff] }
 0x661   : > { %2903 = vrot.lane.b32.xlu1 %v2893_v60, %s7001_s3  ;;  %v3160_v60 = vld [vmem:[#allocation13 + $0x40] sm:$0xff] }
 0x6cb   : > { %v2896_v61 = vpop.permute.xlu1 %2895 }
 0x6cc   : > { %v2906_v63 = vsel %vm2116_vm2, %v2890_v59, %v2896_v61  ;;  %v3161_v59 = vld [vmem:[#allocation13 + $0x48] sm:$0xff]  ;;  %v3175_v61 = vld [vmem:[#allocation13 + $0xb8] sm:$0xff] }
 0x6cf   : > { %v2900_v62 = vpop.permute.xlu1 %2899 }
 0x6d0   : > { %v2908_v2 = vsel %vm2907_vm4, %v2906_v63, %v2900_v62  ;;  %v3159_v62 = vld [vmem:[#allocation13 + $0x38] sm:$0xff]  ;;  %v3174_v63 = vld [vmem:[#allocation13 + $0xb0] sm:$0xff] }
 0x6d3   : > { %v2904_v3 = vpop.permute.xlu1 %2903 }
 0x6d4   : > { %v2910_v4 = vsel %vm2909_vm5, %v2908_v2, %v2904_v3  ;;  %v3158_v2 = vld [vmem:[#allocation13 + $0x30] sm:$0xff]  ;;  %v3173_v3 = vld [vmem:[#allocation13 + $0xa8] sm:$0xff] }
 0x6d5   : > { %6042 = vmatmul.mubr.f32.vlgmr.msra.gmra.mxu1 %v2910_v4  ;;  %v3157_v4 = vld [vmem:[#allocation13 + $0x28] sm:$0xff] }
 0x6d6   : > { %5687 = vmatpush3.msra.mxu1 %v3167_v46 }
 0x6d7   : > { %5688 = vmatprep.subr.mxu1 %v3182_v47 }
 0x6d8   : > { %5689 = vmatpush3.msra.mxu1 %v3166_v48 }
 0x6d9   : > { %5690 = vmatprep.subr.mxu1 %v3181_v49 }
 0x6da   : > { %5691 = vmatpush3.msra.mxu1 %v3165_v50 }
 0x6db   : > { %5692 = vmatprep.subr.mxu1 %v3180_v51  ;;  %v3305_v51 = vld [vmem:[#allocation14 + $0x70] sm:$0xff] }
 0x6dc   : > { %5693 = vmatpush3.msra.mxu1 %v3164_v53  ;;  %v3398_v53 = vld [vmem:[#allocation16 + $0x70] sm:$0xff] }
 0x6dd   : > { %5694 = vmatprep.subr.mxu1 %v3179_v55  ;;  %v3304_v55 = vld [vmem:[#allocation14 + $0x68] sm:$0xff] }
 0x6de   : > { %5695 = vmatpush3.msra.mxu1 %v3163_v52  ;;  %v3397_v52 = vld [vmem:[#allocation16 + $0x68] sm:$0xff] }
 0x6df   : > { %5696 = vmatprep.subr.mxu1 %v3178_v56  ;;  %v3303_v56 = vld [vmem:[#allocation14 + $0x60] sm:$0xff] }
 0x6e0   : > { %5697 = vmatpush3.msra.mxu1 %v3162_v57  ;;  %v3396_v57 = vld [vmem:[#allocation16 + $0x60] sm:$0xff] }
 0x6e1   : > { %5698 = vmatprep.subr.mxu1 %v3177_v58  ;;  %v3302_v58 = vld [vmem:[#allocation14 + $0x58] sm:$0xff] }
 0x6e2   : > { %5699 = vmatpush3.msra.mxu1 %v3161_v59  ;;  %v3395_v59 = vld [vmem:[#allocation16 + $0x58] sm:$0xff] }
 0x6e3   : > { %5700 = vmatprep.subr.mxu1 %v3176_v54  ;;  %v3301_v54 = vld [vmem:[#allocation14 + $0x50] sm:$0xff] }
 0x6e4   : > { %5701 = vmatpush3.msra.mxu1 %v3160_v60  ;;  %v3394_v60 = vld [vmem:[#allocation16 + $0x50] sm:$0xff] }
 0x6e5   : > { %5702 = vmatprep.subr.mxu1 %v3175_v61  ;;  %v3300_v61 = vld [vmem:[#allocation14 + $0x48] sm:$0xff] }
 0x6e6   : > { %5703 = vmatpush3.msra.mxu1 %v3159_v62  ;;  %v3393_v62 = vld [vmem:[#allocation16 + $0x48] sm:$0xff] }
 0x6e7   : > { %5704 = vmatprep.subr.mxu1 %v3174_v63  ;;  %v3299_v63 = vld [vmem:[#allocation14 + $0x40] sm:$0xff] }
 0x6e8   : > { %5705 = vmatpush3.msra.mxu1 %v3158_v2  ;;  %v3392_v2 = vld [vmem:[#allocation16 + $0x40] sm:$0xff] }
 0x6e9   : > { %5706 = vmatprep.subr.mxu1 %v3173_v3  ;;  %v3298_v3 = vld [vmem:[#allocation14 + $0x38] sm:$0xff] }
 0x6ea   : > { %5707 = vmatpush3.msra.mxu1 %v3157_v4  ;;  %v3391_v4 = vld [vmem:[#allocation16 + $0x38] sm:$0xff] }
 0x6eb   : > { %5708 = vmatprep.subr.mxu1 %v3172_v1  ;;  %v3297_v1 = vld [vmem:[#allocation14 + $0x30] sm:$0xff] }
 0x6ec   : > { %5709 = vmatpush3.msra.mxu1 %v3156_v5  ;;  %v3390_v5 = vld [vmem:[#allocation16 + $0x30] sm:$0xff] }
 0x795   : > { %v3000_v10 = vpop.f32.mrf.mxu1 }
 0x796   : > { %v3001_v11 = vadd.f32 %v5561_v8, %v3000_v10 }
 0x797   : > { %v6043_v12 = vpop.f32.mrf.mxu1 }
 0x798   : > { %v7701_v14 = vadd.f32 %v3001_v11, %v7506_v38  ;;  %v3056_v38 = vld [vmem:[#allocation11 + $0xa8] sm:$0xff] }
 0x799   : > { %3089 = vmatprep.subr.mxu0 %v3056_v38 }
 0x79a   : > { %3007 = vadd.xlane.f32.xlu1 %v7701_v14  ;;  %v3011_v15 = vmul.f32 %v7701_v14, %v7701_v14  ;;  %3090 = vmatpush1.msra.mxu0 %v3055_v23  ;;  %v3171_v23 = vld [vmem:[#allocation13 + $0x98] sm:$0xff] }
 0x79b   : > { %3091 = vmatprep.subr.mxu0 %v3054_v24  ;;  %5710 = vmatprep.subr.mxu1 %v3171_v23  ;;  %v3155_v24 = vld [vmem:[#allocation13 + $0x18] sm:$0xff] }
 0x79c   : > { %3012 = vadd.xlane.f32.xlu0 %v3011_v15  ;;  %3092 = vmatpush1.msra.mxu0 %v3053_v25  ;;  %v3170_v25 = vld [vmem:[#allocation13 + $0x90] sm:$0xff] }
 0x79d   : > { %3093 = vmatprep.subr.mxu0 %v3052_v26  ;;  %5711 = vmatpush3.msra.mxu1 %v3155_v24  ;;  %v3154_v26 = vld [vmem:[#allocation13 + $0x10] sm:$0xff] }
 0x79e   : > { %3094 = vmatpush1.msra.mxu0 %v3051_v27  ;;  %5712 = vmatprep.subr.mxu1 %v3170_v25  ;;  %v3153_v27 = vld [vmem:[#allocation13 + $0x8] sm:$0xff] }
 0x79f   : > { %3095 = vmatprep.subr.mxu0 %v3050_v28  ;;  %5713 = vmatpush3.msra.mxu1 %v3154_v26  ;;  %v3168_v28 = vld [vmem:[#allocation13 + $0x80] sm:$0xff] }
 0x7a0   : > { %3096 = vmatpush1.msra.mxu0 %v3049_v29  ;;  %v3152_v29 = vld [vmem:[#allocation13] sm:$0xff] }
 0x7a1   : > { %3097 = vmatprep.subr.mxu0 %v3048_v30  ;;  %v3071_v30 = vsub.s32 0, %v7543_v9 }
 0x7a2   : > { %3098 = vmatpush1.msra.mxu0 %v3047_v31  ;;  %v3067_v31 = vld [vmem:[%s8114_s28] sm:$0x3]  ;;  %s8125_s28 = sld [smem:[#allocation53_spill]] }
 0x7a3   : > { %3099 = vmatprep.subr.mxu0 %v3046_v32  ;;  %v3075_v32 = vsub.s32 1, %v7543_v9 }
 0x7a4   : > { %3100 = vmatpush1.msra.mxu0 %v3045_v33  ;;  %v3072_v33 = vrot.slane %v3067_v31, %v3071_v30 }
 0x7a5   : > { %3101 = vmatprep.subr.mxu0 %v3044_v34  ;;  %v3076_v34 = vrot.slane %v3067_v31, %v3075_v32 }
 0x7a6   : > { %3102 = vmatpush1.msra.mxu0 %v3043_v35 }
 0x7a7   : > { %3103 = vmatprep.subr.mxu0 %v3042_v36 }
 0x7a8   : > { %3104 = vmatpush1.msra.mxu0 %v3041_v37 }
 0x7a9   : > { %3105 = vmatprep.subr.mxu0 %v3040_v39 }
 0x7aa   : > { %3106 = vmatpush1.msra.mxu0 %v3039_v40 }
 0x7ab   : > { %3107 = vmatprep.subr.mxu0 %v3038_v41 }
 0x7ac   : > { %3108 = vmatpush1.msra.mxu0 %v3037_v42  ;;  %v3306_v42 = vld [vmem:[#allocation14 + $0x78] sm:$0xff] }
 0x7ad   : > { %3109 = vmatprep.subr.mxu0 %v3036_v43  ;;  %v3399_v43 = vld [vmem:[#allocation16 + $0x78] sm:$0xff] }
 0x7ae   : > { %3110 = vmatpush1.msra.mxu0 %v3035_v44 }
 0x7af   : > { %6044 = vmatprep.subr.mxu0 %v6998_v0 }
 0x823   : > { %v3008_v6 = vpop.xlane.xlu1 %3007 }
 0x824   : > { %v3010_v7 = vmul.f32 0.0078125, %v3008_v6  ;;  %v3296_v6 = vld [vmem:[#allocation14 + $0x28] sm:$0xff] }
 0x825   : > { %v3013_v8 = vpop.xlane.xlu0 %3012 }
 0x826   : > { %v3015_v10 = vmul.f32 %v3010_v7, %v3010_v7  ;;  %v3014_v11 = vmul.f32 0.0078125, %v3013_v8  ;;  %v3017_v16 = vsub.f32 %v7701_v14, %v3010_v7  ;;  %v3169_v14 = vld [vmem:[#allocation13 + $0x88] sm:$0xff]  ;;  %v3295_v8 = vld [vmem:[#allocation14 + $0x20] sm:$0xff] }
 0x827   : > { %5714 = vmatprep.subr.mxu1 %v3169_v14  ;;  %v3389_v7 = vld [vmem:[#allocation16 + $0x28] sm:$0xff] }
 0x828   : > { %v3016_v12 = vsub.f32 %v3014_v11, %v3015_v10  ;;  %5715 = vmatpush3.msra.mxu1 %v3153_v27  ;;  %v3388_v10 = vld [vmem:[#allocation16 + $0x20] sm:$0xff]  ;;  %v3294_v11 = vld [vmem:[#allocation14 + $0x18] sm:$0xff] }
 0x829   : > { %5716 = vmatprep.subr.mxu1 %v3168_v28 }
 0x82a   : > { %v3018_v15 = vadd.f32 1e-05, %v3016_v12  ;;  %5717 = vmatpush3.msra.mxu1 %v3152_v29  ;;  %v3387_v12 = vld [vmem:[#allocation16 + $0x18] sm:$0xff]  ;;  %v5565_v29 = vld [vmem:[%s8116_s4] ss:$0 sm:$0xff]  ;;  %s8127_s4 = sld [smem:[#allocation57_spill]] }
 0x82b   : > { %6079 = vmatprep.subr.mxu1 %v6998_v0 }
 0x82c   : > { %6490 = vrsqrt.f32 %v3018_v15  ;;  %v3293_v15 = vld [vmem:[#allocation14 + $0x10] sm:$0xff] }
 0x839   : > { %v6491_v17 = vpop.eup %6490 }
 0x83a   : > { %v3020_v19 = vmul.f32 %v6491_v17, %v3017_v16  ;;  %v3386_v16 = vld [vmem:[#allocation16 + $0x10] sm:$0xff]  ;;  %v3292_v17 = vld [vmem:[#allocation14 + $0x8] sm:$0xff] }
 0x83c   : > { %v3027_v22 = vmul.f32 %v5562_v18, %v3020_v19  ;;  %v3385_v18 = vld [vmem:[#allocation16 + $0x8] sm:$0xff]  ;;  %v3291_v19 = vld [vmem:[#allocation14] sm:$0xff] }
 0x83e   : > { %v3034_v38 = vadd.f32 %v5563_v21, %v3027_v22  ;;  %v3384_v21 = vld [vmem:[#allocation16] sm:$0xff] }
 0x840   : > { %3144 = vmatmul.mubr.f32.vlgmr.msra.gmra.mxu0 %v3034_v38 }
 0x841   : > { %6076 = vmatprep.mubr.msk.f32.mxu0 %vm6999_vm0, %v6998_v0  ;;  %6045 = vmatpush3.msra.mxu0 %v3306_v42  ;;  %v3487_v42 = vld [vmem:[#allocation17 + $0x50] sm:$0xff] }
 0x842   : > { %6046 = vmatprep.subr.mxu0 %v6998_v0 }
 0x843   : > { %6047 = vmatpush3.msra.mxu0 %v3305_v51  ;;  %v3478_v51 = vld [vmem:[#allocation17 + $0x8] sm:$0xff] }
 0x844   : > { %6048 = vmatprep.subr.mxu0 %v6998_v0 }
 0x845   : > { %6049 = vmatpush3.msra.mxu0 %v3304_v55  ;;  %v5568_v55 = vld [vmem:[%s8118_s13] ss:$0 sm:$0xff]  ;;  %s8129_s13 = sld [smem:[#allocation59_spill]] }
 0x846   : > { %6050 = vmatprep.subr.mxu0 %v6998_v0 }
 0x847   : > { %6051 = vmatpush3.msra.mxu0 %v3303_v56 }
 0x848   : > { %6052 = vmatprep.subr.mxu0 %v6998_v0 }
 0x849   : > { %6053 = vmatpush3.msra.mxu0 %v3302_v58  ;;  %v5567_v58 = vld [vmem:[%s8119_s12] ss:$0 sm:$0xff]  ;;  %s5596_s12 = sshll.u32 %s7222_s18, 4 }
 0x84a   : > { %6054 = vmatprep.subr.mxu0 %v6998_v0 }
 0x84b   : > { %6055 = vmatpush3.msra.mxu0 %v3301_v54 }
 0x84c   : > { %6056 = vmatprep.subr.mxu0 %v6998_v0 }
 0x84d   : > { %6057 = vmatpush3.msra.mxu0 %v3300_v61 }
 0x84e   : > { %6058 = vmatprep.subr.mxu0 %v6998_v0 }
 0x84f   : > { %6059 = vmatpush3.msra.mxu0 %v3299_v63 }
 0x850   : > { %6060 = vmatprep.subr.mxu0 %v6998_v0 }
 0x851   : > { %6061 = vmatpush3.msra.mxu0 %v3298_v3 }
 0x852   : > { %6062 = vmatprep.subr.mxu0 %v6998_v0 }
 0x853   : > { %6063 = vmatpush3.msra.mxu0 %v3297_v1 }
 0x854   : > { %6064 = vmatprep.subr.mxu0 %v6998_v0 }
 0x855   : > { %6065 = vmatpush3.msra.mxu0 %v3296_v6 }
 0x856   : > { %6066 = vmatprep.subr.mxu0 %v6998_v0 }
 0x857   : > { %6067 = vmatpush3.msra.mxu0 %v3295_v8 }
 0x858   : > { %6068 = vmatprep.subr.mxu0 %v6998_v0 }
 0x859   : > { %6069 = vmatpush3.msra.mxu0 %v3294_v11 }
 0x85a   : > { %6070 = vmatprep.subr.mxu0 %v6998_v0 }
 0x85b   : > { %6071 = vmatpush3.msra.mxu0 %v3293_v15 }
 0x85c   : > { %6072 = vmatprep.subr.mxu0 %v6998_v0 }
 0x85d   : > { %6073 = vmatpush3.msra.mxu0 %v3292_v17 }
 0x85e   : > { %6074 = vmatprep.subr.mxu0 %v6998_v0 }
 0x85f   : > { %6075 = vmatpush3.msra.mxu0 %v3291_v19 }
 0x860   : > { %6114 = vmatprep.subr.mxu0 %v6998_v0 }
 0x900   : > { %v3145_v35 = vpop.f32.mrf.mxu0 }
 0x901   : > { %v3146_v36 = vadd.f32 %v3145_v35, %v3072_v33  ;;  %v5566_v33 = vld [vmem:[%s8117_s22] ss:$0 sm:$0xff]  ;;  %s8128_s22 = sld [smem:[#allocation58_spill]] }
 0x902   : > { %v3147_v37 = vpop.f32.mrf.mxu0 }
 0x903   : > { %v3148_v39 = vadd.f32 %v3147_v37, %v3076_v34  ;;  %v3150_v41 = vmax.f32 %v3146_v36, 0.0  ;;  %v3492_v36 = vld [vmem:[#allocation17 + $0x78] sm:$0xff]  ;;  %v3491_v37 = vld [vmem:[#allocation17 + $0x70] sm:$0xff] }
 0x905   : > { %v3151_v40 = vmax.f32 %v3148_v39, 0.0  ;;  %v3490_v39 = vld [vmem:[#allocation17 + $0x68] sm:$0xff] }
 0x907   : > { %3255 = vmatprep.mubr.f32.mxu1 %v3151_v40  ;;  %v3489_v40 = vld [vmem:[#allocation17 + $0x60] sm:$0xff] }
 0x908   : > { %3256 = vmatmul.mubr.f32.vlgmr.msra.gmra.mxu1 %v3150_v41  ;;  %v3488_v41 = vld [vmem:[#allocation17 + $0x58] sm:$0xff] }
 0x909   : > { %6111 = vmatprep.mubr.msk.f32.mxu1 %vm6999_vm0, %v6998_v0  ;;  %6080 = vmatpush3.msra.mxu1 %v3399_v43  ;;  %v3486_v43 = vld [vmem:[#allocation17 + $0x48] sm:$0xff] }
 0x90a   : > { %6081 = vmatprep.subr.mxu1 %v6998_v0 }
 0x90b   : > { %6082 = vmatpush3.msra.mxu1 %v3398_v53  ;;  %v3477_v53 = vld [vmem:[#allocation17] sm:$0xff] }
 0x90c   : > { %6083 = vmatprep.subr.mxu1 %v6998_v0 }
 0x90d   : > { %6084 = vmatpush3.msra.mxu1 %v3397_v52 }
 0x90e   : > { %6085 = vmatprep.subr.mxu1 %v6998_v0 }
 0x90f   : > { %6086 = vmatpush3.msra.mxu1 %v3396_v57 }
 0x910   : > { %6087 = vmatprep.subr.mxu1 %v6998_v0 }
 0x911   : > { %6088 = vmatpush3.msra.mxu1 %v3395_v59 }
 0x912   : > { %6089 = vmatprep.subr.mxu1 %v6998_v0 }
 0x913   : > { %6090 = vmatpush3.msra.mxu1 %v3394_v60 }
 0x914   : > { %6091 = vmatprep.subr.mxu1 %v6998_v0 }
 0x915   : > { %6092 = vmatpush3.msra.mxu1 %v3393_v62 }
 0x916   : > { %6093 = vmatprep.subr.mxu1 %v6998_v0 }
 0x917   : > { %6094 = vmatpush3.msra.mxu1 %v3392_v2 }
 0x918   : > { %6095 = vmatprep.subr.mxu1 %v6998_v0 }
 0x919   : > { %6096 = vmatpush3.msra.mxu1 %v3391_v4 }
 0x91a   : > { %6097 = vmatprep.subr.mxu1 %v6998_v0 }
 0x91b   : > { %6098 = vmatpush3.msra.mxu1 %v3390_v5 }
 0x91c   : > { %6099 = vmatprep.subr.mxu1 %v6998_v0 }
 0x91d   : > { %6100 = vmatpush3.msra.mxu1 %v3389_v7 }
 0x91e   : > { %6101 = vmatprep.subr.mxu1 %v6998_v0 }
 0x91f   : > { %6102 = vmatpush3.msra.mxu1 %v3388_v10 }
 0x920   : > { %6103 = vmatprep.subr.mxu1 %v6998_v0 }
 0x921   : > { %6104 = vmatpush3.msra.mxu1 %v3387_v12 }
 0x922   : > { %6105 = vmatprep.subr.mxu1 %v6998_v0 }
 0x923   : > { %6106 = vmatpush3.msra.mxu1 %v3386_v16 }
 0x924   : > { %6107 = vmatprep.subr.mxu1 %v6998_v0 }
 0x925   : > { %6108 = vmatpush3.msra.mxu1 %v3385_v18 }
 0x926   : > { %6109 = vmatprep.subr.mxu1 %v6998_v0 }
 0x927   : > { %6110 = vmatpush3.msra.mxu1 %v3384_v21 }
 0x928   : > { %6149 = vmatprep.subr.mxu1 %v6998_v0 }
 0x9c8   : > { %v5718_v44 = vpop.f32.mrf.mxu1 }
 0x9ca   : > { %v5719_v46 = vpop.f32.mrf.mxu1 }
 0x9cb   : > { %v5720_v47 = vadd.f32 %v5719_v46, %v5718_v44  ;;  %v3485_v44 = vld [vmem:[#allocation17 + $0x40] sm:$0xff]  ;;  %v3483_v46 = vld [vmem:[#allocation17 + $0x30] sm:$0xff] }
 0x9cd   : > { %v3258_v48 = vadd.f32 %v5720_v47, %v5564_v45  ;;  %v3484_v45 = vld [vmem:[#allocation17 + $0x38] sm:$0xff]  ;;  %v3482_v47 = vld [vmem:[#allocation17 + $0x28] sm:$0xff] }
 0x9cf   : > { %v7725_v49 = vadd.f32 %v3258_v48, %v3034_v38  ;;  %v3481_v48 = vld [vmem:[#allocation17 + $0x20] sm:$0xff] }
 0x9d1   : > { %3264 = vadd.xlane.f32.xlu0 %v7725_v49  ;;  %v3267_v50 = vmul.f32 %v7725_v49, %v7725_v49 }
 0x9d5   : > { %3268 = vadd.xlane.f32.xlu0 %v3267_v50  ;;  %v3479_v50 = vld [vmem:[#allocation17 + $0x10] sm:$0xff] }
 0xa5a   : > { %v3265_v22 = vpop.xlane.xlu0 %3264 }
 0xa5b   : > { %v3266_v38 = vmul.f32 0.0078125, %v3265_v22 }
 0xa5d   : > { %v3271_v24 = vmul.f32 %v3266_v38, %v3266_v38  ;;  %v3273_v27 = vsub.f32 %v7725_v49, %v3266_v38  ;;  %v3480_v49 = vld [vmem:[#allocation17 + $0x18] sm:$0xff] }
 0xa5e   : > { %v3269_v23 = vpop.xlane.xlu0 %3268 }
 0xa5f   : > { %v3270_v25 = vmul.f32 0.0078125, %v3269_v23 }
 0xa61   : > { %v3272_v26 = vsub.f32 %v3270_v25, %v3271_v24 }
 0xa63   : > { %v3274_v14 = vadd.f32 1e-05, %v3272_v26 }
 0xa65   : > { %6492 = vrsqrt.f32 %v3274_v14 }
 0xa72   : > { %v6493_v28 = vpop.eup %6492 }
 0xa73   : > { %v3276_v31 = vmul.f32 %v6493_v28, %v3273_v27 }
 0xa75   : > { %v3283_v34 = vmul.f32 %v5565_v29, %v3276_v31 }
 0xa77   : > { %v7763_v35 = vadd.f32 %v5566_v33, %v3283_v34 }
 0xa79   : > { %6077 = vmatmul.mubr.f32.vlgmr.msra.gmra.mxu0 %v7763_v35  ;;  %6112 = vmatmul.mubr.f32.vlgmr.msra.gmra.mxu1 %v7763_v35 }
 0xa7a   : > { %6115 = vmatpush3.msra.mxu0 %v3492_v36  ;;  %6146 = vmatprep.mubr.msk.f32.mxu0 %vm6999_vm0, %v6998_v0 }
 0xa7b   : > { %6116 = vmatprep.subr.mxu0 %v6998_v0  ;;  %6151 = vmatprep.mubr.msk.f32.mxu1 %vm6999_vm0, %v6998_v0 }
 0xa7c   : > { %6117 = vmatpush3.msra.mxu0 %v3491_v37 }
 0xa7d   : > { %6118 = vmatprep.subr.mxu0 %v6998_v0 }
 0xa7e   : > { %6119 = vmatpush3.msra.mxu0 %v3490_v39 }
 0xa7f   : > { %6120 = vmatprep.subr.mxu0 %v6998_v0 }
 0xa80   : > { %6121 = vmatpush3.msra.mxu0 %v3489_v40 }
 0xa81   : > { %6122 = vmatprep.subr.mxu0 %v6998_v0 }
 0xa82   : > { %6123 = vmatpush3.msra.mxu0 %v3488_v41 }
 0xa83   : > { %6124 = vmatprep.subr.mxu0 %v6998_v0 }
 0xa84   : > { %6125 = vmatpush3.msra.mxu0 %v3487_v42 }
 0xa85   : > { %6126 = vmatprep.subr.mxu0 %v6998_v0 }
 0xa86   : > { %6127 = vmatpush3.msra.mxu0 %v3486_v43 }
 0xa87   : > { %6128 = vmatprep.subr.mxu0 %v6998_v0 }
 0xa88   : > { %6129 = vmatpush3.msra.mxu0 %v3485_v44 }
 0xa89   : > { %6130 = vmatprep.subr.mxu0 %v6998_v0 }
 0xa8a   : > { %6131 = vmatpush3.msra.mxu0 %v3484_v45 }
 0xa8b   : > { %6132 = vmatprep.subr.mxu0 %v6998_v0 }
 0xa8c   : > { %6133 = vmatpush3.msra.mxu0 %v3483_v46 }
 0xa8d   : > { %6134 = vmatprep.subr.mxu0 %v6998_v0 }
 0xa8e   : > { %6135 = vmatpush3.msra.mxu0 %v3482_v47 }
 0xa8f   : > { %6136 = vmatprep.subr.mxu0 %v6998_v0 }
 0xa90   : > { %6137 = vmatpush3.msra.mxu0 %v3481_v48 }
 0xa91   : > { %6138 = vmatprep.subr.mxu0 %v6998_v0 }
 0xa92   : > { %6139 = vmatpush3.msra.mxu0 %v3480_v49 }
 0xa93   : > { %6140 = vmatprep.subr.mxu0 %v6998_v0 }
 0xa94   : > { %6141 = vmatpush3.msra.mxu0 %v3479_v50 }
 0xa95   : > { %6142 = vmatprep.subr.mxu0 %v6998_v0 }
 0xa96   : > { %6143 = vmatpush3.msra.mxu0 %v3478_v51 }
 0xa97   : > { %6144 = vmatprep.subr.mxu0 %v6998_v0 }
 0xa98   : > { %6145 = vmatpush3.msra.mxu0 %v3477_v53 }
 0xa99   : > { %6147 = vmatmul.mubr.f32.vlgmr.msra.gmra.mxu0 %v7763_v35  ;;  %6154 = vmatprep.subr.mxu0 %v6998_v0 }
 0xa9a   : > { %6156 = vmatprep.mubr.msk.f32.mxu0 %vm6999_vm0, %v6998_v0 }
 0xb39   : > { %v3380_v52 = vpop.f32.mrf.mxu0  ;;  %v3473_v56 = vpop.f32.mrf.mxu1 }
 0xb3a   : > { %v3474_v57 = vadd.f32 %v5568_v55, %v3473_v56  ;;  %v3381_v60 = vadd.f32 %v5567_v58, %v3380_v52 }
 0xb3b   : > { %v6078_v59 = vpop.f32.mrf.mxu0  ;;  %v6113_v54 = vpop.f32.mrf.mxu1 }
 0xb3c   : > { %3720 = vrot.lane.b32.xlu1 %v3474_v57, %s7002_s27  ;;  %3717 = vrot.lane.b32.xlu0 %v3474_v57, %s7001_s3 }
 0xb40   : > { %3723 = vrot.lane.b32.xlu0 %v3474_v57, %s7000_s9  ;;  %3571 = vrot.lane.b32.xlu1 %v3381_v60, %s7001_s3 }
 0xb44   : > { %3574 = vrot.lane.b32.xlu0 %v3381_v60, %s7002_s27  ;;  %3577 = vrot.lane.b32.xlu1 %v3381_v60, %s7000_s9 }
 0xb59   : > { %v7798_v61 = vpop.f32.mrf.mxu0 }
 0xb5b   : > { %v6148_v62 = vpop.f32.mrf.mxu0 }
 0xbae   : > { %v3721_v63 = vpop.permute.xlu1 %3720  ;;  %v3718_v2 = vpop.permute.xlu0 %3717 }
 0xbaf   : > { %v3726_v3 = vcombine.low %v3474_v57, %v3721_v63  ;;  %v3727_v4 = vcombine.high %v3474_v57, %v3721_v63 }
 0xbb1   : > { %v3734_v8 = vrot.slane %v3726_v3, %v7546_v13  ;;  %v3741_v10 = vrot.slane %v3727_v4, %v7546_v13 }
 0xbb2   : > { %v3724_v1 = vpop.permute.xlu0 %3723  ;;  %v3572_v5 = vpop.permute.xlu1 %3571 }
 0xbb3   : > { %v3742_v6 = vcombine.low %v3718_v2, %v3724_v1  ;;  %v3743_v7 = vcombine.high %v3718_v2, %v3724_v1 }
 0xbb5   : > { %v3750_v11 = vrot.slane %v3742_v6, %v7546_v13  ;;  %v3757_v12 = vrot.slane %v3743_v7, %v7546_v13 }
 0xbb6   : > { %v3575_v15 = vpop.permute.xlu0 %3574  ;;  %v3578_v16 = vpop.permute.xlu1 %3577 }
 0xbb7   : > { %v3758_v17 = vcombine.low %v3734_v8, %v3750_v11  ;;  %v3759_v18 = vcombine.high %v3734_v8, %v3750_v11  ;;  %v3774_v19 = vcombine.low %v3741_v10, %v3757_v12  ;;  %v3775_v21 = vcombine.high %v3741_v10, %v3757_v12 }
 0xbb8   : > { %v3580_v22 = vcombine.low %v3381_v60, %v3575_v15  ;;  %v3581_v38 = vcombine.high %v3381_v60, %v3575_v15  ;;  %v3596_v23 = vcombine.low %v3572_v5, %v3578_v16  ;;  %v3597_v24 = vcombine.high %v3572_v5, %v3578_v16 }
 0xbb9   : > { %v3766_v25 = vrot.slane %v3758_v17, %v7549_v20  ;;  %v3773_v26 = vrot.slane %v3759_v18, %v7549_v20  ;;  %v3782_v14 = vrot.slane %v3774_v19, %v7549_v20  ;;  %v3789_v27 = vrot.slane %v3775_v21, %v7549_v20 }
 0xbba   : > { %v3588_v28 = vrot.slane %v3580_v22, %v7546_v13  ;;  %v3595_v29 = vrot.slane %v3581_v38, %v7546_v13  ;;  %v3604_v31 = vrot.slane %v3596_v23, %v7546_v13  ;;  %v3611_v33 = vrot.slane %v3597_v24, %v7546_v13 }
 0xbbb   : > { %v3794_v34 = vcombine.low %v3766_v25, %v3773_v26  ;;  %v5572_v36 = vcombine.high %v3766_v25, %v3773_v26  ;;  %v3810_v37 = vcombine.low %v3782_v14, %v3789_v27  ;;  %v5573_v39 = vcombine.high %v3782_v14, %v3789_v27 }
 0xbbc   : > { %v3612_v40 = vcombine.low %v3588_v28, %v3604_v31  ;;  %v3613_v41 = vcombine.high %v3588_v28, %v3604_v31  ;;  %v3628_v42 = vcombine.low %v3595_v29, %v3611_v33  ;;  %v3629_v43 = vcombine.high %v3595_v29, %v3611_v33 }
 0xbbd   : > { %v3801_v44 = vrot.slane %v3794_v34, %v7546_v13  ;;  %v3809_v45 = vrot.slane %v5572_v36, %v7546_v13  ;;  %v3817_v46 = vrot.slane %v3810_v37, %v7546_v13  ;;  %v3825_v47 = vrot.slane %v5573_v39, %v7546_v13 }
 0xbbe   : > { %v3620_v48 = vrot.slane %v3612_v40, %v7549_v20  ;;  %v3627_v49 = vrot.slane %v3613_v41, %v7549_v20  ;;  %v3636_v50 = vrot.slane %v3628_v42, %v7549_v20  ;;  %v3643_v51 = vrot.slane %v3629_v43, %v7549_v20  ;;  %v5569_v40 = vld [vmem:[%s8120_s2] ss:$0 sm:$0xff]  ;;  %s1314_s2 = scalar_lea.vmem [#allocation23], %s7415_s8 }
 0xbbf   : > { %v3826_v53 = vcombine.low %v3801_v44, %v3809_v45  ;;  %v3842_v55 = vcombine.low %v3817_v46, %v3825_v47  ;;  %v3827_v59 = vcombine.high %v3801_v44, %v3809_v45  ;;  %v3843_v54 = vcombine.high %v3817_v46, %v3825_v47 }
 0xbc0   : > { %v3648_v52 = vcombine.low %v3620_v48, %v3627_v49  ;;  %v5570_v56 = vcombine.high %v3620_v48, %v3627_v49  ;;  %v3664_v57 = vcombine.low %v3636_v50, %v3643_v51  ;;  %v5571_v58 = vcombine.high %v3636_v50, %v3643_v51 }
 0xbc1   : > { %v3834_v60 = vrot.slane %v3826_v53, %v7549_v20  ;;  %v3850_v62 = vrot.slane %v3842_v55, %v7549_v20  ;;  %v3841_v11 = vrot.slane %v3827_v59, %v7549_v20  ;;  %v3857_v12 = vrot.slane %v3843_v54, %v7549_v20 }
 0xbc2   : > { %v3655_v63 = vrot.slane %v3648_v52, %v7546_v13  ;;  %v3663_v2 = vrot.slane %v5570_v56, %v7546_v13  ;;  %v3671_v3 = vrot.slane %v3664_v57, %v7546_v13  ;;  %v3679_v4 = vrot.slane %v5571_v58, %v7546_v13 }
 0xbc3   : > { %v3858_v1 = vcombine.low %v3834_v60, %v3850_v62  ;;  %v3859_v5 = vcombine.high %v3834_v60, %v3850_v62  ;;  %v3860_v22 = vcombine.low %v3841_v11, %v3857_v12  ;;  %v3861_v38 = vcombine.high %v3841_v11, %v3857_v12 }
 0xbc4   : > { %v3680_v6 = vcombine.low %v3655_v63, %v3663_v2  ;;  %v3681_v7 = vcombine.high %v3655_v63, %v3663_v2  ;;  %v3696_v8 = vcombine.low %v3671_v3, %v3679_v4  ;;  %v3697_v10 = vcombine.high %v3671_v3, %v3679_v4 }
 0xbc5   : > { %6150 = vmatpush3.xpose.msk.msra.mxu1 %vm2116_vm2, %v3858_v1  ;;  %6155 = vmatpush3.xpose.msk.msra.mxu0 %vm2116_vm2, %v3859_v5  ;;  %v3567_v41 = vadd.f32 %v5569_v40, %v7798_v61 }
 0xbc6   : > { %6159 = vmatprep.subr.mxu1 %v6998_v0  ;;  %6164 = vmatprep.subr.mxu0 %v6998_v0  ;;  %v3688_v15 = vrot.slane %v3680_v6, %v7549_v20  ;;  %v3704_v16 = vrot.slane %v3696_v8, %v7549_v20  ;;  %v3695_v19 = vrot.slane %v3681_v7, %v7549_v20 }
 0xbc7   : > { %v3711_v21 = vrot.slane %v3697_v10, %v7549_v20 }
 0xbc8   : > { %v3712_v17 = vcombine.low %v3688_v15, %v3704_v16  ;;  %v3713_v18 = vcombine.high %v3688_v15, %v3704_v16 }
 0xbc9   : > { %v3714_v23 = vcombine.low %v3695_v19, %v3711_v21  ;;  %v3715_v24 = vcombine.high %v3695_v19, %v3711_v21 }
 0xbca   : > { %6152 = vmatmul.mubr.msk.f32.vlgmr.msra.gmra.mxu1 %vm2116_vm2, %v3712_v17  ;;  %6157 = vmatmul.mubr.msk.f32.vlgmr.msra.gmra.mxu0 %vm2116_vm2, %v3713_v18 }
 0xbcb   : > { %6160 = vmatpush3.xpose.msk.msra.mxu1 %vm2116_vm2, %v3860_v22  ;;  %6165 = vmatpush3.xpose.msk.msra.mxu0 %vm2116_vm2, %v3861_v38 }
 0xbcc   : > { %6161 = vmatprep.mubr.msk.f32.mxu1 %vm6999_vm0, %v6998_v0  ;;  %6166 = vmatprep.mubr.msk.f32.mxu0 %vm6999_vm0, %v6998_v0 }
 0xbcd   : > { %6169 = vmatprep.subr.mxu1 %v6998_v0  ;;  %6174 = vmatprep.subr.mxu0 %v6998_v0 }
 0xbce   : > { %6162 = vmatmul.mubr.msk.f32.vlgmr.msra.gmra.mxu1 %vm2116_vm2, %v3714_v23  ;;  %6167 = vmatmul.mubr.msk.f32.vlgmr.msra.gmra.mxu0 %vm2116_vm2, %v3715_v24 }
 0xbcf   : > { %6171 = vmatprep.mubr.msk.f32.mxu1 %vm6999_vm0, %v6998_v0  ;;  %6176 = vmatprep.mubr.msk.f32.mxu0 %vm6999_vm0, %v6998_v0 }
 0xc8a   : > { %v4080_v25 = vpop.f32.mrf.mxu1  ;;  %v4156_v26 = vpop.f32.mrf.mxu0 }
 0xc8b   : > { %v4312_v14 = vsel %vm2421_vm3, %v4080_v25, -inf  ;;  %v4315_v27 = vsel %vm2421_vm3, %v4156_v26, -inf }
 0xc8c   : > { %4313 = vmax.xlane.f32.xlu0 %v4312_v14  ;;  %v6153_v28 = vpop.f32.mrf.mxu1  ;;  %4316 = vmax.xlane.f32.xlu1 %v4315_v27  ;;  %v6158_v29 = vpop.f32.mrf.mxu0 }
 0xc8e   : > { %v4232_v31 = vpop.f32.mrf.mxu1  ;;  %v4308_v33 = vpop.f32.mrf.mxu0 }
 0xc8f   : > { %v4318_v34 = vsel %vm2421_vm3, %v4232_v31, -inf  ;;  %v4321_v39 = vsel %vm2421_vm3, %v4308_v33, -inf }
 0xc90   : > { %4319 = vmax.xlane.f32.xlu0 %v4318_v34  ;;  %v6163_v36 = vpop.f32.mrf.mxu1  ;;  %v6168_v37 = vpop.f32.mrf.mxu0 }
 0xc94   : > { %4322 = vmax.xlane.f32.xlu0 %v4321_v39 }
 0xc9d   : > { %3863 = vrot.lane.b32.xlu1 %v3567_v41, %s7001_s3 }
 0xd15   : > { %v4314_v42 = vpop.xlane.xlu0 %4313  ;;  %v4317_v43 = vpop.xlane.xlu1 %4316 }
 0xd16   : > { %v4324_v44 = vsub.f32 %v4080_v25, %v4314_v42  ;;  %v4325_v45 = vsub.f32 %v4156_v26, %v4317_v43 }
 0xd18   : > { %v4328_v46 = vmul.f32 1.442695, %v4324_v44  ;;  %v4330_v47 = vmul.f32 1.442695, %v4325_v45 }
 0xd19   : > { %v4320_v48 = vpop.xlane.xlu0 %4319  ;;  %v3864_v62 = vpop.permute.xlu1 %3863 }
 0xd1a   : > { %6494 = vpow2.f32 %v4328_v46  ;;  %v4326_v49 = vsub.f32 %v4232_v31, %v4320_v48 }
 0xd1b   : > { %6496 = vpow2.f32 %v4330_v47 }
 0xd1c   : > { %v4332_v50 = vmul.f32 1.442695, %v4326_v49 }
 0xd1d   : > { %v4323_v51 = vpop.xlane.xlu0 %4322 }
 0xd1e   : > { %6498 = vpow2.f32 %v4332_v50  ;;  %v4327_v53 = vsub.f32 %v4308_v33, %v4323_v51 }
 0xd20   : > { %v4334_v55 = vmul.f32 1.442695, %v4327_v53 }
 0xd22   : > { %6500 = vpow2.f32 %v4334_v55 }
 0xd27   : > { %v6495_v52 = vpop.eup %6494 }
 0xd28   : > { %v6497_v61 = vpop.eup %6496  ;;  %v4336_v56 = vsel %vm2421_vm3, %v6495_v52, 0.0 }
 0xd29   : > { %4337 = vadd.xlane.f32.xlu1 %v4336_v56  ;;  %v4339_v57 = vsel %vm2421_vm3, %v6497_v61, 0.0 }
 0xd2a   : > { %4340 = vadd.xlane.f32.xlu0 %v4339_v57  ;;  %v4813_v57 = vld [vmem:[#allocation19 + $0x70] sm:$0xff] }
 0xd2b   : > { %v7861_v58 = vpop.eup %6498 }
 0xd2c   : > { %v4342_v59 = vsel %vm2421_vm3, %v7861_v58, 0.0 }
 0xd2d   : > { %4343 = vadd.xlane.f32.xlu1 %v4342_v59  ;;  %v4811_v59 = vld [vmem:[#allocation19 + $0x60] sm:$0xff] }
 0xd2f   : > { %v7865_v54 = vpop.eup %6500 }
 0xd30   : > { %v4345_v60 = vsel %vm2421_vm3, %v7865_v54, 0.0 }
 0xd31   : > { %4346 = vadd.xlane.f32.xlu0 %v4345_v60  ;;  %v4809_v60 = vld [vmem:[#allocation19 + $0x50] sm:$0xff] }
 0xd3e   : > { %3869 = vrot.lane.b32.xlu1 %v3567_v41, %s7000_s9 }
 0xd47   : > { %3866 = vrot.lane.b32.xlu0 %v3567_v41, %s7002_s27 }
 0xdb2   : > { %v4338_v63 = vpop.xlane.xlu1 %4337 }
 0xdb3   : > { %v4341_v2 = vpop.xlane.xlu0 %4340  ;;  %6502 = vrcp.f32 %v4338_v63  ;;  %v4807_v63 = vld [vmem:[#allocation19 + $0x40] sm:$0xff] }
 0xdb4   : > { %6504 = vrcp.f32 %v4341_v2  ;;  %v4806_v2 = vld [vmem:[#allocation19 + $0x38] sm:$0xff] }
 0xdb6   : > { %v4344_v3 = vpop.xlane.xlu1 %4343 }
 0xdb7   : > { %6506 = vrcp.f32 %v4344_v3  ;;  %v4805_v3 = vld [vmem:[#allocation19 + $0x30] sm:$0xff] }
 0xdba   : > { %v3870_v4 = vpop.permute.xlu1 %3869  ;;  %v4347_v1 = vpop.xlane.xlu0 %4346 }
 0xdbb   : > { %v3888_v5 = vcombine.low %v3864_v62, %v3870_v4  ;;  %v3889_v6 = vcombine.high %v3864_v62, %v3870_v4  ;;  %6508 = vrcp.f32 %v4347_v1  ;;  %v4808_v62 = vld [vmem:[#allocation19 + $0x48] sm:$0xff]  ;;  %v4803_v1 = vld [vmem:[#allocation19 + $0x20] sm:$0xff] }
 0xdbc   : > { %v4804_v4 = vld [vmem:[#allocation19 + $0x28] sm:$0xff] }
 0xdbd   : > { %v3896_v11 = vrot.slane %v3888_v5, %v7546_v13  ;;  %v3903_v12 = vrot.slane %v3889_v6, %v7546_v13  ;;  %v4802_v5 = vld [vmem:[#allocation19 + $0x18] sm:$0xff] }
 0xdbe   : > { %v3867_v7 = vpop.permute.xlu0 %3866 }
 0xdbf   : > { %v3872_v8 = vcombine.low %v3567_v41, %v3867_v7  ;;  %v3873_v10 = vcombine.high %v3567_v41, %v3867_v7 }
 0xdc0   : > { %v6503_v40 = vpop.eup %6502 }
 0xdc1   : > { %v3880_v15 = vrot.slane %v3872_v8, %v7546_v13  ;;  %v3887_v16 = vrot.slane %v3873_v10, %v7546_v13  ;;  %v6505_v41 = vpop.eup %6504  ;;  %v4352_v49 = vmul.f32 %v6503_v40, %v6495_v52 }
 0xdc2   : > { %v4353_v50 = vmul.f32 %v6505_v41, %v6497_v61  ;;  %v4814_v61 = vld [vmem:[#allocation19 + $0x78] sm:$0xff] }
 0xdc3   : > { %v3904_v17 = vcombine.low %v3880_v15, %v3896_v11  ;;  %v3905_v18 = vcombine.high %v3880_v15, %v3896_v11  ;;  %v3920_v19 = vcombine.low %v3887_v16, %v3903_v12  ;;  %v3921_v21 = vcombine.high %v3887_v16, %v3903_v12 }
 0xdc4   : > { %v6507_v46 = vpop.eup %6506 }
 0xdc5   : > { %v3912_v22 = vrot.slane %v3904_v17, %v7549_v20  ;;  %v3919_v38 = vrot.slane %v3905_v18, %v7549_v20  ;;  %v3928_v23 = vrot.slane %v3920_v19, %v7549_v20  ;;  %v3935_v24 = vrot.slane %v3921_v21, %v7549_v20 }
 0xdc6   : > { %v4354_v56 = vmul.f32 %v6507_v46, %v7861_v58  ;;  %v4812_v58 = vld [vmem:[#allocation19 + $0x68] sm:$0xff] }
 0xdc7   : > { %v3940_v25 = vcombine.low %v3912_v22, %v3919_v38  ;;  %v5574_v26 = vcombine.high %v3912_v22, %v3919_v38  ;;  %v3956_v14 = vcombine.low %v3928_v23, %v3935_v24  ;;  %v5575_v27 = vcombine.high %v3928_v23, %v3935_v24 }
 0xdc8   : > { %v6509_v51 = vpop.eup %6508 }
 0xdc9   : > { %v3947_v28 = vrot.slane %v3940_v25, %v7546_v13  ;;  %v3955_v29 = vrot.slane %v5574_v26, %v7546_v13  ;;  %v3963_v31 = vrot.slane %v3956_v14, %v7546_v13  ;;  %v3971_v33 = vrot.slane %v5575_v27, %v7546_v13 }
 0xdca   : > { %v4355_v52 = vmul.f32 %v6509_v51, %v7865_v54  ;;  %v4810_v54 = vld [vmem:[#allocation19 + $0x58] sm:$0xff] }
 0xdcb   : > { %v3972_v34 = vcombine.low %v3947_v28, %v3955_v29  ;;  %v3988_v36 = vcombine.low %v3963_v31, %v3971_v33  ;;  %v3973_v37 = vcombine.high %v3947_v28, %v3955_v29  ;;  %v3989_v39 = vcombine.high %v3963_v31, %v3971_v33  ;;  %v4801_v28 = vld [vmem:[#allocation19 + $0x10] sm:$0xff]  ;;  %v4800_v29 = vld [vmem:[#allocation19 + $0x8] sm:$0xff] }
 0xdcd   : > { %v3980_v42 = vrot.slane %v3972_v34, %v7549_v20  ;;  %v3996_v43 = vrot.slane %v3988_v36, %v7549_v20  ;;  %v3987_v44 = vrot.slane %v3973_v37, %v7549_v20  ;;  %v4003_v45 = vrot.slane %v3989_v39, %v7549_v20 }
 0xdcf   : > { %v4004_v47 = vcombine.low %v3980_v42, %v3996_v43  ;;  %v4005_v48 = vcombine.high %v3980_v42, %v3996_v43  ;;  %v4006_v53 = vcombine.low %v3987_v44, %v4003_v45  ;;  %v4007_v55 = vcombine.high %v3987_v44, %v4003_v45  ;;  %v4799_v42 = vld [vmem:[#allocation19] sm:$0xff] }
 0xdd1   : > { %6170 = vmatpush3.msra.mxu1 %v4004_v47  ;;  %6175 = vmatpush3.msra.mxu0 %v4005_v48 }
 0xdd2   : > { %6172 = vmatmul.mubr.msk.f32.vlgmr.msra.gmra.mxu1 %vm2421_vm3, %v4352_v49  ;;  %6177 = vmatmul.mubr.msk.f32.vlgmr.msra.gmra.mxu0 %vm2421_vm3, %v4353_v50 }
 0xdd3   : > { %6179 = vmatprep.subr.mxu1 %v6998_v0  ;;  %6184 = vmatprep.subr.mxu0 %v6998_v0 }
 0xdd4   : > { %6180 = vmatpush3.msra.mxu1 %v4006_v53  ;;  %6185 = vmatpush3.msra.mxu0 %v4007_v55 }
 0xdd5   : > { %6181 = vmatprep.mubr.msk.f32.mxu1 %vm6999_vm0, %v6998_v0  ;;  %6186 = vmatprep.mubr.msk.f32.mxu0 %vm6999_vm0, %v6998_v0 }
 0xdd6   : > { %6182 = vmatmul.mubr.msk.f32.vlgmr.msra.gmra.mxu1 %vm2421_vm3, %v4354_v56  ;;  %6187 = vmatmul.mubr.msk.f32.vlgmr.msra.gmra.mxu0 %vm2421_vm3, %v4355_v52 }
 0xdd7   : > { %6189 = vmatprep.subr.mxu1 %v6998_v0  ;;  %6221 = vmatprep.mubr.msk.f32.mxu1 %vm6999_vm0, %v6998_v0 }
 0xdd8   : > { %5030 = vmatprep.mubr.f32.mxu0 %v6998_v0  ;;  %6190 = vmatpush3.msra.mxu1 %v4814_v61 }
 0xdd9   : > { %6191 = vmatprep.subr.mxu1 %v6998_v0 }
 0xdda   : > { %6192 = vmatpush3.msra.mxu1 %v4813_v57 }
 0xddb   : > { %6193 = vmatprep.subr.mxu1 %v6998_v0 }
 0xddc   : > { %6194 = vmatpush3.msra.mxu1 %v4812_v58 }
 0xddd   : > { %6195 = vmatprep.subr.mxu1 %v6998_v0 }
 0xdde   : > { %6196 = vmatpush3.msra.mxu1 %v4811_v59 }
 0xddf   : > { %6197 = vmatprep.subr.mxu1 %v6998_v0 }
 0xde0   : > { %6198 = vmatpush3.msra.mxu1 %v4810_v54 }
 0xde1   : > { %6199 = vmatprep.subr.mxu1 %v6998_v0 }
 0xde2   : > { %6200 = vmatpush3.msra.mxu1 %v4809_v60 }
 0xde3   : > { %6201 = vmatprep.subr.mxu1 %v6998_v0 }
 0xde4   : > { %6202 = vmatpush3.msra.mxu1 %v4808_v62 }
 0xde5   : > { %6203 = vmatprep.subr.mxu1 %v6998_v0 }
 0xde6   : > { %6204 = vmatpush3.msra.mxu1 %v4807_v63  ;;  %v4953_v63 = vld [vmem:[#allocation20 + $0xf8] sm:$0xff] }
 0xde7   : > { %6205 = vmatprep.subr.mxu1 %v6998_v0  ;;  %4966 = vmatprep.subr.mxu0 %v4953_v63  ;;  %v5059_v63 = vld [vmem:[#allocation22 + $0xa0] sm:$0xff] }
 0xde8   : > { %6206 = vmatpush3.msra.mxu1 %v4806_v2  ;;  %v4952_v2 = vld [vmem:[#allocation20 + $0xf0] sm:$0xff] }
 0xde9   : > { %6207 = vmatprep.subr.mxu1 %v6998_v0  ;;  %4967 = vmatpush1.msra.mxu0 %v4952_v2  ;;  %v5043_v2 = vld [vmem:[#allocation22 + $0x20] sm:$0xff] }
 0xdea   : > { %6208 = vmatpush3.msra.mxu1 %v4805_v3  ;;  %v4951_v3 = vld [vmem:[#allocation20 + $0xe8] sm:$0xff] }
 0xdeb   : > { %6209 = vmatprep.subr.mxu1 %v6998_v0  ;;  %4968 = vmatprep.subr.mxu0 %v4951_v3 }
 0xdec   : > { %6210 = vmatpush3.msra.mxu1 %v4804_v4  ;;  %v4950_v4 = vld [vmem:[#allocation20 + $0xe0] sm:$0xff] }
 0xded   : > { %6211 = vmatprep.subr.mxu1 %v6998_v0  ;;  %4969 = vmatpush1.msra.mxu0 %v4950_v4 }
 0xdee   : > { %6212 = vmatpush3.msra.mxu1 %v4803_v1  ;;  %v5590_v1 = vld [vmem:[%s8121_s23] ss:$0 sm:$0xff]  ;;  %s5288_s23 = sshll.u32 %s1314_s2, 4  ;;  %s5289_s23 = int_to_ptr.vmem [resolvable:$true] %s5288_s23 }
 0xdef   : > { %6213 = vmatprep.subr.mxu1 %v6998_v0 }
 0xdf0   : > { %6214 = vmatpush3.msra.mxu1 %v4802_v5 }
 0xdf1   : > { %6215 = vmatprep.subr.mxu1 %v6998_v0 }
 0xdf2   : > { %6216 = vmatpush3.msra.mxu1 %v4801_v28  ;;  %v4932_v28 = vld [vmem:[#allocation20 + $0x50] sm:$0xff] }
 0xdf3   : > { %6217 = vmatprep.subr.mxu1 %v6998_v0 }
 0xdf4   : > { %6218 = vmatpush3.msra.mxu1 %v4800_v29  ;;  %v4931_v29 = vld [vmem:[#allocation20 + $0x48] sm:$0xff] }
 0xdf5   : > { %6219 = vmatprep.subr.mxu1 %v6998_v0 }
 0xdf6   : > { %6220 = vmatpush3.msra.mxu1 %v4799_v42  ;;  %v4922_v42 = vld [vmem:[#allocation20] sm:$0xff] }
 0xe92   : > { %v4425_v6 = vpop.f32.mrf.mxu1  ;;  %v4498_v7 = vpop.f32.mrf.mxu0 }
 0xe94   : > { %v6173_v8 = vpop.f32.mrf.mxu1  ;;  %v6178_v10 = vpop.f32.mrf.mxu0 }
 0xe96   : > { %v4571_v11 = vpop.f32.mrf.mxu1  ;;  %v4644_v12 = vpop.f32.mrf.mxu0 }
 0xe97   : > { %v4648_v15 = vcombine.low %v4425_v6, %v4571_v11  ;;  %v4649_v16 = vcombine.high %v4425_v6, %v4571_v11  ;;  %v4664_v17 = vcombine.low %v4498_v7, %v4644_v12  ;;  %v4665_v18 = vcombine.high %v4498_v7, %v4644_v12  ;;  %v4949_v11 = vld [vmem:[#allocation20 + $0xd8] sm:$0xff]  ;;  %v4948_v12 = vld [vmem:[#allocation20 + $0xd0] sm:$0xff] }
 0xe98   : > { %v6183_v19 = vpop.f32.mrf.mxu1  ;;  %v6188_v21 = vpop.f32.mrf.mxu0  ;;  %4970 = vmatprep.subr.mxu0 %v4949_v11 }
 0xe99   : > { %v4656_v22 = vrot.slane %v4648_v15, %v7546_v13  ;;  %v4663_v38 = vrot.slane %v4649_v16, %v7546_v13  ;;  %v4672_v23 = vrot.slane %v4664_v17, %v7546_v13  ;;  %v4679_v24 = vrot.slane %v4665_v18, %v7546_v13  ;;  %4971 = vmatpush1.msra.mxu0 %v4948_v12  ;;  %v4947_v15 = vld [vmem:[#allocation20 + $0xc8] sm:$0xff]  ;;  %v4946_v16 = vld [vmem:[#allocation20 + $0xc0] sm:$0xff]  ;;  %v4945_v17 = vld [vmem:[#allocation20 + $0xb8] sm:$0xff] }
 0xe9a   : > { %4972 = vmatprep.subr.mxu0 %v4947_v15  ;;  %v4944_v18 = vld [vmem:[#allocation20 + $0xb0] sm:$0xff]  ;;  %v4942_v19 = vld [vmem:[#allocation20 + $0xa0] sm:$0xff]  ;;  %v4941_v21 = vld [vmem:[#allocation20 + $0x98] sm:$0xff] }
 0xe9b   : > { %v4680_v25 = vcombine.low %v4656_v22, %v4672_v23  ;;  %v4681_v26 = vcombine.high %v4656_v22, %v4672_v23  ;;  %v4696_v14 = vcombine.low %v4663_v38, %v4679_v24  ;;  %v4697_v27 = vcombine.high %v4663_v38, %v4679_v24  ;;  %4973 = vmatpush1.msra.mxu0 %v4946_v16  ;;  %v4940_v22 = vld [vmem:[#allocation20 + $0x90] sm:$0xff]  ;;  %v4939_v38 = vld [vmem:[#allocation20 + $0x88] sm:$0xff]  ;;  %v4938_v23 = vld [vmem:[#allocation20 + $0x80] sm:$0xff] }
 0xe9c   : > { %4974 = vmatprep.subr.mxu0 %v4945_v17  ;;  %v4937_v24 = vld [vmem:[#allocation20 + $0x78] sm:$0xff] }
 0xe9d   : > { %v4688_v31 = vrot.slane %v4680_v25, %v7549_v20  ;;  %v4695_v33 = vrot.slane %v4681_v26, %v7549_v20  ;;  %v4704_v34 = vrot.slane %v4696_v14, %v7549_v20  ;;  %v4711_v36 = vrot.slane %v4697_v27, %v7549_v20  ;;  %4975 = vmatpush1.msra.mxu0 %v4944_v18  ;;  %v4936_v25 = vld [vmem:[#allocation20 + $0x70] sm:$0xff]  ;;  %v4935_v26 = vld [vmem:[#allocation20 + $0x68] sm:$0xff]  ;;  %v4934_v14 = vld [vmem:[#allocation20 + $0x60] sm:$0xff] }
 0xe9e   : > { %v4933_v27 = vld [vmem:[#allocation20 + $0x58] sm:$0xff] }
 0xe9f   : > { %v4716_v37 = vcombine.low %v4688_v31, %v4695_v33  ;;  %v5588_v39 = vcombine.high %v4688_v31, %v4695_v33  ;;  %v4732_v40 = vcombine.low %v4704_v34, %v4711_v36  ;;  %v5589_v41 = vcombine.high %v4704_v34, %v4711_v36  ;;  %v4930_v31 = vld [vmem:[#allocation20 + $0x40] sm:$0xff]  ;;  %v4929_v33 = vld [vmem:[#allocation20 + $0x38] sm:$0xff]  ;;  %v4928_v34 = vld [vmem:[#allocation20 + $0x30] sm:$0xff] }
 0xea0   : > { %v4927_v36 = vld [vmem:[#allocation20 + $0x28] sm:$0xff] }
 0xea1   : > { %v4723_v43 = vrot.slane %v4716_v37, %v7546_v13  ;;  %v4731_v44 = vrot.slane %v5588_v39, %v7546_v13  ;;  %v4739_v45 = vrot.slane %v4732_v40, %v7546_v13  ;;  %v4747_v46 = vrot.slane %v5589_v41, %v7546_v13  ;;  %v4926_v37 = vld [vmem:[#allocation20 + $0x20] sm:$0xff]  ;;  %v4925_v39 = vld [vmem:[#allocation20 + $0x18] sm:$0xff]  ;;  %v4924_v40 = vld [vmem:[#allocation20 + $0x10] sm:$0xff] }
 0xea2   : > { %v4923_v41 = vld [vmem:[#allocation20 + $0x8] sm:$0xff] }
 0xea3   : > { %v4749_v47 = vcombine.high %v4723_v43, %v4731_v44  ;;  %v4765_v48 = vcombine.high %v4739_v45, %v4747_v46  ;;  %v4748_v49 = vcombine.low %v4723_v43, %v4731_v44  ;;  %v4764_v50 = vcombine.low %v4739_v45, %v4747_v46  ;;  %v5070_v43 = vld [vmem:[#allocation22 + $0xf8] sm:$0xff]  ;;  %v5069_v45 = vld [vmem:[#allocation22 + $0xf0] sm:$0xff] }
 0xea4   : > { %v5054_v44 = vld [vmem:[#allocation22 + $0x78] sm:$0xff]  ;;  %5805 = vmatprep.subr.mxu1 %v5070_v43  ;;  %v5053_v46 = vld [vmem:[#allocation22 + $0x70] sm:$0xff] }
 0xea5   : > { %v4763_v51 = vrot.slane %v4749_v47, %v7549_v20  ;;  %v4779_v53 = vrot.slane %v4765_v48, %v7549_v20  ;;  %v4756_v55 = vrot.slane %v4748_v49, %v7549_v20  ;;  %v4772_v56 = vrot.slane %v4764_v50, %v7549_v20  ;;  %v5068_v47 = vld [vmem:[#allocation22 + $0xe8] sm:$0xff]  ;;  %v5067_v49 = vld [vmem:[#allocation22 + $0xe0] sm:$0xff]  ;;  %v5200_v43 = vld [vmem:[%s7189_s29 + $0x70] sm:$0xff] }
 0xea6   : > { %v5052_v48 = vld [vmem:[#allocation22 + $0x68] sm:$0xff]  ;;  %v5051_v50 = vld [vmem:[#allocation22 + $0x60] sm:$0xff] }
 0xea7   : > { %v4782_v52 = vcombine.low %v4763_v51, %v4779_v53  ;;  %v4781_v61 = vcombine.high %v4756_v55, %v4772_v56  ;;  %v4780_v57 = vcombine.low %v4756_v55, %v4772_v56  ;;  %v4783_v13 = vcombine.high %v4763_v51, %v4779_v53  ;;  %v5066_v51 = vld [vmem:[#allocation22 + $0xd8] sm:$0xff]  ;;  %v5065_v55 = vld [vmem:[#allocation22 + $0xd0] sm:$0xff] }
 0xea8   : > { %v5050_v53 = vld [vmem:[#allocation22 + $0x58] sm:$0xff]  ;;  %v5049_v56 = vld [vmem:[#allocation22 + $0x50] sm:$0xff] }
 0xea9   : > { %4789 = vrot.lane.b32.xlu0 %v4782_v52, %s7002_s27  ;;  %4785 = vrot.lane.b32.xlu1 %v4781_v61, %s7000_s9  ;;  %v5064_v52 = vld [vmem:[#allocation22 + $0xc8] sm:$0xff]  ;;  %s8122_s9 = sld [smem:[#allocation54_spill]] }
 0xeaa   : > { %v5048_v61 = vld [vmem:[#allocation22 + $0x48] sm:$0xff]  ;;  %s8124_s27 = sld [smem:[#allocation52_spill]] }
 0xead   : > { %4793 = vrot.lane.b32.xlu1 %v4783_v13, %s7001_s3  ;;  %v5047_v13 = vld [vmem:[#allocation22 + $0x40] sm:$0xff]  ;;  %s8123_s3 = sld [smem:[#allocation55_spill]] }
 0xeaf   : > { %v5591_v15 = vld [vmem:[%s8122_s9] ss:$0 sm:$0xff]  ;;  %s8002_s9 = scalar_lea.hbm %s8129_s13, %s5596_s12 }
 0xeb3   : > { %v5592_v17 = vld [vmem:[%s8123_s3] ss:$0 sm:$0xff]  ;;  %s5276_s3 = scalar_lea.sflag [#allocation4], %s7415_s8 }
 0xf1b   : > { %v4786_v58 = vpop.permute.xlu1 %4785  ;;  %v4790_v59 = vpop.permute.xlu0 %4789 }
 0xf1c   : > { %v4796_v54 = vsel %vm2116_vm2, %v4780_v57, %v4786_v58  ;;  %v5063_v57 = vld [vmem:[#allocation22 + $0xc0] sm:$0xff]  ;;  %v5062_v58 = vld [vmem:[#allocation22 + $0xb8] sm:$0xff] }
 0xf1d   : > { %v4797_v62 = vsel %vm2907_vm4, %v4796_v54, %v4790_v59  ;;  %v5046_v59 = vld [vmem:[#allocation22 + $0x38] sm:$0xff]  ;;  %v5061_v54 = vld [vmem:[#allocation22 + $0xb0] sm:$0xff] }
 0xf1f   : > { %v4794_v60 = vpop.permute.xlu1 %4793 }
 0xf20   : > { %v4798_v20 = vsel %vm2909_vm5, %v4797_v62, %v4794_v60  ;;  %v5045_v60 = vld [vmem:[#allocation22 + $0x30] sm:$0xff]  ;;  %v5060_v62 = vld [vmem:[#allocation22 + $0xa8] sm:$0xff] }
 0xf21   : > { %6222 = vmatmul.mubr.f32.vlgmr.msra.gmra.mxu1 %v4798_v20  ;;  %v5044_v20 = vld [vmem:[#allocation22 + $0x28] sm:$0xff] }
 0xf22   : > { %5806 = vmatpush3.msra.mxu1 %v5054_v44  ;;  %v5199_v44 = vld [vmem:[%s7189_s29 + $0x68] sm:$0xff] }
 0xf23   : > { %5807 = vmatprep.subr.mxu1 %v5069_v45  ;;  %v5198_v45 = vld [vmem:[%s7189_s29 + $0x60] sm:$0xff] }
 0xf24   : > { %5808 = vmatpush3.msra.mxu1 %v5053_v46  ;;  %v5197_v46 = vld [vmem:[%s7189_s29 + $0x58] sm:$0xff] }
 0xf25   : > { %5809 = vmatprep.subr.mxu1 %v5068_v47  ;;  %v5196_v47 = vld [vmem:[%s7189_s29 + $0x50] sm:$0xff] }
 0xf26   : > { %5810 = vmatpush3.msra.mxu1 %v5052_v48  ;;  %v5195_v48 = vld [vmem:[%s7189_s29 + $0x48] sm:$0xff] }
 0xf27   : > { %5811 = vmatprep.subr.mxu1 %v5067_v49  ;;  %v5194_v49 = vld [vmem:[%s7189_s29 + $0x40] sm:$0xff] }
 0xf28   : > { %5812 = vmatpush3.msra.mxu1 %v5051_v50  ;;  %v5193_v50 = vld [vmem:[%s7189_s29 + $0x38] sm:$0xff] }
 0xf29   : > { %5813 = vmatprep.subr.mxu1 %v5066_v51  ;;  %v5192_v51 = vld [vmem:[%s7189_s29 + $0x30] sm:$0xff] }
 0xf2a   : > { %5814 = vmatpush3.msra.mxu1 %v5050_v53  ;;  %v5191_v53 = vld [vmem:[%s7189_s29 + $0x28] sm:$0xff] }
 0xf2b   : > { %5815 = vmatprep.subr.mxu1 %v5065_v55  ;;  %v5190_v55 = vld [vmem:[%s7189_s29 + $0x20] sm:$0xff] }
 0xf2c   : > { %5816 = vmatpush3.msra.mxu1 %v5049_v56  ;;  %v5189_v56 = vld [vmem:[%s7189_s29 + $0x18] sm:$0xff] }
 0xf2d   : > { %5817 = vmatprep.subr.mxu1 %v5064_v52  ;;  %v5188_v52 = vld [vmem:[%s7189_s29 + $0x10] sm:$0xff] }
 0xf2e   : > { %5818 = vmatpush3.msra.mxu1 %v5048_v61  ;;  %v5187_v61 = vld [vmem:[%s7189_s29 + $0x8] sm:$0xff] }
 0xf2f   : > { %5819 = vmatprep.subr.mxu1 %v5063_v57  ;;  %v5186_v57 = vld [vmem:[%s7189_s29] sm:$0xff] }
 0xf30   : > { %5820 = vmatpush3.msra.mxu1 %v5047_v13 }
 0xf31   : > { %5821 = vmatprep.subr.mxu1 %v5062_v58 }
 0xf32   : > { %5822 = vmatpush3.msra.mxu1 %v5046_v59 }
 0xf33   : > { %5823 = vmatprep.subr.mxu1 %v5061_v54 }
 0xf34   : > { %5824 = vmatpush3.msra.mxu1 %v5045_v60 }
 0xf35   : > { %5825 = vmatprep.subr.mxu1 %v5060_v62 }
 0xf36   : > { %5826 = vmatpush3.msra.mxu1 %v5044_v20 }
 0xf37   : > { %5827 = vmatprep.subr.mxu1 %v5059_v63 }
 0xf38   : > { %5828 = vmatpush3.msra.mxu1 %v5043_v2 }
 0xfe1   : > { %v4888_v5 = vpop.f32.mrf.mxu1 }
 0xfe2   : > { %v4889_v6 = vadd.f32 %v5590_v1, %v4888_v5 }
 0xfe3   : > { %v6223_v7 = vpop.f32.mrf.mxu1 }
 0xfe4   : > { %v7942_v8 = vadd.f32 %v4889_v6, %v7763_v35  ;;  %v4943_v35 = vld [vmem:[#allocation20 + $0xa8] sm:$0xff] }
 0xfe5   : > { %4976 = vmatprep.subr.mxu0 %v4943_v35 }
 0xfe6   : > { %4895 = vadd.xlane.f32.xlu0 %v7942_v8  ;;  %v4898_v10 = vmul.f32 %v7942_v8, %v7942_v8  ;;  %4977 = vmatpush1.msra.mxu0 %v4942_v19  ;;  %v5058_v19 = vld [vmem:[#allocation22 + $0x98] sm:$0xff] }
 0xfe7   : > { %4978 = vmatprep.subr.mxu0 %v4941_v21  ;;  %5829 = vmatprep.subr.mxu1 %v5058_v19  ;;  %v5042_v21 = vld [vmem:[#allocation22 + $0x18] sm:$0xff] }
 0xfe8   : > { %4899 = vadd.xlane.f32.xlu1 %v4898_v10  ;;  %4979 = vmatpush1.msra.mxu0 %v4940_v22  ;;  %v5057_v22 = vld [vmem:[#allocation22 + $0x90] sm:$0xff] }
 0xfe9   : > { %4980 = vmatprep.subr.mxu0 %v4939_v38  ;;  %5830 = vmatpush3.msra.mxu1 %v5042_v21  ;;  %v5041_v38 = vld [vmem:[#allocation22 + $0x10] sm:$0xff] }
 0xfea   : > { %4981 = vmatpush1.msra.mxu0 %v4938_v23  ;;  %5831 = vmatprep.subr.mxu1 %v5057_v22  ;;  %v5040_v23 = vld [vmem:[#allocation22 + $0x8] sm:$0xff] }
 0xfeb   : > { %4982 = vmatprep.subr.mxu0 %v4937_v24  ;;  %5832 = vmatpush3.msra.mxu1 %v5041_v38  ;;  %v5055_v24 = vld [vmem:[#allocation22 + $0x80] sm:$0xff] }
 0xfec   : > { %4983 = vmatpush1.msra.mxu0 %v4936_v25  ;;  %v5039_v25 = vld [vmem:[#allocation22] sm:$0xff] }
 0xfed   : > { %4984 = vmatprep.subr.mxu0 %v4935_v26  ;;  %v4954_v26 = vld [vmem:[%s8124_s27] sm:$0x3]  ;;  %s6854_s27 = scalar_lea.vmem %s5289_s23, 16 }
 0xfee   : > { %4985 = vmatpush1.msra.mxu0 %v4934_v14  ;;  %v4959_v14 = vrot.slane %v4954_v26, %v3071_v30  ;;  %p6855_p10 = scmp.ne.s32.totalorder %s5289_s23, %s6854_s27 }
 0xfef   : > { %4986 = vmatprep.subr.mxu0 %v4933_v27  ;;  %v4963_v27 = vrot.slane %v4954_v26, %v3075_v32  ;;  %v5201_v32 = vld [vmem:[%s7189_s29 + $0x78] sm:$0xff] }
 0xff0   : > { %4987 = vmatpush1.msra.mxu0 %v4932_v28  ;;  %p6856_p3 = pnand %p6855_p10, %p8130_p1 }
 0xff1   : > { %4988 = vmatprep.subr.mxu0 %v4931_v29 }
 0xff2   : > { %4989 = vmatpush1.msra.mxu0 %v4930_v31  ;;  %p6857_p6 = pneg %p6856_p3 }
 0xff3   : > { %4990 = vmatprep.subr.mxu0 %v4929_v33 }
 0xff4   : > { %4991 = vmatpush1.msra.mxu0 %v4928_v34 }
 0xff5   : > { %4992 = vmatprep.subr.mxu0 %v4927_v36 }
 0xff6   : > { %4993 = vmatpush1.msra.mxu0 %v4926_v37 }
 0xff7   : > { %4994 = vmatprep.subr.mxu0 %v4925_v39  ;;  %v5593_v39 = vld [vmem:[%s8125_s28] ss:$0 sm:$0xff]  ;;  %s7005_s28 = smov [#allocation23]  }
 0xff8   : > { %4995 = vmatpush1.msra.mxu0 %v4924_v40 }
 0xff9   : > { %4996 = vmatprep.subr.mxu0 %v4923_v41 }
 0xffa   : > { %4997 = vmatpush1.msra.mxu0 %v4922_v42 }
 0xffb   : > { %6224 = vmatprep.subr.mxu0 %v6998_v0 }
0x106f   : > { %v4896_v3 = vpop.xlane.xlu0 %4895 }
0x1070   : > { %v4897_v4 = vmul.f32 0.0078125, %v4896_v3  ;;  %v5594_v3 = vld [vmem:[%s8126_s6] ss:$0 sm:$0xff]  ;;  %s6858_s6 = sshll.u32 %s7005_s28, 4  ;;  %s6859_s6 = int_to_ptr.vmem [resolvable:$false] %s6858_s6 }
0x1071   : > { %v4900_v1 = vpop.xlane.xlu1 %4899  ;;  %s6860_s18 = scalar_lea.vmem %s6859_s6, 32  ;;  %p6861_p4 = scmp.lt.s32.totalorder %s5289_s23, %s6859_s6 }
0x1072   : > { %v4902_v5 = vmul.f32 %v4897_v4, %v4897_v4  ;;  %v4901_v6 = vmul.f32 0.0078125, %v4900_v1  ;;  %v4904_v11 = vsub.f32 %v7942_v8, %v4897_v4  ;;  %v5056_v8 = vld [vmem:[#allocation22 + $0x88] sm:$0xff]  ;;  %v5595_v1 = vld [vmem:[%s8127_s4] ss:$0 sm:$0xff]  ;;  %p6862_p5 = scmp.lt.s32.totalorder %s6860_s18, %s6854_s27 }
0x1073   : > { %5833 = vmatprep.subr.mxu1 %v5056_v8 }
0x1074   : > { %v4903_v7 = vsub.f32 %v4901_v6, %v4902_v5  ;;  %5834 = vmatpush3.msra.mxu1 %v5040_v23  ;;  %p6863_p9 = por %p6862_p5, %p6861_p4 }
0x1075   : > { %5835 = vmatprep.subr.mxu1 %v5055_v24 }
0x1076   : > { %v4905_v10 = vadd.f32 1e-05, %v4903_v7  ;;  %5836 = vmatpush3.msra.mxu1 %v5039_v25  ;;  %p6864_p11 = pnand %p6863_p9, %p6857_p6 }
0x1078   : > { %6510 = vrsqrt.f32 %v4905_v10 }
0x1085   : > { %v6511_v12 = vpop.eup %6510 }
0x1086   : > { %v4907_v16 = vmul.f32 %v6511_v12, %v4904_v11 }
0x1088   : > { %v4914_v18 = vmul.f32 %v5591_v15, %v4907_v16 }
0x108a   : > { %v4921_v35 = vadd.f32 %v5592_v17, %v4914_v18  ;;  %v5202_v17 = vld [vmem:[%s8128_s22] sm:$0x1] }
0x108c   : > { %5031 = vmatmul.mubr.f32.vlgmr.msra.gmra.mxu0 %v4921_v35 }
0x108d   : > { %6256 = vmatprep.mubr.msk.f32.mxu0 %vm6999_vm0, %v6998_v0  ;;  %6225 = vmatpush3.msra.mxu0 %v5201_v32 }
0x108e   : > { %6226 = vmatprep.subr.mxu0 %v6998_v0 }
0x108f   : > { %6227 = vmatpush3.msra.mxu0 %v5200_v43 }
0x1090   : > { %6228 = vmatprep.subr.mxu0 %v6998_v0 }
0x1091   : > { %6229 = vmatpush3.msra.mxu0 %v5199_v44 }
0x1092   : > { %6230 = vmatprep.subr.mxu0 %v6998_v0 }
0x1093   : > { %6231 = vmatpush3.msra.mxu0 %v5198_v45 }
0x1094   : > { %6232 = vmatprep.subr.mxu0 %v6998_v0 }
0x1095   : > { %6233 = vmatpush3.msra.mxu0 %v5197_v46 }
0x1096   : > { %6234 = vmatprep.subr.mxu0 %v6998_v0 }
0x1097   : > { %6235 = vmatpush3.msra.mxu0 %v5196_v47 }
0x1098   : > { %6236 = vmatprep.subr.mxu0 %v6998_v0 }
0x1099   : > { %6237 = vmatpush3.msra.mxu0 %v5195_v48 }
0x109a   : > { %6238 = vmatprep.subr.mxu0 %v6998_v0 }
0x109b   : > { %6239 = vmatpush3.msra.mxu0 %v5194_v49 }
0x109c   : > { %6240 = vmatprep.subr.mxu0 %v6998_v0 }
0x109d   : > { %6241 = vmatpush3.msra.mxu0 %v5193_v50 }
0x109e   : > { %6242 = vmatprep.subr.mxu0 %v6998_v0 }
0x109f   : > { %6243 = vmatpush3.msra.mxu0 %v5192_v51 }
0x10a0   : > { %6244 = vmatprep.subr.mxu0 %v6998_v0 }
0x10a1   : > { %6245 = vmatpush3.msra.mxu0 %v5191_v53 }
0x10a2   : > { %6246 = vmatprep.subr.mxu0 %v6998_v0 }
0x10a3   : > { %6247 = vmatpush3.msra.mxu0 %v5190_v55 }
0x10a4   : > { %6248 = vmatprep.subr.mxu0 %v6998_v0 }
0x10a5   : > { %6249 = vmatpush3.msra.mxu0 %v5189_v56 }
0x10a6   : > { %6250 = vmatprep.subr.mxu0 %v6998_v0 }
0x10a7   : > { %6251 = vmatpush3.msra.mxu0 %v5188_v52 }
0x10a8   : > { %6252 = vmatprep.subr.mxu0 %v6998_v0 }
0x10a9   : > { %6253 = vmatpush3.msra.mxu0 %v5187_v61 }
0x10aa   : > { %6254 = vmatprep.subr.mxu0 %v6998_v0 }
0x10ab   : > { %6255 = vmatpush3.msra.mxu0 %v5186_v57 }
0x114c   : > { %v5032_v28 = vpop.f32.mrf.mxu0 }
0x114d   : > { %v5033_v29 = vadd.f32 %v5032_v28, %v4959_v14 }
0x114e   : > { %v5034_v31 = vpop.f32.mrf.mxu0 }
0x114f   : > { %v5035_v33 = vadd.f32 %v5034_v31, %v4963_v27  ;;  %v5037_v36 = vmax.f32 %v5033_v29, 0.0 }
0x1151   : > { %v5038_v34 = vmax.f32 %v5035_v33, 0.0 }
0x1153   : > { %5142 = vmatprep.mubr.f32.mxu1 %v5038_v34 }
0x1154   : > { %5143 = vmatmul.mubr.f32.vlgmr.msra.gmra.mxu1 %v5037_v36 }
0x1214   : > { %v5837_v37 = vpop.f32.mrf.mxu1 }
0x1216   : > { %v5838_v40 = vpop.f32.mrf.mxu1 }
0x1217   : > { %v5839_v41 = vadd.f32 %v5838_v40, %v5837_v37 }
0x1219   : > { %v5145_v30 = vadd.f32 %v5839_v41, %v5593_v39 }
0x121b   : > { %v7959_v42 = vadd.f32 %v5145_v30, %v4921_v35 }
0x121d   : > { %5151 = vadd.xlane.f32.xlu0 %v7959_v42  ;;  %v5154_v9 = vmul.f32 %v7959_v42, %v7959_v42 }
0x1221   : > { %5155 = vadd.xlane.f32.xlu0 %v5154_v9 }
0x12a6   : > { %v5152_v13 = vpop.xlane.xlu0 %5151 }
0x12a7   : > { %v5153_v58 = vmul.f32 0.0078125, %v5152_v13 }
0x12a9   : > { %v5158_v54 = vmul.f32 %v5153_v58, %v5153_v58  ;;  %v5160_v63 = vsub.f32 %v7959_v42, %v5153_v58 }
0x12aa   : > { %v5156_v59 = vpop.xlane.xlu0 %5155 }
0x12ab   : > { %v5157_v60 = vmul.f32 0.0078125, %v5156_v59 }
0x12ad   : > { %v5159_v62 = vsub.f32 %v5157_v60, %v5158_v54 }
0x12af   : > { %v5161_v20 = vadd.f32 1e-05, %v5159_v62 }
0x12b1   : > { %6512 = vrsqrt.f32 %v5161_v20 }
0x12be   : > { %v6513_v2 = vpop.eup %6512 }
0x12bf   : > { %v5163_v4 = vmul.f32 %v6513_v2, %v5160_v63 }
0x12c1   : > { %v5170_v5 = vmul.f32 %v5594_v3, %v5163_v4 }
0x12c3   : > { %v5177_v0 = vadd.f32 %v5595_v1, %v5170_v5 }
0x12c5   : > { %v5178_v6 = vrot.slane %v5177_v0, 4 }
0x12c7   : > { %v5179_v7 = vadd.f32 %v5178_v6, %v5177_v0 }
0x12c9   : > { %v5180_v10 = vrot.slane %v5179_v7, 2 }
0x12cb   : > { %v5181_v11 = vadd.f32 %v5180_v10, %v5179_v7 }
0x12cd   : > { %v5182_v12 = vrot.slane %v5181_v11, 1 }
0x12cf   : > { %v5183_v15 = vadd.f32 %v5182_v12, %v5181_v11 }
0x12d1   : > { %v5185_v16 = vmul.f32 0.125, %v5183_v15 }
0x12d3   : > { %6257 = vmatmul.mubr.f32.vlgmr.msra.gmra.mxu0 %v5185_v16 }
0x1393   : > { %v5269_v18 = vpop.f32.mrf.mxu0 }
0x1394   : > { %v5270_v35 = vadd.f32 %v5269_v18, %v5202_v17 }
0x1395   : > { %v6258_v19 = vpop.f32.mrf.mxu0 }
0x1396   : > { %5274 = vst.msk [vmem:[%s1314_s2] sm:$0x1] %vm5273_vm6, %v5270_v35 }
0x1397   : > { %6867 = shalt.err (!%p6864_p11)
}
0x1398   : > { %s6868_s8 = scalar_lea.hbm %s8002_s9, 16  ;;  %s6872_s4 = scalar_lea.hbm %s8129_s13, 32 }
0x1399   : > { %p6869_p0 = scmp.ne.s32.totalorder %s8002_s9, %s6868_s8  ;;  %p6873_p2 = scmp.lt.s32.totalorder %s8002_s9, %s8129_s13 }
0x139a   : > { %p6874_p7 = scmp.lt.s32.totalorder %s6872_s4, %s6868_s8 }
0x139b   : > { %p6870_p13 = pnand %p6869_p0, %p8130_p1 }
0x139c   : > { %p6875_p8 = por %p6874_p7, %p6873_p2 }
0x139d   : > { %p6871_p12 = pneg %p6870_p13 }
0x139f   : > { %p6876_p10 = pnand %p6875_p8, %p6871_p12 }
0x13a1   : > { %6879 = shalt.err (!%p6876_p10)
}
0x13a2   : > { %6309 = dma.vmem_to_hbm [thread:$0]  (%p8130_p1), %s5289_s23, 16, %s8002_s9, %s5276_s3  }
0x13a3 PF: > { %s5300_s22 = sand.u32 1, %s6930_s7   ;;  %p8131_p3 = scmp.ne.s32.totalorder %s8090_s26, 0 }
0x13a4   : > { %p8132_p6 = scmp.ge.s32.totalorder %s6942_s15, 2  ;;  %s5301_s12 = scalar_lea.sflag [#allocation4], %s5300_s22 }
0x13a6   : > { %p6353_p4 = pnand %p8132_p6, %p8131_p3 }
0x13a8   : > { %p6354_p5 = pneg %p6353_p4 }
0x13aa   : > { %6925 = dma.done.wait (%p6354_p5), %s5301_s12, 16  }
0x13ab   : > { %6927 = vsyncadd (%p6354_p5), %s5301_s12, 4294967280  ;;  %p94_p9 = scmp.ge.s32.totalorder %s7358_s0, 4   ;;  %s8133_s7 = smov %s6934_s10 }
0x13ac   : > { %s8134_s10 = smov %s6938_s11  ;;  %s8135_s11 = smov %s7369_s16 }
0x13ad   : > { %s8136_s15 = smov %s7358_s0  ;;  %96 = sbr.rel (!%p94_p9) target bundleno = 82 (0x52), region = 298 }
0x13b2   :  { %5305 = vsyncpa [#allocation3], 1 }
0x13b3   :  { %5307 = vsyncpa [#allocation3 + $0x1], 1 }
0x13b4   :  { %5308 = vsyncpa [#allocation6], 1 }
0x13b5   :  { %5309 = vsyncpa [#allocation9], 1 }
0x13b6   :  { %5310 = vsyncpa [#allocation12], 1 }
0x13b7   :  { %5311 = vsyncpa [#allocation15], 1 }
0x13b8   :  { %5312 = vsyncpa [#allocation18], 1 }
0x13b9   :  { %5313 = vsyncpa [#allocation21], 1 }
0x13ba   :  { %5314 = vsyncpa [#allocation4], 1 }
0x13bb   :  { %5316 = vsyncpa [#allocation4 + $0x1], 1 }

</bundles_post_ra>
